<compile_context>
chip_gen: v5e
topology: v5e:2x2
jax: 0.10.0
libtpu: 0.0.40
codegen_flags: <defaults>
</compile_context>

<pallas_src>
import functools

import jax
import jax.numpy as jnp
from jax.experimental import pallas as pl
from jax.experimental.pallas import tpu as pltpu


def _tap_slab(pad_ref, H, W, C):
    """Build the (HW, 9*C) im2col slab from a zero-padded (H+2, W+2, C) VMEM scratch."""
    taps = [pad_ref[ky:ky + H, kx:kx + W, :].reshape(H * W, C)
            for ky in range(3) for kx in range(3)]
    return jnp.concatenate(taps, axis=1)


def _fused_cnn_kernel(x_slab_ref, w1_ref, b1_ref, w2_ref, b2_ref, w3_ref, b3_ref,
                      o_ref, a1_pad_ref, a2_pad_ref, *, H, W, C_out):
    """One batch element per grid step; every intermediate stays in VMEM."""
    HW = H * W
    C1 = w1_ref.shape[1]          # 64
    C2 = w2_ref.shape[1]          # 128

    # ---- conv1 + ReLU: single matmul on the pre-built im2col slab (K = 32 >= 9*3).
    a1 = jnp.dot(x_slab_ref[0], w1_ref[...], preferred_element_type=jnp.float32)
    a1 = jnp.maximum(a1 + b1_ref[...], 0.0)                        # (HW, C1)

    # Zero-padded halo for conv2, entirely in VMEM scratch (re-zeroed each step so
    # the result is independent of grid order / megacore sharding).
    a1_pad_ref[...] = jnp.zeros_like(a1_pad_ref)
    a1_pad_ref[1:H + 1, 1:W + 1, :] = a1.reshape(H, W, C1)

    # ---- conv2 + ReLU: 9-tap concat -> one deep-K matmul (K = 9*64 = 576).
    slab2 = _tap_slab(a1_pad_ref, H, W, C1)                        # (HW, 576)
    a2 = jnp.dot(slab2, w2_ref[...], preferred_element_type=jnp.float32)
    a2 = jnp.maximum(a2 + b2_ref[...], 0.0)                        # (HW, C2)

    a2_pad_ref[...] = jnp.zeros_like(a2_pad_ref)
    a2_pad_ref[1:H + 1, 1:W + 1, :] = a2.reshape(H, W, C2)

    # ---- conv_final: 9-tap concat, K = 9*128 = 1152.  Cout was zero-padded to 128 in
    # the wrapper, so the transpose below is the tile-aligned (HW,128)->(128,HW) case
    # and the final store is lane-dense along HW.
    slab3 = _tap_slab(a2_pad_ref, H, W, C2)                        # (HW, 1152)
    out = jnp.dot(slab3, w3_ref[...], preferred_element_type=jnp.float32)  # (HW, 128)
    out_t = jnp.transpose(out)[:C_out, :]                          # (3, HW)
    o_ref[0] = (out_t + b3_ref[...]).astype(o_ref.dtype)


def _im2col_3x3(x_nhwc):
    """(N,H,W,C) -> (N, H*W, 9*C) with zero 'same' padding; taps in (ky, kx) order."""
    N, H, W, C = x_nhwc.shape
    xp = jnp.pad(x_nhwc, ((0, 0), (1, 1), (1, 1), (0, 0)))
    taps = [xp[:, ky:ky + H, kx:kx + W, :] for ky in range(3) for kx in range(3)]
    return jnp.concatenate(taps, axis=-1).reshape(N, H * W, 9 * C)


@jax.jit
def simple_cnn_forward(x_nchw, params):
    (w1, b1), (w2, b2), (w3, b3) = params
    N, C_in, H, W = x_nchw.shape
    HW = H * W
    C1, C2, C_out = w1.shape[-1], w2.shape[-1], w3.shape[-1]

    # conv1's im2col slab is built once in the wrapper (only the network input is
    # ever padded); its contraction dim is rounded up for clean sublane alignment.
    x_slab = _im2col_3x3(jnp.transpose(x_nchw, (0, 2, 3, 1)))      # (N, HW, 9*C_in)
    K1 = ((9 * C_in + 7) // 8) * 8                                 # 27 -> 32
    x_slab = jnp.pad(x_slab, ((0, 0), (0, 0), (0, K1 - 9 * C_in)))
    w1_2d = jnp.pad(w1.reshape(9 * C_in, C1), ((0, K1 - 9 * C_in), (0, 0)))  # (32, 64)
    K2 = 9 * C1
    w2_2d = w2.reshape(K2, C2)                                     # (576, 128)
    K3 = 9 * C2
    # Pad Cout 3 -> 128: same number of MXU passes (N <= 256 is one pass), but the
    # in-kernel result transpose becomes the aligned (HW,128)->(128,HW) case.
    w3_2d = jnp.pad(w3.reshape(K3, C_out), ((0, 0), (0, 128 - C_out)))       # (1152, 128)
    b1r, b2r, b3r = b1.reshape(1, C1), b2.reshape(1, C2), b3.reshape(C_out, 1)

    kernel = functools.partial(_fused_cnn_kernel, H=H, W=W, C_out=C_out)

    flops = 2 * N * HW * (K1 * C1 + K2 * C2 + K3 * 128)
    bytes_accessed = 4 * (x_slab.size + w1_2d.size + w2_2d.size + w3_2d.size
                          + b1.size + b2.size + b3.size + N * C_out * HW)

    out = pl.pallas_call(
        kernel,
        out_shape=jax.ShapeDtypeStruct((N, C_out, HW), jnp.float32),
        grid=(N,),
        in_specs=[
            pl.BlockSpec((1, HW, K1), lambda n: (n, 0, 0)),
            pl.BlockSpec((K1, C1), lambda n: (0, 0)),
            pl.BlockSpec((1, C1), lambda n: (0, 0)),
            pl.BlockSpec((K2, C2), lambda n: (0, 0)),
            pl.BlockSpec((1, C2), lambda n: (0, 0)),
            pl.BlockSpec((K3, 128), lambda n: (0, 0)),
            pl.BlockSpec((C_out, 1), lambda n: (0, 0)),
        ],
        out_specs=pl.BlockSpec((1, C_out, HW), lambda n: (n, 0, 0)),
        scratch_shapes=[
            pltpu.VMEM((H + 2, W + 2, C1), jnp.float32),   # padded conv1 activation
            pltpu.VMEM((H + 2, W + 2, C2), jnp.float32),   # padded conv2 activation
        ],
        compiler_params=pltpu.CompilerParams(
            # "parallel" lets v7x shard the batch axis across its two TensorCores;
            # it is a no-op (single TC) on v5e/v6e.
            dimension_semantics=("parallel",),
            vmem_limit_bytes=32 * 1024 * 1024,
        ),
        cost_estimate=pl.CostEstimate(flops=flops, transcendentals=0,
                                      bytes_accessed=bytes_accessed),
    )(x_slab, w1_2d, b1r, w2_2d, b2r, w3_2d, b3r)

    # Lane-dense (N, Cout, HW) -> NCHW is a free reshape (no transpose needed).
    return out.reshape(N, C_out, H, W)


def init_params(key):
    """Deterministic init matching PyTorch Conv2d layer shapes / default init.

    Weights stored as (kH, kW, Cin, Cout) (PyTorch stores (Cout, Cin, kH, kW))."""
    keys = jax.random.split(key, 6)

    def conv_init(kw, kb, cin, cout):
        fan_in = cin * 3 * 3
        bound = 1.0 / jnp.sqrt(fan_in)
        w = jax.random.uniform(kw, (3, 3, cin, cout), jnp.float32, -bound, bound)
        b = jax.random.uniform(kb, (cout,), jnp.float32, -bound, bound)
        return w, b

    w1, b1 = conv_init(keys[0], keys[1], 3, 64)
    w2, b2 = conv_init(keys[2], keys[3], 64, 128)
    w3, b3 = conv_init(keys[4], keys[5], 128, 3)
    return (w1, b1), (w2, b2), (w3, b3)


def _conv_ref(x, w, b):
    y = jax.lax.conv_general_dilated(
        x, w, window_strides=(1, 1), padding="SAME",
        dimension_numbers=("NHWC", "HWIO", "NHWC"))
    return y + b


@jax.jit
def simple_cnn_reference(x_nchw, params):
    (w1, b1), (w2, b2), (w3, b3) = params
    x = jnp.transpose(x_nchw, (0, 2, 3, 1))
    x = jax.nn.relu(_conv_ref(x, w1, b1))
    x = jax.nn.relu(_conv_ref(x, w2, b2))
    x = _conv_ref(x, w3, b3)
    return jnp.transpose(x, (0, 3, 1, 2))


if __name__ == "__main__":
    key = jax.random.PRNGKey(0)
    kx, kp = jax.random.split(key)

    # Shapes consistent with the module: conv1 expects 3 input channels.
    x = jax.random.normal(kx, (2, 3, 16, 16), dtype=jnp.float32)
    params = init_params(kp)

    y = simple_cnn_forward(x, params)
    jax.block_until_ready(y)
    assert y.shape == (2, 3, 16, 16), y.shape

    # Cross-check against a pure-JAX reference (loose tol for MXU f32 rounding).
    y_ref = simple_cnn_reference(x, params)
    max_err = float(jnp.max(jnp.abs(y - y_ref)))
    assert max_err < 1e-2, f"kernel/reference mismatch: max abs err = {max_err}"

    print("KERNEL_OK")
</pallas_src>

<mosaic_0001>
module attributes {stable_mosaic.version = 11 : i64} {
  func.func @_fused_cnn_kernel(%arg0: i32, %arg1: memref<1x256x32xf32, #tpu.memory_space<vmem>>, %arg2: memref<32x64xf32, #tpu.memory_space<vmem>>, %arg3: memref<1x64xf32, #tpu.memory_space<vmem>>, %arg4: memref<576x128xf32, #tpu.memory_space<vmem>>, %arg5: memref<1x128xf32, #tpu.memory_space<vmem>>, %arg6: memref<1152x128xf32, #tpu.memory_space<vmem>>, %arg7: memref<3x1xf32, #tpu.memory_space<vmem>>, %arg8: memref<1x3x256xf32, #tpu.memory_space<vmem>>, %arg9: memref<18x18x64xf32, #tpu.memory_space<vmem>>, %arg10: memref<18x18x128xf32, #tpu.memory_space<vmem>>) attributes {dimension_semantics = [#tpu.dimension_semantics<parallel>], iteration_bounds = array<i64: 2>, scalar_prefetch = 0 : i64, scratch_operands = 2 : i64, tpu.core_type = #tpu.core_type<tc>, window_params = [{transform_indices = @transform_0, window_bounds = array<i64: 1, 256, 32>}, {pipeline_mode = #tpu.pipeline_mode<synchronous>, transform_indices = @transform_1, window_bounds = array<i64: 32, 64>}, {pipeline_mode = #tpu.pipeline_mode<synchronous>, transform_indices = @transform_2, window_bounds = array<i64: 1, 64>}, {pipeline_mode = #tpu.pipeline_mode<synchronous>, transform_indices = @transform_3, window_bounds = array<i64: 576, 128>}, {pipeline_mode = #tpu.pipeline_mode<synchronous>, transform_indices = @transform_4, window_bounds = array<i64: 1, 128>}, {pipeline_mode = #tpu.pipeline_mode<synchronous>, transform_indices = @transform_5, window_bounds = array<i64: 1152, 128>}, {pipeline_mode = #tpu.pipeline_mode<synchronous>, transform_indices = @transform_6, window_bounds = array<i64: 3, 1>}, {transform_indices = @transform_7, window_bounds = array<i64: 1, 3, 256>}]} {
    %c0 = arith.constant 0 : index
    %c0_0 = arith.constant 0 : index
    %c0_1 = arith.constant 0 : index
    %0 = vector.load %arg1[%c0, %c0_0, %c0_1] : memref<1x256x32xf32, #tpu.memory_space<vmem>>, vector<1x256x32xf32>
    %1 = vector.shape_cast %0 : vector<1x256x32xf32> to vector<256x32xf32>
    %c0_2 = arith.constant 0 : index
    %c0_3 = arith.constant 0 : index
    %2 = vector.load %arg2[%c0_2, %c0_3] : memref<32x64xf32, #tpu.memory_space<vmem>>, vector<32x64xf32>
    %cst = arith.constant dense<0.000000e+00> : vector<256x64xf32>
    %3 = tpu.matmul %1, %2, %cst {dimension_numbers = #tpu.dot_dimension_numbers<[1], [0], [0], [1], [0, 0, 1, 1], [], []>} : vector<256x32xf32>, vector<32x64xf32>, vector<256x64xf32> -> vector<256x64xf32>
    %c0_4 = arith.constant 0 : index
    %c0_5 = arith.constant 0 : index
    %4 = vector.load %arg3[%c0_4, %c0_5] : memref<1x64xf32, #tpu.memory_space<vmem>>, vector<1x64xf32>
    %5 = vector.broadcast %4 : vector<1x64xf32> to vector<256x64xf32>
    %6 = arith.addf %3, %5 : vector<256x64xf32>
    %cst_6 = arith.constant 0.000000e+00 : f32
    %7 = vector.broadcast %cst_6 : f32 to vector<256x64xf32>
    %8 = arith.maximumf %6, %7 : vector<256x64xf32>
    %cst_7 = arith.constant 0.000000e+00 : f32
    %9 = vector.broadcast %cst_7 : f32 to vector<18x18x64xf32>
    %c0_8 = arith.constant 0 : index
    %c0_9 = arith.constant 0 : index
    %c0_10 = arith.constant 0 : index
    %10 = vector.load %arg9[%c0_8, %c0_9, %c0_10] : memref<18x18x64xf32, #tpu.memory_space<vmem>>, vector<18x18x64xf32>
    tpu.vector_store %arg9[%c0_8, %c0_9, %c0_10], %9 {strides = array<i32>} : memref<18x18x64xf32, #tpu.memory_space<vmem>>, vector<18x18x64xf32>,
    %11 = vector.shape_cast %8 : vector<256x64xf32> to vector<16x16x64xf32>
    %c1 = arith.constant 1 : index
    %c1_11 = arith.constant 1 : index
    %c0_12 = arith.constant 0 : index
    %12 = vector.load %arg9[%c1, %c1_11, %c0_12] : memref<18x18x64xf32, #tpu.memory_space<vmem>>, vector<16x16x64xf32>
    tpu.vector_store %arg9[%c1, %c1_11, %c0_12], %11 {strides = array<i32>} : memref<18x18x64xf32, #tpu.memory_space<vmem>>, vector<16x16x64xf32>,
    %c0_13 = arith.constant 0 : index
    %c0_14 = arith.constant 0 : index
    %c0_15 = arith.constant 0 : index
    %13 = vector.load %arg9[%c0_13, %c0_14, %c0_15] : memref<18x18x64xf32, #tpu.memory_space<vmem>>, vector<16x16x64xf32>
    %14 = vector.shape_cast %13 : vector<16x16x64xf32> to vector<256x64xf32>
    %c0_16 = arith.constant 0 : index
    %c1_17 = arith.constant 1 : index
    %c0_18 = arith.constant 0 : index
    %15 = vector.load %arg9[%c0_16, %c1_17, %c0_18] : memref<18x18x64xf32, #tpu.memory_space<vmem>>, vector<16x16x64xf32>
    %16 = vector.shape_cast %15 : vector<16x16x64xf32> to vector<256x64xf32>
    %c0_19 = arith.constant 0 : index
    %c2 = arith.constant 2 : index
    %c0_20 = arith.constant 0 : index
    %17 = vector.load %arg9[%c0_19, %c2, %c0_20] : memref<18x18x64xf32, #tpu.memory_space<vmem>>, vector<16x16x64xf32>
    %18 = vector.shape_cast %17 : vector<16x16x64xf32> to vector<256x64xf32>
    %c1_21 = arith.constant 1 : index
    %c0_22 = arith.constant 0 : index
    %c0_23 = arith.constant 0 : index
    %19 = vector.load %arg9[%c1_21, %c0_22, %c0_23] : memref<18x18x64xf32, #tpu.memory_space<vmem>>, vector<16x16x64xf32>
    %20 = vector.shape_cast %19 : vector<16x16x64xf32> to vector<256x64xf32>
    %c1_24 = arith.constant 1 : index
    %c1_25 = arith.constant 1 : index
    %c0_26 = arith.constant 0 : index
    %21 = vector.load %arg9[%c1_24, %c1_25, %c0_26] : memref<18x18x64xf32, #tpu.memory_space<vmem>>, vector<16x16x64xf32>
    %22 = vector.shape_cast %21 : vector<16x16x64xf32> to vector<256x64xf32>
    %c1_27 = arith.constant 1 : index
    %c2_28 = arith.constant 2 : index
    %c0_29 = arith.constant 0 : index
    %23 = vector.load %arg9[%c1_27, %c2_28, %c0_29] : memref<18x18x64xf32, #tpu.memory_space<vmem>>, vector<16x16x64xf32>
    %24 = vector.shape_cast %23 : vector<16x16x64xf32> to vector<256x64xf32>
    %c2_30 = arith.constant 2 : index
    %c0_31 = arith.constant 0 : index
    %c0_32 = arith.constant 0 : index
    %25 = vector.load %arg9[%c2_30, %c0_31, %c0_32] : memref<18x18x64xf32, #tpu.memory_space<vmem>>, vector<16x16x64xf32>
    %26 = vector.shape_cast %25 : vector<16x16x64xf32> to vector<256x64xf32>
    %c2_33 = arith.constant 2 : index
    %c1_34 = arith.constant 1 : index
    %c0_35 = arith.constant 0 : index
    %27 = vector.load %arg9[%c2_33, %c1_34, %c0_35] : memref<18x18x64xf32, #tpu.memory_space<vmem>>, vector<16x16x64xf32>
    %28 = vector.shape_cast %27 : vector<16x16x64xf32> to vector<256x64xf32>
    %c2_36 = arith.constant 2 : index
    %c2_37 = arith.constant 2 : index
    %c0_38 = arith.constant 0 : index
    %29 = vector.load %arg9[%c2_36, %c2_37, %c0_38] : memref<18x18x64xf32, #tpu.memory_space<vmem>>, vector<16x16x64xf32>
    %30 = vector.shape_cast %29 : vector<16x16x64xf32> to vector<256x64xf32>
    %31 = tpu.concatenate %14, %16, %18, %20, %22, %24, %26, %28, %30 in 1 : vector<256x64xf32>, vector<256x64xf32>, vector<256x64xf32>, vector<256x64xf32>, vector<256x64xf32>, vector<256x64xf32>, vector<256x64xf32>, vector<256x64xf32>, vector<256x64xf32> -> vector<256x576xf32>
    %c0_39 = arith.constant 0 : index
    %c0_40 = arith.constant 0 : index
    %32 = vector.load %arg4[%c0_39, %c0_40] : memref<576x128xf32, #tpu.memory_space<vmem>>, vector<576x128xf32>
    %cst_41 = arith.constant dense<0.000000e+00> : vector<256x128xf32>
    %33 = tpu.matmul %31, %32, %cst_41 {dimension_numbers = #tpu.dot_dimension_numbers<[1], [0], [0], [1], [0, 0, 1, 1], [], []>} : vector<256x576xf32>, vector<576x128xf32>, vector<256x128xf32> -> vector<256x128xf32>
    %c0_42 = arith.constant 0 : index
    %c0_43 = arith.constant 0 : index
    %34 = vector.load %arg5[%c0_42, %c0_43] : memref<1x128xf32, #tpu.memory_space<vmem>>, vector<1x128xf32>
    %35 = vector.broadcast %34 : vector<1x128xf32> to vector<256x128xf32>
    %36 = arith.addf %33, %35 : vector<256x128xf32>
    %cst_44 = arith.constant 0.000000e+00 : f32
    %37 = vector.broadcast %cst_44 : f32 to vector<256x128xf32>
    %38 = arith.maximumf %36, %37 : vector<256x128xf32>
    %cst_45 = arith.constant 0.000000e+00 : f32
    %39 = vector.broadcast %cst_45 : f32 to vector<18x18x128xf32>
    %c0_46 = arith.constant 0 : index
    %c0_47 = arith.constant 0 : index
    %c0_48 = arith.constant 0 : index
    %40 = vector.load %arg10[%c0_46, %c0_47, %c0_48] : memref<18x18x128xf32, #tpu.memory_space<vmem>>, vector<18x18x128xf32>
    tpu.vector_store %arg10[%c0_46, %c0_47, %c0_48], %39 {strides = array<i32>} : memref<18x18x128xf32, #tpu.memory_space<vmem>>, vector<18x18x128xf32>,
    %41 = vector.shape_cast %38 : vector<256x128xf32> to vector<16x16x128xf32>
    %c1_49 = arith.constant 1 : index
    %c1_50 = arith.constant 1 : index
    %c0_51 = arith.constant 0 : index
    %42 = vector.load %arg10[%c1_49, %c1_50, %c0_51] : memref<18x18x128xf32, #tpu.memory_space<vmem>>, vector<16x16x128xf32>
    tpu.vector_store %arg10[%c1_49, %c1_50, %c0_51], %41 {strides = array<i32>} : memref<18x18x128xf32, #tpu.memory_space<vmem>>, vector<16x16x128xf32>,
    %c0_52 = arith.constant 0 : index
    %c0_53 = arith.constant 0 : index
    %c0_54 = arith.constant 0 : index
    %43 = vector.load %arg10[%c0_52, %c0_53, %c0_54] : memref<18x18x128xf32, #tpu.memory_space<vmem>>, vector<16x16x128xf32>
    %44 = vector.shape_cast %43 : vector<16x16x128xf32> to vector<256x128xf32>
    %c0_55 = arith.constant 0 : index
    %c1_56 = arith.constant 1 : index
    %c0_57 = arith.constant 0 : index
    %45 = vector.load %arg10[%c0_55, %c1_56, %c0_57] : memref<18x18x128xf32, #tpu.memory_space<vmem>>, vector<16x16x128xf32>
    %46 = vector.shape_cast %45 : vector<16x16x128xf32> to vector<256x128xf32>
    %c0_58 = arith.constant 0 : index
    %c2_59 = arith.constant 2 : index
    %c0_60 = arith.constant 0 : index
    %47 = vector.load %arg10[%c0_58, %c2_59, %c0_60] : memref<18x18x128xf32, #tpu.memory_space<vmem>>, vector<16x16x128xf32>
    %48 = vector.shape_cast %47 : vector<16x16x128xf32> to vector<256x128xf32>
    %c1_61 = arith.constant 1 : index
    %c0_62 = arith.constant 0 : index
    %c0_63 = arith.constant 0 : index
    %49 = vector.load %arg10[%c1_61, %c0_62, %c0_63] : memref<18x18x128xf32, #tpu.memory_space<vmem>>, vector<16x16x128xf32>
    %50 = vector.shape_cast %49 : vector<16x16x128xf32> to vector<256x128xf32>
    %c1_64 = arith.constant 1 : index
    %c1_65 = arith.constant 1 : index
    %c0_66 = arith.constant 0 : index
    %51 = vector.load %arg10[%c1_64, %c1_65, %c0_66] : memref<18x18x128xf32, #tpu.memory_space<vmem>>, vector<16x16x128xf32>
    %52 = vector.shape_cast %51 : vector<16x16x128xf32> to vector<256x128xf32>
    %c1_67 = arith.constant 1 : index
    %c2_68 = arith.constant 2 : index
    %c0_69 = arith.constant 0 : index
    %53 = vector.load %arg10[%c1_67, %c2_68, %c0_69] : memref<18x18x128xf32, #tpu.memory_space<vmem>>, vector<16x16x128xf32>
    %54 = vector.shape_cast %53 : vector<16x16x128xf32> to vector<256x128xf32>
    %c2_70 = arith.constant 2 : index
    %c0_71 = arith.constant 0 : index
    %c0_72 = arith.constant 0 : index
    %55 = vector.load %arg10[%c2_70, %c0_71, %c0_72] : memref<18x18x128xf32, #tpu.memory_space<vmem>>, vector<16x16x128xf32>
    %56 = vector.shape_cast %55 : vector<16x16x128xf32> to vector<256x128xf32>
    %c2_73 = arith.constant 2 : index
    %c1_74 = arith.constant 1 : index
    %c0_75 = arith.constant 0 : index
    %57 = vector.load %arg10[%c2_73, %c1_74, %c0_75] : memref<18x18x128xf32, #tpu.memory_space<vmem>>, vector<16x16x128xf32>
    %58 = vector.shape_cast %57 : vector<16x16x128xf32> to vector<256x128xf32>
    %c2_76 = arith.constant 2 : index
    %c2_77 = arith.constant 2 : index
    %c0_78 = arith.constant 0 : index
    %59 = vector.load %arg10[%c2_76, %c2_77, %c0_78] : memref<18x18x128xf32, #tpu.memory_space<vmem>>, vector<16x16x128xf32>
    %60 = vector.shape_cast %59 : vector<16x16x128xf32> to vector<256x128xf32>
    %61 = tpu.concatenate %44, %46, %48, %50, %52, %54, %56, %58, %60 in 1 : vector<256x128xf32>, vector<256x128xf32>, vector<256x128xf32>, vector<256x128xf32>, vector<256x128xf32>, vector<256x128xf32>, vector<256x128xf32>, vector<256x128xf32>, vector<256x128xf32> -> vector<256x1152xf32>
    %c0_79 = arith.constant 0 : index
    %c0_80 = arith.constant 0 : index
    %62 = vector.load %arg6[%c0_79, %c0_80] : memref<1152x128xf32, #tpu.memory_space<vmem>>, vector<1152x128xf32>
    %cst_81 = arith.constant dense<0.000000e+00> : vector<256x128xf32>
    %63 = tpu.matmul %61, %62, %cst_81 {dimension_numbers = #tpu.dot_dimension_numbers<[1], [0], [0], [1], [0, 0, 1, 1], [], []>} : vector<256x1152xf32>, vector<1152x128xf32>, vector<256x128xf32> -> vector<256x128xf32>
    %64 = tpu.transpose %63, [1, 0] : vector<256x128xf32> -> vector<128x256xf32>
    %65 = vector.extract_strided_slice %64 {offsets = [0, 0], sizes = [3, 256], strides = [1, 1]} : vector<128x256xf32> to vector<3x256xf32>
    %c0_82 = arith.constant 0 : index
    %c0_83 = arith.constant 0 : index
    %66 = vector.load %arg7[%c0_82, %c0_83] : memref<3x1xf32, #tpu.memory_space<vmem>>, vector<3x1xf32>
    %67 = vector.broadcast %66 : vector<3x1xf32> to vector<3x256xf32>
    %68 = arith.addf %65, %67 : vector<3x256xf32>
    %c0_84 = arith.constant 0 : index
    %c0_85 = arith.constant 0 : index
    %c0_86 = arith.constant 0 : index
    %69 = vector.load %arg8[%c0_84, %c0_85, %c0_86] : memref<1x3x256xf32, #tpu.memory_space<vmem>>, vector<1x3x256xf32>
    %70 = vector.shape_cast %69 : vector<1x3x256xf32> to vector<3x256xf32>
    %71 = vector.shape_cast %68 : vector<3x256xf32> to vector<1x3x256xf32>
    tpu.vector_store %arg8[%c0_84, %c0_85, %c0_86], %71 {strides = array<i32>} : memref<1x3x256xf32, #tpu.memory_space<vmem>>, vector<1x3x256xf32>,
    return
  }
  func.func @transform_0(%arg0: i32) -> (i32, i32, i32) {
    %c0_i32 = arith.constant 0 : i32
    %c0_i32_0 = arith.constant 0 : i32
    %c0_i32_1 = arith.constant 0 : i32
    return %arg0, %c0_i32, %c0_i32_0 : i32, i32, i32
  }
  func.func @transform_1(%arg0: i32) -> (i32, i32) {
    %c0_i32 = arith.constant 0 : i32
    %c0_i32_0 = arith.constant 0 : i32
    %c0_i32_1 = arith.constant 0 : i32
    return %c0_i32, %c0_i32_0 : i32, i32
  }
  func.func @transform_2(%arg0: i32) -> (i32, i32) {
    %c0_i32 = arith.constant 0 : i32
    %c0_i32_0 = arith.constant 0 : i32
    %c0_i32_1 = arith.constant 0 : i32
    return %c0_i32, %c0_i32_0 : i32, i32
  }
  func.func @transform_3(%arg0: i32) -> (i32, i32) {
    %c0_i32 = arith.constant 0 : i32
    %c0_i32_0 = arith.constant 0 : i32
    %c0_i32_1 = arith.constant 0 : i32
    return %c0_i32, %c0_i32_0 : i32, i32
  }
  func.func @transform_4(%arg0: i32) -> (i32, i32) {
    %c0_i32 = arith.constant 0 : i32
    %c0_i32_0 = arith.constant 0 : i32
    %c0_i32_1 = arith.constant 0 : i32
    return %c0_i32, %c0_i32_0 : i32, i32
  }
  func.func @transform_5(%arg0: i32) -> (i32, i32) {
    %c0_i32 = arith.constant 0 : i32
    %c0_i32_0 = arith.constant 0 : i32
    %c0_i32_1 = arith.constant 0 : i32
    return %c0_i32, %c0_i32_0 : i32, i32
  }
  func.func @transform_6(%arg0: i32) -> (i32, i32) {
    %c0_i32 = arith.constant 0 : i32
    %c0_i32_0 = arith.constant 0 : i32
    %c0_i32_1 = arith.constant 0 : i32
    return %c0_i32, %c0_i32_0 : i32, i32
  }
  func.func @transform_7(%arg0: i32) -> (i32, i32, i32) {
    %c0_i32 = arith.constant 0 : i32
    %c0_i32_0 = arith.constant 0 : i32
    %c0_i32_1 = arith.constant 0 : i32
    return %arg0, %c0_i32, %c0_i32_0 : i32, i32, i32
  }
}

</mosaic_0001>

<bundles_post_ra>
// kernel: simple_cnn_forward.1
= control target key start
LH: loop header
LB: loop body
LE: loop exit
PB: predicated region body
PF: predicated region fallthrough
CT: control target
= control target key end

     0   :  { %s4512_s24 = smov 0   ;;  %s7652_s0 = inlined_call_operand.vmem [shape: f32[2,256,32], index: 0, kind: input, shape index: {}]   ;;  %s7653_s1 = inlined_call_operand.vmem [shape: f32[32,64], index: 1, kind: input, shape index: {}]   ;;  %s7654_s2 = inlined_call_operand.vmem [shape: f32[1,64], index: 2, kind: input, shape index: {}]   ;;  %s7655_s3 = inlined_call_operand.vmem [shape: f32[576,128], index: 3, kind: input, shape index: {}]   ;;  %s7656_s4 = inlined_call_operand.vmem [shape: f32[1,128], index: 4, kind: input, shape index: {}]   ;;  %s7657_s5 = inlined_call_operand.vmem [shape: f32[1152,128], index: 5, kind: input, shape index: {}]   ;;  %s7658_s6 = inlined_call_operand.vmem [shape: f32[3,1], index: 6, kind: input, shape index: {}]   ;;  %s7659_s7 = inlined_call_operand.vmem [shape: f32[2,3,256], index: 7, kind: output, shape index: {}]  }
   0x1 LB: > { %s4019_s25 = sadd.s32 4294967295, %s4467_s24   ;;  %p4023_p0 = scmp.ge.s32.totalorder %s4467_s24, 1  ;;  %s4467_s24 = sphi %s4512_s24, %s17_s24  }
   0x2   : > { %p237_p1 = scmp.lt.s32.totalorder %s4467_s24, 3 }
   0x4   : > { %p238_p2 = pnand %p4023_p0, %p237_p1 }
   0x6   : > { %241 = sbr.rel (%p238_p2) target bundleno = 1658 (0x67a), region = 48 }
   0xb   : > { %v314_v0 = vld [vmem:[%s7653_s1 + $0x18] sm:$0xff]  ;;  %v313_v1 = vld [vmem:[%s7653_s1 + $0x10] sm:$0xff]  ;;  %p269_p3 = scmp.lt.s32.totalorder %s4019_s25, 1  ;;  %v312_v2 = vld [vmem:[%s7653_s1 + $0x8] sm:$0xff]  ;;  %vm319_vm0 = vcmask 261120   ;;  %vm561_vm1 = vcmask 523264  }
   0xc   : > { %428 = vmatpush.msra.mxu0 %v314_v0  ;;  %4096 = vmatpush.msra.mxu3 %v314_v0  ;;  %v311_v3 = vld [vmem:[%s7653_s1] sm:$0xff]  ;;  %v4469_v21 = vmov 0.0   ;;  %s4470_s15 = smov 64   ;;  %vm564_vm2 = vcmask 517120   ;;  %vm3960_vm3 = vcmask 1043456  }
   0xd   : > { %s7801_s25 = smov (!%p269_p3, %s4019_s25), 1  ;;  %562 = vst.msk [vmem:[#allocation2] sm:$0xff] %vm561_vm1, %v4469_v21  ;;  %v4707_v33 = vld [vmem:[%s7654_s2] ss:$0 sm:$0xff] }
   0xe   : > { %429 = vmatpush.msra.mxu0 %v313_v1  ;;  %4097 = vmatpush.msra.mxu3 %v313_v1  ;;  %s4094_s11 = sshll.u32 %s7801_s25, 8  ;;  %563 = vst.msk [vmem:[#allocation2 + $0x8] sm:$0xff] %vm561_vm1, %v4469_v21  ;;  %s4095_s26 = sshll.u32 %s7801_s25, 3 }
   0xf   : > { %s4538_s14 = scalar_lea.vmem %s7652_s0, %s4094_s11  ;;  %566 = vst.msk [vmem:[#allocation2 + $0x18] sm:$0xff] %vm561_vm1, %v4469_v21  ;;  %s278_s28 = scalar_lea.vmem %s7659_s7, %s4095_s26 }
  0x10   : > { %430 = vmatpush.msra.mxu0 %v312_v2  ;;  %4098 = vmatpush.msra.mxu3 %v312_v2  ;;  %v279_v4 = vld [vmem:[%s4538_s14] sm:$0xff]  ;;  %v305_v5 = vld [vmem:[%s4538_s14 + $0xd0] sm:$0xff]  ;;  %v280_v6 = vld [vmem:[%s4538_s14 + $0x8] sm:$0xff]  ;;  %567 = vst.msk [vmem:[#allocation2 + $0x20] sm:$0xff] %vm561_vm1, %v4469_v21 }
  0x11   : > { %v306_v7 = vld [vmem:[%s4538_s14 + $0xd8] sm:$0xff]  ;;  %v281_v8 = vld [vmem:[%s4538_s14 + $0x10] sm:$0xff]  ;;  %v307_v9 = vld [vmem:[%s4538_s14 + $0xe0] sm:$0xff]  ;;  %569 = vst.msk [vmem:[#allocation2 + $0x30] sm:$0xff] %vm561_vm1, %v4469_v21 }
  0x12   : > { %431 = vmatpush.msra.mxu0 %v311_v3  ;;  %4099 = vmatpush.msra.mxu3 %v311_v3  ;;  %v282_v10 = vld [vmem:[%s4538_s14 + $0x18] sm:$0xff]  ;;  %v308_v11 = vld [vmem:[%s4538_s14 + $0xe8] sm:$0xff]  ;;  %v283_v12 = vld [vmem:[%s4538_s14 + $0x20] sm:$0xff]  ;;  %570 = vst.msk [vmem:[#allocation2 + $0x38] sm:$0xff] %vm561_vm1, %v4469_v21 }
  0x13   : > { %4028 = vmatmul.msk.f32.vlgmr.msra.gmra.mxu0 %vm319_vm0, %v279_v4  ;;  %4054 = vmatmul.msk.f32.vlgmr.msra.gmra.mxu3 %vm319_vm0, %v305_v5  ;;  %v309_v13 = vld [vmem:[%s4538_s14 + $0xf0] sm:$0xff]  ;;  %v284_v14 = vld [vmem:[%s4538_s14 + $0x28] sm:$0xff]  ;;  %v310_v15 = vld [vmem:[%s4538_s14 + $0xf8] sm:$0xff]  ;;  %572 = vst.msk [vmem:[#allocation2 + $0x48] sm:$0xff] %vm561_vm1, %v4469_v21 }
  0x14   : > { %v285_v16 = vld [vmem:[%s4538_s14 + $0x30] sm:$0xff]  ;;  %v286_v17 = vld [vmem:[%s4538_s14 + $0x38] sm:$0xff]  ;;  %v287_v18 = vld [vmem:[%s4538_s14 + $0x40] sm:$0xff]  ;;  %573 = vst.msk [vmem:[#allocation2 + $0x50] sm:$0xff] %vm561_vm1, %v4469_v21 }
  0x15   : > { %v288_v19 = vld [vmem:[%s4538_s14 + $0x48] sm:$0xff]  ;;  %v289_v20 = vld [vmem:[%s4538_s14 + $0x50] sm:$0xff]  ;;  %v290_v22 = vld [vmem:[%s4538_s14 + $0x58] sm:$0xff]  ;;  %575 = vst.msk [vmem:[#allocation2 + $0x60] sm:$0xff] %vm561_vm1, %v4469_v21 }
  0x16   : > { %v682_v23 = vld [vmem:[#allocation2 + $0x1] sm:$0xff]  ;;  %576 = vst.msk [vmem:[#allocation2 + $0x68] sm:$0xff] %vm561_vm1, %v4469_v21  ;;  %v293_v26 = vld [vmem:[%s4538_s14 + $0x70] sm:$0xff]  ;;  %v294_v27 = vld [vmem:[%s4538_s14 + $0x78] sm:$0xff] }
  0x17   : > { %971 = vrot.lane.b32.xlu0 %v682_v23, %s4470_s15  ;;  %578 = vst.msk [vmem:[#allocation2 + $0x78] sm:$0xff] %vm561_vm1, %v4469_v21  ;;  %v291_v24 = vld [vmem:[%s4538_s14 + $0x60] sm:$0xff]  ;;  %v292_v25 = vld [vmem:[%s4538_s14 + $0x68] sm:$0xff]  ;;  %v297_v36 = vld [vmem:[%s4538_s14 + $0x90] sm:$0xff] }
  0x18   : > { %579 = vst.msk [vmem:[#allocation2 + $0x80] sm:$0xff] %vm561_vm1, %v4469_v21  ;;  %v295_v28 = vld [vmem:[%s4538_s14 + $0x80] sm:$0xff]  ;;  %v296_v32 = vld [vmem:[%s4538_s14 + $0x88] sm:$0xff]  ;;  %v298_v41 = vld [vmem:[%s4538_s14 + $0x98] sm:$0xff] }
  0x19   : > { %581 = vst.msk [vmem:[#allocation2 + $0x90] sm:$0xff] %vm561_vm1, %v4469_v21  ;;  %v299_v44 = vld [vmem:[%s4538_s14 + $0xa0] sm:$0xff]  ;;  %v300_v53 = vld [vmem:[%s4538_s14 + $0xa8] sm:$0xff] }
  0x1a   : > { %582 = vst.msk [vmem:[#allocation2 + $0x98] sm:$0xff] %vm561_vm1, %v4469_v21 }
  0x1b   : > { %4029 = vmatmul.msk.f32.gmra.mxu0 %vm319_vm0, %v280_v6  ;;  %4055 = vmatmul.msk.f32.gmra.mxu3 %vm319_vm0, %v306_v7  ;;  %584 = vst.msk [vmem:[#allocation2 + $0xa8] sm:$0xff] %vm561_vm1, %v4469_v21  ;;  %v301_v7 = vld [vmem:[%s4538_s14 + $0xb0] sm:$0xff] }
  0x1c   : > { %585 = vst.msk [vmem:[#allocation2 + $0xb0] sm:$0xff] %vm561_vm1, %v4469_v21 }
  0x1d   : > { %587 = vst.msk [vmem:[#allocation2 + $0xc0] sm:$0xff] %vm561_vm1, %v4469_v21 }
  0x1e   : > { %588 = vst.msk [vmem:[#allocation2 + $0xc8] sm:$0xff] %vm561_vm1, %v4469_v21 }
  0x1f   : > { %590 = vst.msk [vmem:[#allocation2 + $0xd8] sm:$0xff] %vm561_vm1, %v4469_v21 }
  0x20   : > { %591 = vst.msk [vmem:[#allocation2 + $0xe0] sm:$0xff] %vm561_vm1, %v4469_v21 }
  0x21   : > { %593 = vst.msk [vmem:[#allocation2 + $0xf0] sm:$0xff] %vm561_vm1, %v4469_v21 }
  0x22   : > { %594 = vst.msk [vmem:[#allocation2 + $0xf8] sm:$0xff] %vm561_vm1, %v4469_v21 }
  0x23   : > { %4030 = vmatmul.msk.f32.gmra.mxu0 %vm319_vm0, %v281_v8  ;;  %4056 = vmatmul.msk.f32.gmra.mxu3 %vm319_vm0, %v307_v9  ;;  %596 = vst.msk [vmem:[#allocation2 + $0x108] sm:$0xff] %vm561_vm1, %v4469_v21 }
  0x24   : > { %597 = vst.msk [vmem:[#allocation2 + $0x110] sm:$0xff] %vm561_vm1, %v4469_v21 }
  0x25   : > { %599 = vst.msk [vmem:[#allocation2 + $0x120] sm:$0xff] %vm561_vm1, %v4469_v21 }
  0x26   : > { %600 = vst.msk [vmem:[#allocation2 + $0x128] sm:$0xff] %vm561_vm1, %v4469_v21 }
  0x27   : > { %602 = vst.msk [vmem:[#allocation2 + $0x138] sm:$0xff] %vm561_vm1, %v4469_v21 }
  0x28   : > { %603 = vst.msk [vmem:[#allocation2 + $0x140] sm:$0xff] %vm561_vm1, %v4469_v21 }
  0x29   : > { %605 = vst.msk [vmem:[#allocation2 + $0x150] sm:$0xff] %vm561_vm1, %v4469_v21 }
  0x2a   : > { %606 = vst.msk [vmem:[#allocation2 + $0x158] sm:$0xff] %vm561_vm1, %v4469_v21 }
  0x2b   : > { %4031 = vmatmul.msk.f32.gmra.mxu0 %vm319_vm0, %v282_v10  ;;  %4057 = vmatmul.msk.f32.gmra.mxu3 %vm319_vm0, %v308_v11  ;;  %608 = vst.msk [vmem:[#allocation2 + $0x168] sm:$0xff] %vm561_vm1, %v4469_v21 }
  0x2c   : > { %609 = vst.msk [vmem:[#allocation2 + $0x170] sm:$0xff] %vm561_vm1, %v4469_v21 }
  0x2d   : > { %611 = vst.msk [vmem:[#allocation2 + $0x180] sm:$0xff] %vm561_vm1, %v4469_v21 }
  0x2e   : > { %612 = vst.msk [vmem:[#allocation2 + $0x188] sm:$0xff] %vm561_vm1, %v4469_v21 }
  0x2f   : > { %614 = vst.msk [vmem:[#allocation2 + $0x198] sm:$0xff] %vm561_vm1, %v4469_v21 }
  0x30   : > { %615 = vst.msk [vmem:[#allocation2 + $0x1a0] sm:$0xff] %vm561_vm1, %v4469_v21 }
  0x31   : > { %2348 = vst [vmem:[#allocation3] sm:$0xff] %v4469_v21 }
  0x32   : > { %2349 = vst [vmem:[#allocation3 + $0x8] sm:$0xff] %v4469_v21 }
  0x33   : > { %4032 = vmatmul.msk.f32.gmra.mxu0 %vm319_vm0, %v283_v12  ;;  %4058 = vmatmul.msk.f32.gmra.mxu3 %vm319_vm0, %v309_v13  ;;  %2350 = vst [vmem:[#allocation3 + $0x10] sm:$0x3] %v4469_v21  ;;  %v1594_v12 = vld [vmem:[%s7655_s3 + $0x78] sm:$0xff]  ;;  %v1593_v13 = vld [vmem:[%s7655_s3 + $0x70] sm:$0xff] }
  0x34   : > { %2351 = vst [vmem:[#allocation3 + $0x18] sm:$0xff] %v4469_v21  ;;  %1751 = vmatpush.msra.mxu1 %v1594_v12  ;;  %4100 = vmatpush.msrb.mxu3 %v1594_v12  ;;  %v651_v12 = vld [vmem:[#allocation2 + $0x8] sm:$0xff] }
  0x35   : > { %2352 = vst [vmem:[#allocation3 + $0x20] sm:$0xff] %v4469_v21 }
  0x36   : > { %2353 = vst [vmem:[#allocation3 + $0x28] sm:$0x3] %v4469_v21  ;;  %1752 = vmatpush.msra.mxu1 %v1593_v13  ;;  %4101 = vmatpush.msrb.mxu3 %v1593_v13 }
  0x37   : > { %2354 = vst [vmem:[#allocation3 + $0x30] sm:$0xff] %v4469_v21 }
  0x38   : > { %2355 = vst [vmem:[#allocation3 + $0x38] sm:$0xff] %v4469_v21 }
  0x39   : > { %2356 = vst [vmem:[#allocation3 + $0x40] sm:$0x3] %v4469_v21 }
  0x3a   : > { %2357 = vst [vmem:[#allocation3 + $0x48] sm:$0xff] %v4469_v21 }
  0x3b   : > { %4033 = vmatmul.msk.f32.gmra.mxu0 %vm319_vm0, %v284_v14  ;;  %4059 = vmatmul.msk.f32.gmra.mxu3 %vm319_vm0, %v310_v15  ;;  %2358 = vst [vmem:[#allocation3 + $0x50] sm:$0xff] %v4469_v21 }
  0x3c   : > { %2359 = vst [vmem:[#allocation3 + $0x58] sm:$0x3] %v4469_v21 }
  0x3d   : > { %2360 = vst [vmem:[#allocation3 + $0x60] sm:$0xff] %v4469_v21 }
  0x3e   : > { %2361 = vst [vmem:[#allocation3 + $0x68] sm:$0xff] %v4469_v21 }
  0x3f   : > { %2362 = vst [vmem:[#allocation3 + $0x70] sm:$0x3] %v4469_v21 }
  0x40   : > { %2363 = vst [vmem:[#allocation3 + $0x78] sm:$0xff] %v4469_v21 }
  0x41   : > { %2364 = vst [vmem:[#allocation3 + $0x80] sm:$0xff] %v4469_v21 }
  0x42   : > { %2365 = vst [vmem:[#allocation3 + $0x88] sm:$0x3] %v4469_v21 }
  0x43   : > { %4034 = vmatmul.msk.f32.gmra.mxu0 %vm319_vm0, %v285_v16  ;;  %2366 = vst [vmem:[#allocation3 + $0x90] sm:$0xff] %v4469_v21  ;;  %v1592_v16 = vld [vmem:[%s7655_s3 + $0x68] sm:$0xff] }
  0x44   : > { %2367 = vst [vmem:[#allocation3 + $0x98] sm:$0xff] %v4469_v21  ;;  %1753 = vmatpush.msra.mxu1 %v1592_v16  ;;  %4102 = vmatpush.msrb.mxu3 %v1592_v16 }
  0x45   : > { %2368 = vst [vmem:[#allocation3 + $0xa0] sm:$0x3] %v4469_v21 }
  0x46   : > { %2369 = vst [vmem:[#allocation3 + $0xa8] sm:$0xff] %v4469_v21 }
  0x47   : > { %2370 = vst [vmem:[#allocation3 + $0xb0] sm:$0xff] %v4469_v21 }
  0x48   : > { %2371 = vst [vmem:[#allocation3 + $0xb8] sm:$0x3] %v4469_v21 }
  0x49   : > { %2372 = vst [vmem:[#allocation3 + $0xc0] sm:$0xff] %v4469_v21 }
  0x4a   : > { %2373 = vst [vmem:[#allocation3 + $0xc8] sm:$0xff] %v4469_v21 }
  0x4b   : > { %4035 = vmatmul.msk.f32.gmra.mxu0 %vm319_vm0, %v286_v17  ;;  %2374 = vst [vmem:[#allocation3 + $0xd0] sm:$0x3] %v4469_v21 }
  0x4c   : > { %2375 = vst [vmem:[#allocation3 + $0xd8] sm:$0xff] %v4469_v21 }
  0x4d   : > { %2376 = vst [vmem:[#allocation3 + $0xe0] sm:$0xff] %v4469_v21 }
  0x4e   : > { %2377 = vst [vmem:[#allocation3 + $0xe8] sm:$0x3] %v4469_v21 }
  0x4f   : > { %2378 = vst [vmem:[#allocation3 + $0xf0] sm:$0xff] %v4469_v21 }
  0x50   : > { %2379 = vst [vmem:[#allocation3 + $0xf8] sm:$0xff] %v4469_v21 }
  0x51   : > { %2380 = vst [vmem:[#allocation3 + $0x100] sm:$0x3] %v4469_v21 }
  0x52   : > { %2381 = vst [vmem:[#allocation3 + $0x108] sm:$0xff] %v4469_v21 }
  0x53   : > { %4036 = vmatmul.msk.f32.gmra.mxu0 %vm319_vm0, %v287_v18  ;;  %2382 = vst [vmem:[#allocation3 + $0x110] sm:$0xff] %v4469_v21 }
  0x54   : > { %2383 = vst [vmem:[#allocation3 + $0x118] sm:$0x3] %v4469_v21 }
  0x55   : > { %2384 = vst [vmem:[#allocation3 + $0x120] sm:$0xff] %v4469_v21 }
  0x56   : > { %2385 = vst [vmem:[#allocation3 + $0x128] sm:$0xff] %v4469_v21 }
  0x57   : > { %2386 = vst [vmem:[#allocation3 + $0x130] sm:$0x3] %v4469_v21 }
  0x58   : > { %2387 = vst [vmem:[#allocation3 + $0x138] sm:$0xff] %v4469_v21 }
  0x59   : > { %2388 = vst [vmem:[#allocation3 + $0x140] sm:$0xff] %v4469_v21 }
  0x5a   : > { %2389 = vst [vmem:[#allocation3 + $0x148] sm:$0x3] %v4469_v21 }
  0x5b   : > { %4037 = vmatmul.msk.f32.gmra.mxu0 %vm319_vm0, %v288_v19  ;;  %2390 = vst [vmem:[#allocation3 + $0x150] sm:$0xff] %v4469_v21 }
  0x5c   : > { %2391 = vst [vmem:[#allocation3 + $0x158] sm:$0xff] %v4469_v21 }
  0x5d   : > { %2392 = vst [vmem:[#allocation3 + $0x160] sm:$0x3] %v4469_v21 }
  0x5e   : > { %2393 = vst [vmem:[#allocation3 + $0x168] sm:$0xff] %v4469_v21 }
  0x5f   : > { %2394 = vst [vmem:[#allocation3 + $0x170] sm:$0xff] %v4469_v21 }
  0x60   : > { %2395 = vst [vmem:[#allocation3 + $0x178] sm:$0x3] %v4469_v21 }
  0x61   : > { %2396 = vst [vmem:[#allocation3 + $0x180] sm:$0xff] %v4469_v21 }
  0x62   : > { %2397 = vst [vmem:[#allocation3 + $0x188] sm:$0xff] %v4469_v21 }
  0x63   : > { %4038 = vmatmul.msk.f32.gmra.mxu0 %vm319_vm0, %v289_v20  ;;  %2398 = vst [vmem:[#allocation3 + $0x190] sm:$0x3] %v4469_v21  ;;  %v302_v20 = vld [vmem:[%s4538_s14 + $0xb8] sm:$0xff] }
  0x64   : > { %2399 = vst [vmem:[#allocation3 + $0x198] sm:$0xff] %v4469_v21 }
  0x65   : > { %2400 = vst [vmem:[#allocation3 + $0x1a0] sm:$0xff] %v4469_v21 }
  0x66   : > { %2401 = vst [vmem:[#allocation3 + $0x1a8] sm:$0x3] %v4469_v21 }
  0x67   : > { %565 = vst.msk [vmem:[#allocation2 + $0x10] sm:$0x3] %vm564_vm2, %v4469_v21 }
  0x68   : > { %568 = vst.msk [vmem:[#allocation2 + $0x28] sm:$0x3] %vm564_vm2, %v4469_v21 }
  0x69   : > { %571 = vst.msk [vmem:[#allocation2 + $0x40] sm:$0x3] %vm564_vm2, %v4469_v21 }
  0x6a   : > { %574 = vst.msk [vmem:[#allocation2 + $0x58] sm:$0x3] %vm564_vm2, %v4469_v21 }
  0x6b   : > { %4039 = vmatmul.msk.f32.gmra.mxu0 %vm319_vm0, %v290_v22  ;;  %577 = vst.msk [vmem:[#allocation2 + $0x70] sm:$0x3] %vm564_vm2, %v4469_v21 }
  0x6c   : > { %580 = vst.msk [vmem:[#allocation2 + $0x88] sm:$0x3] %vm564_vm2, %v4469_v21 }
  0x6d   : > { %583 = vst.msk [vmem:[#allocation2 + $0xa0] sm:$0x3] %vm564_vm2, %v4469_v21 }
  0x6e   : > { %v683_v46 = vld [vmem:[#allocation2 + $0x9] sm:$0xff]  ;;  %586 = vst.msk [vmem:[#allocation2 + $0xb8] sm:$0x3] %vm564_vm2, %v4469_v21 }
  0x6f   : > { %973 = vrot.lane.b32.xlu0 %v683_v46, %s4470_s15  ;;  %589 = vst.msk [vmem:[#allocation2 + $0xd0] sm:$0x3] %vm564_vm2, %v4469_v21 }
  0x70   : > { %592 = vst.msk [vmem:[#allocation2 + $0xe8] sm:$0x3] %vm564_vm2, %v4469_v21 }
  0x71   : > { %595 = vst.msk [vmem:[#allocation2 + $0x100] sm:$0x3] %vm564_vm2, %v4469_v21 }
  0x72   : > { %598 = vst.msk [vmem:[#allocation2 + $0x118] sm:$0x3] %vm564_vm2, %v4469_v21 }
  0x73   : > { %4040 = vmatmul.msk.f32.gmra.mxu0 %vm319_vm0, %v291_v24  ;;  %601 = vst.msk [vmem:[#allocation2 + $0x130] sm:$0x3] %vm564_vm2, %v4469_v21 }
  0x74   : > { %604 = vst.msk [vmem:[#allocation2 + $0x148] sm:$0x3] %vm564_vm2, %v4469_v21 }
  0x75   : > { %607 = vst.msk [vmem:[#allocation2 + $0x160] sm:$0x3] %vm564_vm2, %v4469_v21 }
  0x76   : > { %610 = vst.msk [vmem:[#allocation2 + $0x178] sm:$0x3] %vm564_vm2, %v4469_v21 }
  0x77   : > { %613 = vst.msk [vmem:[#allocation2 + $0x190] sm:$0x3] %vm564_vm2, %v4469_v21 }
  0x78   : > { %616 = vst.msk [vmem:[#allocation2 + $0x1a8] sm:$0x3] %vm564_vm2, %v4469_v21 }
  0x7b   : > { %4041 = vmatmul.msk.f32.gmra.mxu0 %vm319_vm0, %v292_v25  ;;  %v1591_v25 = vld [vmem:[%s7655_s3 + $0x60] sm:$0xff] }
  0x7c   : > { %1754 = vmatpush.msra.mxu1 %v1591_v25  ;;  %4103 = vmatpush.msrb.mxu3 %v1591_v25 }
  0x83   : > { %4042 = vmatmul.msk.f32.gmra.mxu0 %vm319_vm0, %v293_v26  ;;  %v1590_v26 = vld [vmem:[%s7655_s3 + $0x58] sm:$0xff] }
  0x84   : > { %1755 = vmatpush.msra.mxu1 %v1590_v26  ;;  %4104 = vmatpush.msrb.mxu3 %v1590_v26 }
  0x8b   : > { %4043 = vmatmul.msk.f32.gmra.mxu0 %vm319_vm0, %v294_v27  ;;  %v1589_v27 = vld [vmem:[%s7655_s3 + $0x50] sm:$0xff] }
  0x8c   : > { %1756 = vmatpush.msra.mxu1 %v1589_v27  ;;  %4105 = vmatpush.msrb.mxu3 %v1589_v27 }
  0x90   : > { %v433_v29 = vpop.f32.mrf.mxu0 }
  0x91   : > { %v434_v37 = vadd.f32 %v4707_v33, %v433_v29 }
  0x93   : > { %4044 = vmatmul.msk.f32.gmra.mxu0 %vm319_vm0, %v295_v28  ;;  %v529_v38 = vmax.f32 %v434_v37, 0.0 }
  0x95   : > { %618 = vst.msk [vmem:[#allocation2 + $0x19] sm:$0xff] %vm561_vm1, %v529_v38 }
  0x96   : > { %v511_v31 = vpop.f32.mrf.mxu3 }
  0x97   : > { %v512_v48 = vadd.f32 %v4707_v33, %v511_v31  ;;  %v303_v31 = vld [vmem:[%s4538_s14 + $0xc0] sm:$0xff] }
  0x98   : > { %v436_v30 = vpop.f32.mrf.mxu0 }
  0x99   : > { %v437_v47 = vadd.f32 %v4707_v33, %v436_v30  ;;  %v555_v56 = vmax.f32 %v512_v48, 0.0  ;;  %v1588_v30 = vld [vmem:[%s7655_s3 + $0x48] sm:$0xff] }
  0x9a   : > { %1757 = vmatpush.msra.mxu1 %v1588_v30  ;;  %4106 = vmatpush.msrb.mxu3 %v1588_v30 }
  0x9b   : > { %4045 = vmatmul.msk.f32.gmra.mxu0 %vm319_vm0, %v296_v32  ;;  %v530_v54 = vmax.f32 %v437_v47, 0.0  ;;  %644 = vst.msk [vmem:[#allocation2 + $0x151] sm:$0xff] %vm561_vm1, %v555_v56  ;;  %v1580_v47 = vld [vmem:[%s7655_s3 + $0x8] sm:$0xff] }
  0x9c   : > { %v684_v45 = vld [vmem:[#allocation2 + $0x19] sm:$0xff] }
  0x9d   : > { %975 = vrot.lane.b32.xlu1 %v684_v45, %s4470_s15  ;;  %619 = vst.msk [vmem:[#allocation2 + $0x21] sm:$0xff] %vm561_vm1, %v530_v54 }
  0x9e   : > { %v514_v35 = vpop.f32.mrf.mxu3 }
  0x9f   : > { %v515_v51 = vadd.f32 %v4707_v33, %v514_v35  ;;  %v1586_v35 = vld [vmem:[%s7655_s3 + $0x38] sm:$0xff] }
  0xa0   : > { %v439_v34 = vpop.f32.mrf.mxu0 }
  0xa1   : > { %v440_v50 = vadd.f32 %v4707_v33, %v439_v34  ;;  %v556_v60 = vmax.f32 %v515_v51, 0.0  ;;  %v1587_v34 = vld [vmem:[%s7655_s3 + $0x40] sm:$0xff] }
  0xa2   : > { %1758 = vmatpush.msra.mxu1 %v1587_v34  ;;  %4107 = vmatpush.msrb.mxu3 %v1587_v34  ;;  %v650_v51 = vld [vmem:[#allocation2] sm:$0xff] }
  0xa3   : > { %4046 = vmatmul.msk.f32.gmra.mxu0 %vm319_vm0, %v297_v36  ;;  %v531_v58 = vmax.f32 %v440_v50, 0.0  ;;  %645 = vst.msk [vmem:[#allocation2 + $0x159] sm:$0xff] %vm561_vm1, %v556_v60  ;;  %v1585_v36 = vld [vmem:[%s7655_s3 + $0x30] sm:$0xff]  ;;  %v1579_v50 = vld [vmem:[%s7655_s3] sm:$0xff] }
  0xa4   : > { %v685_v14 = vld [vmem:[#allocation2 + $0x21] sm:$0xff]  ;;  %1759 = vmatpush.msra.mxu1 %v1586_v35  ;;  %4108 = vmatpush.msrb.mxu3 %v1586_v35 }
  0xa5   : > { %620 = vst.msk [vmem:[#allocation2 + $0x31] sm:$0xff] %vm561_vm1, %v531_v58  ;;  %977 = vrot.lane.b32.xlu1 %v685_v14, %s4470_s15 }
  0xa6   : > { %v517_v40 = vpop.f32.mrf.mxu3  ;;  %1760 = vmatpush.msra.mxu1 %v1585_v36  ;;  %4109 = vmatpush.msrb.mxu3 %v1585_v36 }
  0xa7   : > { %v518_v57 = vadd.f32 %v4707_v33, %v517_v40  ;;  %v304_v40 = vld [vmem:[%s4538_s14 + $0xc8] sm:$0xff] }
  0xa8   : > { %v442_v39 = vpop.f32.mrf.mxu0 }
  0xa9   : > { %v443_v55 = vadd.f32 %v4707_v33, %v442_v39  ;;  %v557_v0 = vmax.f32 %v518_v57, 0.0  ;;  %v1584_v39 = vld [vmem:[%s7655_s3 + $0x28] sm:$0xff] }
  0xaa   : > { %1761 = vmatpush.msra.mxu1 %v1584_v39  ;;  %4110 = vmatpush.msrb.mxu3 %v1584_v39 }
  0xab   : > { %4047 = vmatmul.msk.f32.gmra.mxu0 %vm319_vm0, %v298_v41  ;;  %v532_v62 = vmax.f32 %v443_v55, 0.0  ;;  %646 = vst.msk [vmem:[#allocation2 + $0x169] sm:$0xff] %vm561_vm1, %v557_v0 }
  0xac   : > { %v4801_v17 = vld [vmem:[#allocation2 + $0x31] sm:$0xff] }
  0xad   : > { %621 = vst.msk [vmem:[#allocation2 + $0x39] sm:$0xff] %vm561_vm1, %v532_v62  ;;  %979 = vrot.lane.b32.xlu2 %v4801_v17, %s4470_s15  ;;  %v4900_v36 = vld [vmem:[#allocation2 + $0x30] sm:$0xff] }
  0xae   : > { %v520_v43 = vpop.f32.mrf.mxu3 }
  0xaf   : > { %v521_v61 = vadd.f32 %v4707_v33, %v520_v43  ;;  %v1582_v43 = vld [vmem:[%s7655_s3 + $0x18] sm:$0xff] }
  0xb0   : > { %v445_v42 = vpop.f32.mrf.mxu0 }
  0xb1   : > { %v446_v59 = vadd.f32 %v4707_v33, %v445_v42  ;;  %v558_v5 = vmax.f32 %v521_v61, 0.0  ;;  %v1583_v42 = vld [vmem:[%s7655_s3 + $0x20] sm:$0xff] }
  0xb2   : > { %1762 = vmatpush.msra.mxu1 %v1583_v42  ;;  %4111 = vmatpush.msrb.mxu3 %v1583_v42 }
  0xb3   : > { %4048 = vmatmul.msk.f32.gmra.mxu0 %vm319_vm0, %v299_v44  ;;  %v533_v3 = vmax.f32 %v446_v59, 0.0  ;;  %647 = vst.msk [vmem:[#allocation2 + $0x171] sm:$0xff] %vm561_vm1, %v558_v5  ;;  %v1581_v44 = vld [vmem:[%s7655_s3 + $0x10] sm:$0xff] }
  0xb4   : > { %v4810_v22 = vld [vmem:[#allocation2 + $0x39] sm:$0xff]  ;;  %1763 = vmatpush.msra.mxu1 %v1582_v43  ;;  %4112 = vmatpush.msrb.mxu3 %v1582_v43 }
  0xb5   : > { %622 = vst.msk [vmem:[#allocation2 + $0x49] sm:$0xff] %vm561_vm1, %v533_v3  ;;  %v4906_v43 = vld [vmem:[#allocation2 + $0x38] sm:$0xff] }
  0xb6   : > { %v523_v52 = vpop.f32.mrf.mxu3  ;;  %1764 = vmatpush.msra.mxu1 %v1581_v44  ;;  %4113 = vmatpush.msrb.mxu3 %v1581_v44 }
  0xb7   : > { %v524_v1 = vadd.f32 %v4707_v33, %v523_v52 }
  0xb8   : > { %v448_v49 = vpop.f32.mrf.mxu0  ;;  %1765 = vmatpush.msra.mxu1 %v1580_v47  ;;  %4114 = vmatpush.msrb.mxu3 %v1580_v47 }
  0xb9   : > { %v449_v63 = vadd.f32 %v4707_v33, %v448_v49  ;;  %v559_v10 = vmax.f32 %v524_v1, 0.0  ;;  %v972_v49 = vpop.permute.xlu0 %971 }
  0xba   : > { %1766 = vmatpush.msra.mxu1 %v1579_v50  ;;  %v1451_v52 = vsel %vm561_vm1, %v650_v51, %v972_v49  ;;  %4115 = vmatpush.msrb.mxu3 %v1579_v50 }
  0xbb   : > { %4049 = vmatmul.msk.f32.gmra.mxu0 %vm319_vm0, %v300_v53  ;;  %v534_v8 = vmax.f32 %v449_v63, 0.0  ;;  %648 = vst.msk [vmem:[#allocation2 + $0x181] sm:$0xff] %vm561_vm1, %v559_v10  ;;  %1767 = vmatmul.f32.vlgmr.msra.gmra.mxu1 %v1451_v52 }
  0xbc   : > { %v4812_v23 = vld [vmem:[#allocation2 + $0x49] sm:$0xff] }
  0xbd   : > { %623 = vst.msk [vmem:[#allocation2 + $0x51] sm:$0xff] %vm561_vm1, %v534_v8  ;;  %v4159_v24 = vpack.i.bf16 %v4812_v23, %v4810_v22  ;;  %v4918_v52 = vld [vmem:[#allocation2 + $0x48] sm:$0xff] }
  0xbe   : > { %v526_v6 = vpop.f32.mrf.mxu3 }
  0xbf   : > { %v527_v9 = vadd.f32 %v4707_v33, %v526_v6  ;;  %4160 = vrot.lane.b32.xlu2 %v4159_v24, %s4470_s15 }
  0xc0   : > { %v451_v2 = vpop.f32.mrf.mxu0 }
  0xc1   : > { %v452_v4 = vadd.f32 %v4707_v33, %v451_v2  ;;  %v560_v15 = vmax.f32 %v527_v9, 0.0 }
  0xc3   : > { %v535_v11 = vmax.f32 %v452_v4, 0.0  ;;  %4050 = vmatmul.msk.f32.gmra.mxu0 %vm319_vm0, %v301_v7  ;;  %649 = vst.msk [vmem:[#allocation2 + $0x189] sm:$0xff] %vm561_vm1, %v560_v15 }
  0xc4   : > { %v4911_v49 = vld [vmem:[#allocation2 + $0x51] sm:$0xff] }
  0xc5   : > { %624 = vst.msk [vmem:[#allocation2 + $0x61] sm:$0xff] %vm561_vm1, %v535_v11 }
  0xc8   : > { %v454_v18 = vpop.f32.mrf.mxu0 }
  0xc9   : > { %v455_v19 = vadd.f32 %v4707_v33, %v454_v18 }
  0xcb   : > { %v536_v21 = vmax.f32 %v455_v19, 0.0  ;;  %4051 = vmatmul.msk.f32.gmra.mxu0 %vm319_vm0, %v302_v20  ;;  %v4887_v20 = vld [vmem:[#allocation2 + $0x18] sm:$0xff] }
  0xcd   : > { %625 = vst.msk [vmem:[#allocation2 + $0x69] sm:$0xff] %vm561_vm1, %v536_v21 }
  0xd0   : > { %v457_v28 = vpop.f32.mrf.mxu0 }
  0xd1   : > { %v458_v29 = vadd.f32 %v4707_v33, %v457_v28 }
  0xd3   : > { %v537_v32 = vmax.f32 %v458_v29, 0.0  ;;  %4052 = vmatmul.msk.f32.gmra.mxu0 %vm319_vm0, %v303_v31  ;;  %v4894_v29 = vld [vmem:[#allocation2 + $0x20] sm:$0xff] }
  0xd5   : > { %626 = vst.msk [vmem:[#allocation2 + $0x79] sm:$0xff] %vm561_vm1, %v537_v32 }
  0xd8   : > { %v460_v37 = vpop.f32.mrf.mxu0 }
  0xd9   : > { %v461_v38 = vadd.f32 %v4707_v33, %v460_v37 }
  0xdb   : > { %v538_v41 = vmax.f32 %v461_v38, 0.0  ;;  %4053 = vmatmul.msk.f32.gmra.mxu0 %vm319_vm0, %v304_v40 }
  0xdd   : > { %627 = vst.msk [vmem:[#allocation2 + $0x81] sm:$0xff] %vm561_vm1, %v538_v41 }
  0xe0   : > { %v463_v45 = vpop.f32.mrf.mxu0 }
  0xe1   : > { %v464_v46 = vadd.f32 %v4707_v33, %v463_v45  ;;  %v974_v14 = vpop.permute.xlu0 %973 }
  0xe2   : > { %v1452_v15 = vsel %vm561_vm1, %v651_v12, %v974_v14 }
  0xe3   : > { %v539_v48 = vmax.f32 %v464_v46, 0.0  ;;  %1770 = vmatmul.f32.gmra.mxu1 %v1452_v15  ;;  %v4974_v15 = vld [vmem:[#allocation2 + $0x169] sm:$0xff] }
  0xe5   : > { %628 = vst.msk [vmem:[#allocation2 + $0x91] sm:$0xff] %vm561_vm1, %v539_v48 }
  0xe8   : > { %v466_v53 = vpop.f32.mrf.mxu0 }
  0xe9   : > { %v467_v54 = vadd.f32 %v4707_v33, %v466_v53 }
  0xeb   : > { %v540_v55 = vmax.f32 %v467_v54, 0.0 }
  0xed   : > { %629 = vst.msk [vmem:[#allocation2 + $0x99] sm:$0xff] %vm561_vm1, %v540_v55 }
  0xf0   : > { %v469_v56 = vpop.f32.mrf.mxu0 }
  0xf1   : > { %v470_v57 = vadd.f32 %v4707_v33, %v469_v56 }
  0xf3   : > { %v541_v58 = vmax.f32 %v470_v57, 0.0  ;;  %v4924_v57 = vld [vmem:[#allocation2 + $0x61] sm:$0xff] }
  0xf4   : > { %v4972_v14 = vld [vmem:[#allocation2 + $0x99] sm:$0xff] }
  0xf5   : > { %630 = vst.msk [vmem:[#allocation2 + $0xa9] sm:$0xff] %vm561_vm1, %v541_v58 }
  0xf8   : > { %v472_v59 = vpop.f32.mrf.mxu0 }
  0xf9   : > { %v473_v60 = vadd.f32 %v4707_v33, %v472_v59 }
  0xfb   : > { %v542_v61 = vmax.f32 %v473_v60, 0.0 }
  0xfd   : > { %631 = vst.msk [vmem:[#allocation2 + $0xb1] sm:$0xff] %vm561_vm1, %v542_v61  ;;  %v1642_v61 = vld [vmem:[%s7655_s3 + $0x1f8] sm:$0xff] }
  0xfe   : > { %2090 = vmatpush.msrb.mxu0 %v1642_v61 }
 0x100   : > { %v475_v62 = vpop.f32.mrf.mxu0 }
 0x101   : > { %v476_v63 = vadd.f32 %v4707_v33, %v475_v62 }
 0x103   : > { %v543_v0 = vmax.f32 %v476_v63, 0.0  ;;  %v4936_v63 = vld [vmem:[#allocation2 + $0x81] sm:$0xff] }
 0x105   : > { %632 = vst.msk [vmem:[#allocation2 + $0xc1] sm:$0xff] %vm561_vm1, %v543_v0  ;;  %v4938_v0 = vld [vmem:[#allocation2 + $0x151] sm:$0xff] }
 0x107   : > { %v980_v32 = vpop.permute.xlu2 %979 }
 0x108   : > { %v478_v1 = vpop.f32.mrf.mxu0  ;;  %v1455_v37 = vsel %vm561_vm1, %v4900_v36, %v980_v32 }
 0x109   : > { %v479_v2 = vadd.f32 %v4707_v33, %v478_v1 }
 0x10b   : > { %v544_v3 = vmax.f32 %v479_v2, 0.0  ;;  %v4940_v2 = vld [vmem:[#allocation2 + $0x69] sm:$0xff] }
 0x10d   : > { %633 = vst.msk [vmem:[#allocation2 + $0xc9] sm:$0xff] %vm561_vm1, %v544_v3 }
 0x10f   : > { %v976_v18 = vpop.permute.xlu1 %975 }
 0x110   : > { %v481_v4 = vpop.f32.mrf.mxu0  ;;  %v1453_v24 = vsel %vm561_vm1, %v4887_v20, %v976_v18  ;;  %v4978_v18 = vld [vmem:[#allocation2 + $0xc1] sm:$0xff] }
 0x111   : > { %v482_v5 = vadd.f32 %v4707_v33, %v481_v4  ;;  %1773 = vmatmul.f32.gmra.mxu1 %v1453_v24 }
 0x113   : > { %v545_v6 = vmax.f32 %v482_v5, 0.0  ;;  %v4184_v5 = vpack.i.bf16 %v4936_v63, %v4938_v0 }
 0x115   : > { %634 = vst.msk [vmem:[#allocation2 + $0xd9] sm:$0xff] %vm561_vm1, %v545_v6  ;;  %v4953_v6 = vld [vmem:[#allocation2 + $0x159] sm:$0xff] }
 0x117   : > { %v978_v28 = vpop.permute.xlu1 %977 }
 0x118   : > { %v484_v7 = vpop.f32.mrf.mxu0  ;;  %v1454_v30 = vsel %vm561_vm1, %v4894_v29, %v978_v28 }
 0x119   : > { %v485_v8 = vadd.f32 %v4707_v33, %v484_v7  ;;  %1776 = vmatmul.f32.gmra.mxu1 %v1454_v30  ;;  %v4161_v39 = vpop.permute.xlu2 %4160  ;;  %v4955_v7 = vld [vmem:[#allocation2 + $0xa9] sm:$0xff] }
 0x11a   : > { %v4162_v42 = vunpack.i.l.bf16 %v4161_v39  ;;  %v4163_v48 = vunpack.i.h.bf16 %v4161_v39 }
 0x11b   : > { %v546_v9 = vmax.f32 %v485_v8, 0.0  ;;  %v4957_v8 = vld [vmem:[#allocation2 + $0x171] sm:$0xff] }
 0x11c   : > { %v1456_v44 = vsel %vm561_vm1, %v4906_v43, %v4162_v42  ;;  %v1457_v53 = vsel %vm561_vm1, %v4918_v52, %v4163_v48  ;;  %v4997_v30 = vld [vmem:[#allocation2 + $0xd9] sm:$0xff]  ;;  %v1641_v48 = vld [vmem:[%s7655_s3 + $0x1f0] sm:$0xff] }
 0x11d   : > { %635 = vst.msk [vmem:[#allocation2 + $0xe1] sm:$0xff] %vm561_vm1, %v546_v9  ;;  %v4959_v9 = vld [vmem:[#allocation2 + $0x79] sm:$0xff]  ;;  %v4229_v32 = vpack.i.bf16 %v4906_v43, %v4997_v30  ;;  %2091 = vmatpush.msrb.mxu0 %v1641_v48  ;;  %v1649_v48 = vld [vmem:[%s7655_s3 + $0x230] sm:$0xff] }
 0x11e   : > { %v776_v43 = vld [vmem:[#allocation2 + $0x180] sm:$0xff] }
 0x120   : > { %v487_v10 = vpop.f32.mrf.mxu0 }
 0x121   : > { %v488_v11 = vadd.f32 %v4707_v33, %v487_v10  ;;  %1779 = vmatmul.f32.gmra.mxu1 %v1455_v37  ;;  %v5012_v37 = vld [vmem:[#allocation2 + $0x158] sm:$0xff] }
 0x122   : > { %v4224_v39 = vpack.i.bf16 %v5012_v37, %v4900_v36 }
 0x123   : > { %v547_v13 = vmax.f32 %v488_v11, 0.0 }
 0x125   : > { %636 = vst.msk [vmem:[#allocation2 + $0xf1] sm:$0xff] %vm561_vm1, %v547_v13  ;;  %v4199_v13 = vpack.i.bf16 %v4955_v7, %v4957_v8 }
 0x128   : > { %v490_v16 = vpop.f32.mrf.mxu0 }
 0x129   : > { %v491_v19 = vadd.f32 %v4707_v33, %v490_v16  ;;  %1782 = vmatmul.f32.gmra.mxu1 %v1456_v44  ;;  %v5029_v44 = vld [vmem:[#allocation2 + $0x170] sm:$0xff] }
 0x12b   : > { %v548_v21 = vmax.f32 %v491_v19, 0.0  ;;  %v4980_v19 = vld [vmem:[#allocation2 + $0xb1] sm:$0xff] }
 0x12d   : > { %637 = vst.msk [vmem:[#allocation2 + $0xf9] sm:$0xff] %vm561_vm1, %v548_v21  ;;  %v4194_v21 = vpack.i.bf16 %v4972_v14, %v4974_v15 }
 0x130   : > { %v493_v25 = vpop.f32.mrf.mxu0 }
 0x131   : > { %v494_v26 = vadd.f32 %v4707_v33, %v493_v25  ;;  %1785 = vmatmul.f32.gmra.mxu1 %v1457_v53  ;;  %v4214_v25 = vpack.i.bf16 %v4894_v29, %v4978_v18 }
 0x133   : > { %v549_v27 = vmax.f32 %v494_v26, 0.0  ;;  %v4991_v26 = vld [vmem:[#allocation2 + $0xc9] sm:$0xff] }
 0x134   : > { %v5027_v42 = vld [vmem:[#allocation2 + $0xf9] sm:$0xff] }
 0x135   : > { %638 = vst.msk [vmem:[#allocation2 + $0x109] sm:$0xff] %vm561_vm1, %v549_v27  ;;  %v4993_v27 = vld [vmem:[#allocation2 + $0x150] sm:$0xff]  ;;  %v4249_v36 = vpack.i.bf16 %v5027_v42, %v776_v43 }
 0x136   : > { %v5111_v43 = vld [vmem:[#allocation2 + $0x52] sm:$0xff] }
 0x138   : > { %v496_v31 = vpop.f32.mrf.mxu0 }
 0x139   : > { %v497_v34 = vadd.f32 %v4707_v33, %v496_v31  ;;  %v4219_v31 = vpack.i.bf16 %v4991_v26, %v4993_v27 }
 0x13b   : > { %v550_v35 = vmax.f32 %v497_v34, 0.0  ;;  %v5008_v34 = vld [vmem:[#allocation2 + $0xe1] sm:$0xff] }
 0x13d   : > { %639 = vst.msk [vmem:[#allocation2 + $0x111] sm:$0xff] %vm561_vm1, %v550_v35  ;;  %v5010_v35 = vld [vmem:[#allocation2 + $0x168] sm:$0xff] }
 0x140   : > { %v499_v38 = vpop.f32.mrf.mxu0 }
 0x141   : > { %v500_v40 = vadd.f32 %v4707_v33, %v499_v38  ;;  %v5014_v38 = vld [vmem:[#allocation2 + $0xf1] sm:$0xff] }
 0x143   : > { %v551_v41 = vmax.f32 %v500_v40, 0.0  ;;  %v5020_v40 = vld [vmem:[#allocation2 + $0x50] sm:$0xff] }
 0x144   : > { %v5046_v53 = vld [vmem:[#allocation2 + $0x111] sm:$0xff] }
 0x145   : > { %640 = vst.msk [vmem:[#allocation2 + $0x121] sm:$0xff] %vm561_vm1, %v551_v41  ;;  %v4244_v41 = vpack.i.bf16 %v5020_v40, %v5014_v38 }
 0x148   : > { %v502_v45 = vpop.f32.mrf.mxu0 }
 0x149   : > { %v503_v46 = vadd.f32 %v4707_v33, %v502_v45  ;;  %v5031_v45 = vld [vmem:[#allocation2 + $0x109] sm:$0xff] }
 0x14b   : > { %v552_v47 = vmax.f32 %v503_v46, 0.0  ;;  %v4239_v46 = vpack.i.bf16 %v5029_v44, %v4918_v52  ;;  %v777_v52 = vld [vmem:[#allocation2 + $0x188] sm:$0xff] }
 0x14c   : > { %v4913_v50 = vld [vmem:[#allocation2 + $0x121] sm:$0xff] }
 0x14d   : > { %641 = vst.msk [vmem:[#allocation2 + $0x129] sm:$0xff] %vm561_vm1, %v552_v47  ;;  %v4164_v51 = vpack.i.bf16 %v4911_v49, %v4913_v50  ;;  %v5036_v47 = vld [vmem:[#allocation2 + $0x68] sm:$0xff] }
 0x14f   : > { %4165 = vrot.lane.b32.xlu0 %v4164_v51, %s4470_s15  ;;  %v4259_v51 = vpack.i.bf16 %v5036_v47, %v5031_v45 }
 0x150   : > { %v505_v54 = vpop.f32.mrf.mxu0 }
 0x151   : > { %v506_v55 = vadd.f32 %v4707_v33, %v505_v54  ;;  %v5048_v54 = vld [vmem:[#allocation2 + $0x60] sm:$0xff] }
 0x152   : > { %v4254_v61 = vpack.i.bf16 %v777_v52, %v5048_v54  ;;  %v5125_v52 = vld [vmem:[#allocation2 + $0xc0] sm:$0xff] }
 0x153   : > { %v553_v56 = vmax.f32 %v506_v55, 0.0  ;;  %v5050_v55 = vld [vmem:[#allocation2 + $0x80] sm:$0xff] }
 0x154   : > { %v4926_v58 = vld [vmem:[#allocation2 + $0x129] sm:$0xff] }
 0x155   : > { %642 = vst.msk [vmem:[#allocation2 + $0x139] sm:$0xff] %vm561_vm1, %v553_v56  ;;  %v4169_v59 = vpack.i.bf16 %v4924_v57, %v4926_v58  ;;  %v5052_v56 = vld [vmem:[#allocation2 + $0x1a] sm:$0xff] }
 0x157   : > { %4170 = vrot.lane.b32.xlu1 %v4169_v59, %s4470_s15  ;;  %v1650_v59 = vld [vmem:[%s7655_s3 + $0x238] sm:$0xff] }
 0x158   : > { %v508_v60 = vpop.f32.mrf.mxu0  ;;  %2211 = vmatpush.msrb.mxu1 %v1650_v59  ;;  %v5129_v59 = vld [vmem:[#allocation2 + $0x6a] sm:$0xff] }
 0x159   : > { %v509_v62 = vadd.f32 %v4707_v33, %v508_v60  ;;  %v4951_v33 = vld [vmem:[#allocation2 + $0x91] sm:$0xff]  ;;  %v4264_v60 = vpack.i.bf16 %v5046_v53, %v5052_v56 }
 0x15a   : > { %v4189_v12 = vpack.i.bf16 %v4951_v33, %v4953_v6  ;;  %2212 = vmatpush.msrb.mxu1 %v1649_v48 }
 0x15b   : > { %v554_v1 = vmax.f32 %v509_v62, 0.0  ;;  %v4274_v62 = vpack.i.bf16 %v5050_v55, %v4801_v17 }
 0x15c   : > { %v4942_v3 = vld [vmem:[#allocation2 + $0x139] sm:$0xff] }
 0x15d   : > { %643 = vst.msk [vmem:[#allocation2 + $0x141] sm:$0xff] %vm561_vm1, %v554_v1  ;;  %v4174_v4 = vpack.i.bf16 %v4940_v2, %v4942_v3  ;;  %v4976_v16 = vld [vmem:[#allocation2 + $0x138] sm:$0xff] }
 0x15e   : > { %v4204_v24 = vpack.i.bf16 %v4980_v19, %v4976_v16  ;;  %v5065_v1 = vld [vmem:[#allocation2 + $0x32] sm:$0xff] }
 0x15f   : > { %4175 = vrot.lane.b32.xlu2 %v4174_v4, %s4470_s15  ;;  %4185 = vrot.lane.b32.xlu1 %v4184_v5, %s4470_s15  ;;  %v5067_v4 = vld [vmem:[#allocation2 + $0x78] sm:$0xff] }
 0x160   : > { %v5069_v5 = vld [vmem:[#allocation2 + $0x98] sm:$0xff] }
 0x164   : > { %v4961_v10 = vld [vmem:[#allocation2 + $0x141] sm:$0xff] }
 0x165   : > { %v4179_v11 = vpack.i.bf16 %v4959_v9, %v4961_v10  ;;  %v4995_v28 = vld [vmem:[#allocation2 + $0x140] sm:$0xff] }
 0x166   : > { %v4209_v29 = vpack.i.bf16 %v4995_v28, %v4887_v20  ;;  %v4234_v20 = vpack.i.bf16 %v5008_v34, %v5010_v35 }
 0x167   : > { %4180 = vrot.lane.b32.xlu0 %v4179_v11, %s4470_s15  ;;  %4190 = vrot.lane.b32.xlu2 %v4189_v12, %s4470_s15  ;;  %v5071_v11 = vld [vmem:[#allocation2 + $0x22] sm:$0xff]  ;;  %v4279_v12 = vpack.i.bf16 %v4810_v22, %v5065_v1  ;;  %v5087_v22 = vld [vmem:[#allocation2 + $0x90] sm:$0xff] }
 0x168   : > { %4200 = vrot.lane.b32.xlu1 %v4199_v13, %s4470_s15  ;;  %v4269_v17 = vpack.i.bf16 %v5071_v11, %v5067_v4  ;;  %v4289_v13 = vpack.i.bf16 %v5069_v5, %v4812_v23 }
 0x16f   : > { %4195 = vrot.lane.b32.xlu0 %v4194_v21, %s4470_s15  ;;  %4205 = vrot.lane.b32.xlu2 %v4204_v24, %s4470_s15  ;;  %v1640_v21 = vld [vmem:[%s7655_s3 + $0x1e8] sm:$0xff] }
 0x170   : > { %4215 = vrot.lane.b32.xlu1 %v4214_v25, %s4470_s15  ;;  %2092 = vmatpush.msrb.mxu0 %v1640_v21  ;;  %v5085_v24 = vld [vmem:[#allocation2 + $0x4a] sm:$0xff]  ;;  %v820_v21 = vld [vmem:[#allocation2 + $0x92] sm:$0xff] }
 0x171   : > { %v5089_v25 = vld [vmem:[#allocation2 + $0xb0] sm:$0xff]  ;;  %v4294_v23 = vpack.i.bf16 %v4911_v49, %v5085_v24  ;;  %v5107_v49 = vld [vmem:[#allocation2 + $0xa8] sm:$0xff] }
 0x177   : > { %4220 = vrot.lane.b32.xlu2 %v4219_v31, %s4470_s15  ;;  %4210 = vrot.lane.b32.xlu0 %v4209_v29, %s4470_s15  ;;  %v5091_v31 = vld [vmem:[#allocation2 + $0x3a] sm:$0xff] }
 0x178   : > { %4230 = vrot.lane.b32.xlu1 %v4229_v32, %s4470_s15  ;;  %v4284_v29 = vpack.i.bf16 %v5091_v31, %v5087_v22  ;;  %v4304_v32 = vpack.i.bf16 %v5089_v25, %v4924_v57 }
 0x17f   : > { %4235 = vrot.lane.b32.xlu2 %v4234_v20, %s4470_s15  ;;  %4225 = vrot.lane.b32.xlu0 %v4224_v39, %s4470_s15  ;;  %v1639_v20 = vld [vmem:[%s7655_s3 + $0x1e0] sm:$0xff] }
 0x180   : > { %4245 = vrot.lane.b32.xlu1 %v4244_v41, %s4470_s15  ;;  %2093 = vmatpush.msrb.mxu0 %v1639_v20  ;;  %v5105_v39 = vld [vmem:[#allocation2 + $0x62] sm:$0xff] }
 0x181   : > { %v5109_v41 = vld [vmem:[#allocation2 + $0xc8] sm:$0xff]  ;;  %v4309_v57 = vpack.i.bf16 %v4940_v2, %v5105_v39  ;;  %v5127_v2 = vld [vmem:[#allocation2 + $0xe0] sm:$0xff] }
 0x182   : > { %v819_v20 = vld [vmem:[#allocation2 + $0x82] sm:$0xff] }
 0x187   : > { %4250 = vrot.lane.b32.xlu2 %v4249_v36, %s4470_s15  ;;  %4240 = vrot.lane.b32.xlu0 %v4239_v46, %s4470_s15  ;;  %v4299_v36 = vpack.i.bf16 %v5111_v43, %v5107_v49  ;;  %v4319_v46 = vpack.i.bf16 %v5109_v41, %v4959_v9 }
 0x188   : > { %4260 = vrot.lane.b32.xlu1 %v4259_v51, %s4470_s15  ;;  %v818_v51 = vld [vmem:[#allocation2 + $0x7a] sm:$0xff] }
 0x189   : > { %v4324_v9 = vpack.i.bf16 %v4936_v63, %v818_v51  ;;  %v1648_v63 = vld [vmem:[%s7655_s3 + $0x228] sm:$0xff]  ;;  %v1607_v51 = vld [vmem:[%s7655_s3 + $0xe0] sm:$0xff] }
 0x18a   : > { %2213 = vmatpush.msrb.mxu1 %v1648_v63 }
 0x18f   : > { %4265 = vrot.lane.b32.xlu2 %v4264_v60, %s4470_s15  ;;  %4255 = vrot.lane.b32.xlu0 %v4254_v61, %s4470_s15  ;;  %v4314_v60 = vpack.i.bf16 %v5129_v59, %v5125_v52  ;;  %v4334_v61 = vpack.i.bf16 %v5127_v2, %v4951_v33  ;;  %v1610_v33 = vld [vmem:[%s7655_s3 + $0xf8] sm:$0xff] }
 0x190   : > { %4275 = vrot.lane.b32.xlu1 %v4274_v62, %s4470_s15  ;;  %v1638_v62 = vld [vmem:[%s7655_s3 + $0x1d8] sm:$0xff]  ;;  %4116 = vmatpush.msra.mxu3 %v1610_v33 }
 0x191   : > { %2094 = vmatpush.msrb.mxu0 %v1638_v62  ;;  %1864 = vmatpush.msra.mxu2 %v1610_v33  ;;  %v5188_v62 = vld [vmem:[#allocation2 + $0x110] sm:$0xff] }
 0x197   : > { %4280 = vrot.lane.b32.xlu2 %v4279_v12, %s4470_s15  ;;  %4270 = vrot.lane.b32.xlu0 %v4269_v17, %s4470_s15  ;;  %v1637_v12 = vld [vmem:[%s7655_s3 + $0x1d0] sm:$0xff] }
 0x198   : > { %4290 = vrot.lane.b32.xlu1 %v4289_v13, %s4470_s15  ;;  %v1609_v17 = vld [vmem:[%s7655_s3 + $0xf0] sm:$0xff]  ;;  %v1636_v13 = vld [vmem:[%s7655_s3 + $0x1c8] sm:$0xff]  ;;  %2095 = vmatpush.msrb.mxu0 %v1637_v12  ;;  %v821_v12 = vld [vmem:[#allocation2 + $0x9a] sm:$0xff] }
 0x199   : > { %4117 = vmatpush.msra.mxu3 %v1609_v17  ;;  %1865 = vmatpush.msra.mxu2 %v1609_v17  ;;  %v1604_v17 = vld [vmem:[%s7655_s3 + $0xc8] sm:$0xff] }
 0x19a   : > { %2096 = vmatpush.msrb.mxu0 %v1636_v13  ;;  %v4364_v13 = vpack.i.bf16 %v5188_v62, %v4978_v18 }
 0x19f   : > { %4295 = vrot.lane.b32.xlu2 %v4294_v23, %s4470_s15  ;;  %4285 = vrot.lane.b32.xlu0 %v4284_v29, %s4470_s15  ;;  %v5157_v23 = vld [vmem:[#allocation2 + $0xd8] sm:$0xff] }
 0x1a0   : > { %4305 = vrot.lane.b32.xlu1 %v4304_v32, %s4470_s15  ;;  %v5159_v29 = vld [vmem:[#allocation2 + $0xf8] sm:$0xff]  ;;  %v1608_v32 = vld [vmem:[%s7655_s3 + $0xe8] sm:$0xff] }
 0x1a1   : > { %4118 = vmatpush.msra.mxu3 %v1608_v32  ;;  %v4349_v48 = vpack.i.bf16 %v5159_v29, %v4955_v7  ;;  %1866 = vmatpush.msra.mxu2 %v1608_v32  ;;  %v1635_v7 = vld [vmem:[%s7655_s3 + $0x1c0] sm:$0xff] }
 0x1a2   : > { %2097 = vmatpush.msrb.mxu0 %v1635_v7 }
 0x1a3   : > { %4119 = vmatpush.msra.mxu3 %v1607_v51  ;;  %1867 = vmatpush.msra.mxu2 %v1607_v51  ;;  %v769_v51 = vld [vmem:[#allocation2 + $0x128] sm:$0xff] }
 0x1a7   : > { %4310 = vrot.lane.b32.xlu2 %v4309_v57, %s4470_s15  ;;  %4300 = vrot.lane.b32.xlu0 %v4299_v36, %s4470_s15  ;;  %v4339_v57 = vpack.i.bf16 %v4972_v14, %v820_v21  ;;  %v4329_v36 = vpack.i.bf16 %v819_v20, %v5157_v23  ;;  %v1606_v14 = vld [vmem:[%s7655_s3 + $0xd8] sm:$0xff]  ;;  %v1603_v21 = vld [vmem:[%s7655_s3 + $0xc0] sm:$0xff] }
 0x1a8   : > { %4320 = vrot.lane.b32.xlu1 %v4319_v46, %s4470_s15  ;;  %v1647_v46 = vld [vmem:[%s7655_s3 + $0x220] sm:$0xff]  ;;  %4120 = vmatpush.msra.mxu3 %v1606_v14  ;;  %v1602_v20 = vld [vmem:[%s7655_s3 + $0xb8] sm:$0xff] }
 0x1a9   : > { %2214 = vmatpush.msrb.mxu1 %v1647_v46  ;;  %1868 = vmatpush.msra.mxu2 %v1606_v14  ;;  %v5208_v46 = vld [vmem:[#allocation2 + $0x108] sm:$0xff]  ;;  %v1601_v14 = vld [vmem:[%s7655_s3 + $0xb0] sm:$0xff] }
 0x1af   : > { %4325 = vrot.lane.b32.xlu2 %v4324_v9, %s4470_s15  ;;  %4315 = vrot.lane.b32.xlu0 %v4314_v60, %s4470_s15  ;;  %v822_v9 = vld [vmem:[#allocation2 + $0xaa] sm:$0xff] }
 0x1b0   : > { %4335 = vrot.lane.b32.xlu1 %v4334_v61, %s4470_s15  ;;  %v5183_v60 = vld [vmem:[#allocation2 + $0xf0] sm:$0xff]  ;;  %v4354_v63 = vpack.i.bf16 %v4980_v19, %v822_v9 }
 0x1b1   : > { %v1605_v61 = vld [vmem:[%s7655_s3 + $0xd0] sm:$0xff]  ;;  %v4344_v33 = vpack.i.bf16 %v821_v12, %v5183_v60 }
 0x1b2   : > { %4121 = vmatpush.msra.mxu3 %v1605_v61  ;;  %1869 = vmatpush.msra.mxu2 %v1605_v61  ;;  %v823_v61 = vld [vmem:[#allocation2 + $0xb2] sm:$0xff] }
 0x1b4   : > { %4122 = vmatpush.msra.mxu3 %v1604_v17  ;;  %1870 = vmatpush.msra.mxu2 %v1604_v17  ;;  %v1634_v17 = vld [vmem:[%s7655_s3 + $0x1b8] sm:$0xff] }
 0x1b5   : > { %2098 = vmatpush.msrb.mxu0 %v1634_v17 }
 0x1b6   : > { %4123 = vmatpush.msra.mxu3 %v1603_v21  ;;  %1871 = vmatpush.msra.mxu2 %v1603_v21  ;;  %v1598_v21 = vld [vmem:[%s7655_s3 + $0x98] sm:$0xff] }
 0x1b7   : > { %4340 = vrot.lane.b32.xlu2 %v4339_v57, %s4470_s15  ;;  %4330 = vrot.lane.b32.xlu0 %v4329_v36, %s4470_s15  ;;  %v824_v36 = vld [vmem:[#allocation2 + $0xc2] sm:$0xff] }
 0x1b8   : > { %4350 = vrot.lane.b32.xlu1 %v4349_v48, %s4470_s15  ;;  %v674_v48 = vld [vmem:[#allocation2 + $0x120] sm:$0xff]  ;;  %4124 = vmatpush.msra.mxu3 %v1602_v20  ;;  %v4369_v12 = vpack.i.bf16 %v4991_v26, %v824_v36  ;;  %v1597_v36 = vld [vmem:[%s7655_s3 + $0x90] sm:$0xff] }
 0x1b9   : > { %v5202_v19 = vpop.permute.xlu2 %4175  ;;  %1872 = vmatpush.msra.mxu2 %v1602_v20  ;;  %v1599_v26 = vld [vmem:[%s7655_s3 + $0xa0] sm:$0xff] }
 0x1ba   : > { %4125 = vmatpush.msra.mxu3 %v1601_v14 }
 0x1bb   : > { %1873 = vmatpush.msra.mxu2 %v1601_v14 }
 0x1bf   : > { %4355 = vrot.lane.b32.xlu2 %v4354_v63, %s4470_s15  ;;  %4345 = vrot.lane.b32.xlu0 %v4344_v33, %s4470_s15  ;;  %v4359_v63 = vpack.i.bf16 %v823_v61, %v5208_v46  ;;  %v1600_v33 = vld [vmem:[%s7655_s3 + $0xa8] sm:$0xff] }
 0x1c0   : > { %4365 = vrot.lane.b32.xlu1 %v4364_v13, %s4470_s15  ;;  %1874 = vmatpush.msra.mxu2 %v1600_v33  ;;  %v825_v61 = vld [vmem:[#allocation2 + $0xca] sm:$0xff] }
 0x1c1   : > { %v4166_v32 = vpop.permute.xlu0 %4165  ;;  %4126 = vmatpush.msra.mxu3 %v1600_v33  ;;  %v1633_v33 = vld [vmem:[%s7655_s3 + $0x1b0] sm:$0xff] }
 0x1c2   : > { %v4168_v18 = vunpack.i.h.bf16 %v4166_v32  ;;  %v4167_v57 = vunpack.i.l.bf16 %v4166_v32  ;;  %1875 = vmatpush.msra.mxu2 %v1599_v26  ;;  %2099 = vmatpush.msrb.mxu0 %v1633_v33  ;;  %v5311_v33 = vld [vmem:[#allocation2 + $0x15a] sm:$0xff] }
 0x1c3   : > { %4127 = vmatpush.msra.mxu3 %v1599_v26 }
 0x1c4   : > { %v1458_v7 = vsel %vm561_vm1, %v5020_v40, %v4168_v18  ;;  %v1475_v9 = vsel %vm561_vm1, %v674_v48, %v4167_v57  ;;  %v4379_v40 = vpack.i.bf16 %v769_v51, %v4997_v30  ;;  %v5234_v30 = vpop.permute.xlu2 %4190  ;;  %v826_v18 = vld [vmem:[#allocation2 + $0xda] sm:$0xff]  ;;  %v828_v57 = vld [vmem:[#allocation2 + $0xf2] sm:$0xff]  ;;  %1876 = vmatpush.msra.mxu2 %v1598_v21 }
 0x1c5   : > { %1788 = vmatmul.f32.gmra.mxu1 %v1458_v7  ;;  %1839 = vmatmul.f32.vlgmr.msrb.gmra.mxu3 %v1475_v9  ;;  %v4384_v14 = vpack.i.bf16 %v5008_v34, %v826_v18  ;;  %v4394_v17 = vpack.i.bf16 %v5027_v42, %v828_v57  ;;  %v1595_v34 = vld [vmem:[%s7655_s3 + $0x80] sm:$0xff]  ;;  %v831_v18 = vld [vmem:[#allocation2 + $0x112] sm:$0xff] }
 0x1c6   : > { %1877 = vmatpush.msra.mxu2 %v1597_v36  ;;  %4128 = vmatpush.msra.mxu3 %v1598_v21  ;;  %v4409_v57 = vpack.i.bf16 %v4913_v50, %v831_v18  ;;  %v1632_v50 = vld [vmem:[%s7655_s3 + $0x1a8] sm:$0xff]  ;;  %v4439_v18 = vpack.i.bf16 %v4974_v15, %v5311_v33  ;;  %v4193_v15 = vunpack.i.h.bf16 %v5234_v30 }
 0x1c7   : > { %4370 = vrot.lane.b32.xlu2 %v4369_v12, %s4470_s15  ;;  %4360 = vrot.lane.b32.xlu0 %v4359_v63, %s4470_s15  ;;  %v4374_v12 = vpack.i.bf16 %v825_v61, %v674_v48  ;;  %v1596_v63 = vld [vmem:[%s7655_s3 + $0x88] sm:$0xff]  ;;  %v4178_v48 = vunpack.i.h.bf16 %v5202_v19  ;;  %v1631_v61 = vld [vmem:[%s7655_s3 + $0x1a0] sm:$0xff] }
 0x1c8   : > { %4380 = vrot.lane.b32.xlu1 %v4379_v40, %s4470_s15  ;;  %1878 = vmatpush.msra.mxu2 %v1596_v63 }
 0x1c9   : > { %v4171_v13 = vpop.permute.xlu1 %4170  ;;  %4129 = vmatpush.msra.mxu3 %v1597_v36  ;;  %v1460_v26 = vsel %vm561_vm1, %v5036_v47, %v4178_v48  ;;  %2100 = vmatpush.msrb.mxu0 %v1632_v50 }
 0x1ca   : > { %v4173_v32 = vunpack.i.h.bf16 %v4171_v13  ;;  %v4172_v20 = vunpack.i.l.bf16 %v4171_v13  ;;  %1879 = vmatpush.msra.mxu2 %v1595_v34  ;;  %v829_v13 = vld [vmem:[#allocation2 + $0xfa] sm:$0xff] }
 0x1cb   : > { %v4399_v21 = vpack.i.bf16 %v5031_v45, %v829_v13  ;;  %4130 = vmatpush.msra.mxu3 %v1596_v63  ;;  %v830_v45 = vld [vmem:[#allocation2 + $0x10a] sm:$0xff]  ;;  %2101 = vmatpush.msrb.mxu0 %v1631_v61 }
 0x1cc   : > { %v1459_v7 = vsel %vm561_vm1, %v5048_v54, %v4173_v32  ;;  %v1476_v9 = vsel %vm561_vm1, %v769_v51, %v4172_v20  ;;  %v1646_v54 = vld [vmem:[%s7655_s3 + $0x218] sm:$0xff]  ;;  %v4177_v51 = vunpack.i.l.bf16 %v5202_v19  ;;  %v5261_v40 = vpop.permute.xlu2 %4205  ;;  %v827_v32 = vld [vmem:[#allocation2 + $0xe2] sm:$0xff]  ;;  %v5355_v61 = vld [vmem:[#allocation2 + $0x16a] sm:$0xff] }
 0x1cd   : > { %1791 = vmatmul.f32.gmra.mxu1 %v1459_v7  ;;  %1842 = vmatmul.f32.gmra.mxu3 %v1476_v9  ;;  %v4389_v20 = vpack.i.bf16 %v5014_v38, %v827_v32  ;;  %v5275_v9 = vld [vmem:[#allocation2 + $0x122] sm:$0xff]  ;;  %v5277_v38 = vld [vmem:[#allocation2 + $0x13a] sm:$0xff]  ;;  %v5323_v32 = vld [vmem:[#allocation2 + $0x12a] sm:$0xff] }
 0x1ce   : > { %2215 = vmatpush.msrb.mxu1 %v1646_v54  ;;  %v1477_v19 = vsel %vm561_vm1, %v4976_v16, %v4177_v51  ;;  %4131 = vmatpush.msra.mxu3 %v1595_v34  ;;  %v4414_v63 = vpack.i.bf16 %v4926_v58, %v5275_v9  ;;  %v4424_v34 = vpack.i.bf16 %v4961_v10, %v5277_v38  ;;  %v1629_v58 = vld [vmem:[%s7655_s3 + $0x190] sm:$0xff]  ;;  %v5309_v51 = vld [vmem:[#allocation2 + $0x142] sm:$0xff] }
 0x1cf   : > { %4385 = vrot.lane.b32.xlu2 %v4384_v14, %s4470_s15  ;;  %4375 = vrot.lane.b32.xlu0 %v4374_v12, %s4470_s15 }
 0x1d0   : > { %4395 = vrot.lane.b32.xlu1 %v4394_v17, %s4470_s15  ;;  %v4404_v17 = vpack.i.bf16 %v5046_v53, %v830_v45 }
 0x1d1   : > { %v4186_v42 = vpop.permute.xlu1 %4185 }
 0x1d2   : > { %v4187_v53 = vunpack.i.l.bf16 %v4186_v42 }
 0x1d4   : > { %v5292_v54 = vpop.permute.xlu2 %4220  ;;  %v1479_v13 = vsel %vm561_vm1, %v4993_v27, %v4187_v53  ;;  %v1645_v27 = vld [vmem:[%s7655_s3 + $0x210] sm:$0xff] }
 0x1d5   : > { %1794 = vmatmul.f32.gmra.mxu1 %v1460_v26  ;;  %1845 = vmatmul.f32.gmra.mxu3 %v1477_v19  ;;  %v1628_v26 = vld [vmem:[%s7655_s3 + $0x188] sm:$0xff] }
 0x1d6   : > { %2216 = vmatpush.msrb.mxu1 %v1645_v27  ;;  %v1622_v27 = vld [vmem:[%s7655_s3 + $0x158] sm:$0xff] }
 0x1d7   : > { %4400 = vrot.lane.b32.xlu2 %v4399_v21, %s4470_s15  ;;  %4390 = vrot.lane.b32.xlu0 %v4389_v20, %s4470_s15  ;;  %v4429_v21 = vpack.i.bf16 %v4938_v0, %v5309_v51  ;;  %v4419_v20 = vpack.i.bf16 %v4942_v3, %v5323_v32  ;;  %v1625_v0 = vld [vmem:[%s7655_s3 + $0x170] sm:$0xff]  ;;  %v2739_v3 = vld [vmem:[%s7657_s5 + $0x78] sm:$0xff] }
 0x1d8   : > { %4410 = vrot.lane.b32.xlu1 %v4409_v57, %s4470_s15  ;;  %v4192_v57 = vunpack.i.l.bf16 %v5234_v30  ;;  %2868 = vmatpush.msrb.mxu2 %v2739_v3  ;;  %v1463_v30 = vsel %vm561_vm1, %v5087_v22, %v4193_v15  ;;  %v1623_v22 = vld [vmem:[%s7655_s3 + $0x160] sm:$0xff] }
 0x1d9   : > { %v4181_v16 = vpop.permute.xlu0 %4180 }
 0x1da   : > { %v4183_v47 = vunpack.i.h.bf16 %v4181_v16  ;;  %v4182_v36 = vunpack.i.l.bf16 %v4181_v16  ;;  %v5273_v7 = vpop.permute.xlu1 %4200 }
 0x1db   : > { %v4202_v3 = vunpack.i.l.bf16 %v5273_v7 }
 0x1dc   : > { %v1461_v14 = vsel %vm561_vm1, %v5067_v4, %v4183_v47  ;;  %v1478_v12 = vsel %vm561_vm1, %v4995_v28, %v4182_v36  ;;  %v1630_v4 = vld [vmem:[%s7655_s3 + $0x198] sm:$0xff]  ;;  %v4188_v28 = vunpack.i.h.bf16 %v4186_v42  ;;  %v1627_v42 = vld [vmem:[%s7655_s3 + $0x180] sm:$0xff]  ;;  %v5347_v16 = vpop.permute.xlu2 %4235 }
 0x1dd   : > { %1797 = vmatmul.f32.gmra.mxu1 %v1461_v14  ;;  %1848 = vmatmul.f32.gmra.mxu3 %v1478_v12  ;;  %v714_v36 = vld [vmem:[#allocation2 + $0x2] sm:$0xff]  ;;  %v5357_v14 = vld [vmem:[#allocation2 + $0x152] sm:$0xff]  ;;  %v1480_v12 = vsel %vm561_vm1, %v5012_v37, %v4192_v57 }
 0x1de   : > { %2102 = vmatpush.msrb.mxu0 %v1630_v4  ;;  %v1462_v19 = vsel %vm561_vm1, %v5050_v55, %v4188_v28  ;;  %v1626_v55 = vld [vmem:[%s7655_s3 + $0x178] sm:$0xff]  ;;  %v1624_v4 = vld [vmem:[%s7655_s3 + $0x168] sm:$0xff] }
 0x1df   : > { %4415 = vrot.lane.b32.xlu2 %v4414_v63, %s4470_s15  ;;  %4405 = vrot.lane.b32.xlu0 %v4404_v17, %s4470_s15  ;;  %v4444_v17 = vpack.i.bf16 %v4957_v8, %v5355_v61  ;;  %v904_v37 = vld [vmem:[#allocation2 + $0x189] sm:$0xff] }
 0x1e0   : > { %4425 = vrot.lane.b32.xlu1 %v4424_v34, %s4470_s15  ;;  %2103 = vmatpush.msrb.mxu0 %v1629_v58  ;;  %v4434_v34 = vpack.i.bf16 %v4953_v6, %v5357_v14 }
 0x1e1   : > { %v5305_v48 = vpop.permute.xlu0 %4195  ;;  %1977 = vmatpush.msrb.mxu3 %v1626_v55  ;;  %v840_v55 = vld [vmem:[#allocation2 + $0x182] sm:$0xff] }
 0x1e2   : > { %v5307_v10 = vpop.permute.xlu1 %4215  ;;  %2104 = vmatpush.msrb.mxu0 %v1628_v26  ;;  %v4198_v58 = vunpack.i.h.bf16 %v5305_v48  ;;  %v4197_v8 = vunpack.i.l.bf16 %v5305_v48  ;;  %v715_v26 = vld [vmem:[#allocation2 + $0xa] sm:$0xff] }
 0x1e3   : > { %1978 = vmatpush.msrb.mxu3 %v1625_v0  ;;  %v4218_v6 = vunpack.i.h.bf16 %v5307_v10  ;;  %v4203_v0 = vunpack.i.h.bf16 %v5273_v7 }
 0x1e4   : > { %2105 = vmatpush.msrb.mxu0 %v1627_v42  ;;  %v5380_v28 = vpop.permute.xlu2 %4250  ;;  %v5384_v42 = vld [vmem:[#allocation2 + $0x172] sm:$0xff]  ;;  %v1481_v48 = vsel %vm561_vm1, %v5010_v35, %v4197_v8 }
 0x1e5   : > { %1800 = vmatmul.f32.gmra.mxu1 %v1462_v19  ;;  %1851 = vmatmul.f32.gmra.mxu3 %v1479_v13  ;;  %v903_v19 = vld [vmem:[#allocation2 + $0x181] sm:$0xff]  ;;  %v1464_v13 = vsel %vm561_vm1, %v5069_v5, %v4198_v58  ;;  %v2738_v5 = vld [vmem:[%s7657_s5 + $0x70] sm:$0xff] }
 0x1e6   : > { %1979 = vmatpush.msrb.mxu3 %v1624_v4  ;;  %v1621_v35 = vld [vmem:[%s7655_s3 + $0x150] sm:$0xff]  ;;  %2869 = vmatpush.msrb.mxu2 %v2738_v5  ;;  %v4207_v4 = vunpack.i.l.bf16 %v5261_v40 }
 0x1e7   : > { %4430 = vrot.lane.b32.xlu2 %v4429_v21, %s4470_s15  ;;  %4420 = vrot.lane.b32.xlu0 %v4419_v20, %s4470_s15  ;;  %v1484_v21 = vsel %vm561_vm1, %v715_v26, %v4218_v6  ;;  %v4449_v20 = vpack.i.bf16 %v903_v19, %v5384_v42  ;;  %v843_v26 = vld [vmem:[#allocation2 + $0x30] sm:$0xff] }
 0x1e8   : > { %4440 = vrot.lane.b32.xlu1 %v4439_v18, %s4470_s15  ;;  %1980 = vmatpush.msrb.mxu3 %v1623_v22  ;;  %v1507_v6 = vsel %vm561_vm1, %v5275_v9, %v4207_v4  ;;  %v1617_v9 = vld [vmem:[%s7655_s3 + $0x130] sm:$0xff] }
 0x1e9   : > { %v5350_v47 = vpop.permute.xlu0 %4210 }
 0x1ea   : > { %v4212_v45 = vunpack.i.l.bf16 %v5350_v47  ;;  %v5353_v50 = vpop.permute.xlu1 %4230  ;;  %1981 = vmatpush.msrb.mxu3 %v1622_v27 }
 0x1ec   : > { %v1483_v63 = vsel %vm561_vm1, %v714_v36, %v4212_v45  ;;  %1982 = vmatpush.msrb.mxu3 %v1621_v35  ;;  %v5410_v36 = vpop.permute.xlu2 %4265  ;;  %v1465_v45 = vsel %vm561_vm1, %v5107_v49, %v4203_v0  ;;  %v1644_v49 = vld [vmem:[%s7655_s3 + $0x208] sm:$0xff]  ;;  %v844_v0 = vld [vmem:[#allocation2 + $0x38] sm:$0xff] }
 0x1ed   : > { %1803 = vmatmul.f32.gmra.mxu1 %v1463_v30  ;;  %1854 = vmatmul.f32.gmra.mxu3 %v1480_v12  ;;  %v1482_v30 = vsel %vm561_vm1, %v5029_v44, %v4202_v3  ;;  %v5416_v12 = vpop.f32.mrf.mxu1  ;;  %v1619_v44 = vld [vmem:[%s7655_s3 + $0x140] sm:$0xff] }
 0x1ee   : > { %1880 = vmatmul.f32.vlgmr.msra.gmra.mxu2 %v1483_v63  ;;  %v841_v63 = vld [vmem:[#allocation2 + $0x18a] sm:$0xff]  ;;  %2217 = vmatpush.msrb.mxu1 %v1644_v49 }
 0x1ef   : > { %4445 = vrot.lane.b32.xlu2 %v4444_v17, %s4470_s15  ;;  %4435 = vrot.lane.b32.xlu0 %v4434_v34, %s4470_s15  ;;  %v1620_v17 = vld [vmem:[%s7655_s3 + $0x148] sm:$0xff]  ;;  %v4208_v34 = vunpack.i.h.bf16 %v5261_v40 }
 0x1f0   : > { %1413 = vrot.lane.b32.xlu1 %v904_v37, %s4470_s15  ;;  %1983 = vmatpush.msrb.mxu3 %v1620_v17  ;;  %v4233_v37 = vunpack.i.h.bf16 %v5353_v50 }
 0x1f1   : > { %v5392_v18 = vpop.permute.xlu0 %4225  ;;  %v1466_v8 = vsel %vm561_vm1, %v5089_v25, %v4208_v34  ;;  %v1618_v25 = vld [vmem:[%s7655_s3 + $0x138] sm:$0xff] }
 0x1f2   : > { %v5382_v53 = vpop.permute.xlu1 %4245  ;;  %v4227_v15 = vunpack.i.l.bf16 %v5392_v18  ;;  %1984 = vmatpush.msrb.mxu3 %v1619_v44  ;;  %v1486_v40 = vsel %vm561_vm1, %v5071_v11, %v4233_v37  ;;  %v4217_v11 = vunpack.i.l.bf16 %v5307_v10  ;;  %v845_v44 = vld [vmem:[#allocation2 + $0x48] sm:$0xff]  ;;  %v2735_v37 = vld [vmem:[%s7657_s5 + $0x58] sm:$0xff] }
 0x1f4   : > { %v1485_v7 = vsel %vm561_vm1, %v5052_v56, %v4227_v15  ;;  %v2737_v56 = vld [vmem:[%s7657_s5 + $0x68] sm:$0xff]  ;;  %1985 = vmatpush.msrb.mxu3 %v1618_v25  ;;  %v1467_v5 = vsel %vm561_vm1, %v5125_v52, %v4217_v11  ;;  %v2736_v52 = vld [vmem:[%s7657_s5 + $0x60] sm:$0xff] }
 0x1f5   : > { %1806 = vmatmul.f32.gmra.mxu1 %v1464_v13  ;;  %1857 = vmatmul.f32.gmra.mxu3 %v1481_v48  ;;  %v5446_v13 = vpop.permute.xlu2 %4280  ;;  %v1616_v15 = vld [vmem:[%s7655_s3 + $0x128] sm:$0xff] }
 0x1f6   : > { %1883 = vmatmul.f32.gmra.mxu2 %v1484_v21  ;;  %v5456_v21 = vpop.f32.mrf.mxu1  ;;  %1986 = vmatpush.msrb.mxu3 %v1617_v9  ;;  %v846_v9 = vld [vmem:[#allocation2 + $0x50] sm:$0xff] }
 0x1f7   : > { %1287 = vrot.lane.b32.xlu2 %v840_v55, %s4470_s15  ;;  %4450 = vrot.lane.b32.xlu0 %v4449_v20, %s4470_s15  ;;  %v4213_v20 = vunpack.i.h.bf16 %v5350_v47  ;;  %v4283_v55 = vunpack.i.h.bf16 %v5446_v13 }
 0x1f8   : > { %2870 = vmatpush.msrb.mxu2 %v2737_v56  ;;  %1987 = vmatpush.msrb.mxu3 %v1616_v15 }
 0x1f9   : > { %v5448_v48 = vpop.permute.xlu0 %4240  ;;  %v1508_v35 = vsel %vm561_vm1, %v5323_v32, %v4213_v20  ;;  %v1548_v10 = vsel %vm561_vm1, %v844_v0, %v4283_v55  ;;  %v1615_v32 = vld [vmem:[%s7655_s3 + $0x120] sm:$0xff]  ;;  %v1612_v20 = vld [vmem:[%s7655_s3 + $0x108] sm:$0xff] }
 0x1fa   : > { %v5408_v57 = vpop.permute.xlu1 %4260  ;;  %v4242_v27 = vunpack.i.l.bf16 %v5448_v48  ;;  %2871 = vmatpush.msrb.mxu2 %v2736_v52  ;;  %1988 = vmatpush.msrb.mxu3 %v1615_v32  ;;  %v847_v0 = vld [vmem:[#allocation2 + $0x60] sm:$0xff]  ;;  %v4243_v32 = vunpack.i.h.bf16 %v5448_v48 }
 0x1fb   : > { %v4263_v55 = vunpack.i.h.bf16 %v5408_v57 }
 0x1fc   : > { %v1487_v3 = vsel %vm561_vm1, %v5065_v1, %v4242_v27  ;;  %v4223_v1 = vunpack.i.h.bf16 %v5292_v54  ;;  %2872 = vmatpush.msrb.mxu2 %v2735_v37 }
 0x1fd   : > { %1809 = vmatmul.f32.gmra.mxu1 %v1465_v45  ;;  %1860 = vmatmul.f32.gmra.mxu3 %v1482_v30  ;;  %v4222_v45 = vunpack.i.l.bf16 %v5292_v54  ;;  %v5493_v34 = vpop.permute.xlu2 %4295 }
 0x1fe   : > { %1886 = vmatmul.f32.gmra.mxu2 %v1485_v7  ;;  %v5482_v30 = vpop.f32.mrf.mxu1  ;;  %v4248_v7 = vunpack.i.h.bf16 %v5382_v53  ;;  %v1468_v17 = vsel %vm561_vm1, %v5109_v41, %v4223_v1  ;;  %v1614_v41 = vld [vmem:[%s7655_s3 + $0x118] sm:$0xff] }
 0x1ff   : > { %1289 = vrot.lane.b32.xlu0 %v841_v63, %s4470_s15  ;;  %v1509_v49 = vsel %vm561_vm1, %v5277_v38, %v4222_v45  ;;  %v1643_v38 = vld [vmem:[%s7655_s3 + $0x200] sm:$0xff]  ;;  %1989 = vmatpush.msrb.mxu3 %v1614_v41 }
 0x200   : > { %v1488_v56 = vsel %vm561_vm1, %v5091_v31, %v4248_v7  ;;  %v1613_v31 = vld [vmem:[%s7655_s3 + $0x110] sm:$0xff]  ;;  %2218 = vmatpush.msrb.mxu1 %v1643_v38  ;;  %v1512_v7 = vsel %vm561_vm1, %v5311_v33, %v4243_v32  ;;  %v849_v38 = vld [vmem:[#allocation2 + $0x78] sm:$0xff] }
 0x201   : > { %v5495_v4 = vpop.permute.xlu0 %4255  ;;  %1990 = vmatpush.msrb.mxu3 %v1613_v31 }
 0x202   : > { %v5436_v22 = vpop.permute.xlu1 %4275 }
 0x203   : > { %v4277_v58 = vunpack.i.l.bf16 %v5436_v22  ;;  %1991 = vmatpush.msrb.mxu3 %v1612_v20  ;;  %v4278_v33 = vunpack.i.h.bf16 %v5436_v22 }
 0x205   : > { %1812 = vmatmul.f32.gmra.mxu1 %v1466_v8  ;;  %1952 = vmatmul.f32.vlgmr.msra.gmra.mxu3 %v1507_v6  ;;  %v1547_v19 = vsel %vm561_vm1, %v843_v26, %v4277_v58  ;;  %v4232_v58 = vunpack.i.l.bf16 %v5353_v50  ;;  %v4228_v8 = vunpack.i.h.bf16 %v5392_v18  ;;  %v4298_v6 = vunpack.i.h.bf16 %v5493_v34  ;;  %v5543_v15 = vpop.permute.xlu2 %4310 }
 0x206   : > { %1889 = vmatmul.f32.gmra.mxu2 %v1486_v40  ;;  %2106 = vmatmul.f32.vlgmr.msrb.gmra.mxu0 %v1547_v19  ;;  %v4257_v26 = vunpack.i.l.bf16 %v5495_v4  ;;  %v5513_v40 = vpop.f32.mrf.mxu1 }
 0x207   : > { %v1469_v19 = vsel %vm561_vm1, %v5157_v23, %v4232_v58  ;;  %v1510_v25 = vsel %vm561_vm1, %v5309_v51, %v4228_v8  ;;  %v1550_v18 = vsel %vm561_vm1, %v846_v9, %v4298_v6  ;;  %v1611_v23 = vld [vmem:[%s7655_s3 + $0x100] sm:$0xff]  ;;  %v4238_v51 = vunpack.i.h.bf16 %v5347_v16 }
 0x208   : > { %v1489_v50 = vsel %vm561_vm1, %v5085_v24, %v4257_v26  ;;  %v4237_v24 = vunpack.i.l.bf16 %v5347_v16  ;;  %1992 = vmatpush.msrb.mxu3 %v1611_v23  ;;  %v4262_v58 = vunpack.i.l.bf16 %v5408_v57  ;;  %v5591_v26 = vld [vmem:[#allocation2 + $0x7a] sm:$0xff] }
 0x209   : > { %v5545_v52 = vpop.permute.xlu0 %4270 }
 0x20a   : > { %v5469_v47 = vpop.permute.xlu1 %4290  ;;  %v4272_v1 = vunpack.i.l.bf16 %v5545_v52 }
 0x20b   : > { %v4292_v63 = vunpack.i.l.bf16 %v5469_v47 }
 0x20d   : > { %1815 = vmatmul.f32.gmra.mxu1 %v1467_v5  ;;  %1955 = vmatmul.f32.gmra.mxu3 %v1508_v35  ;;  %v1549_v54 = vsel %vm561_vm1, %v845_v44, %v4292_v63  ;;  %v1470_v5 = vsel %vm561_vm1, %v5127_v2, %v4238_v51  ;;  %v1511_v35 = vsel %vm561_vm1, %v5357_v14, %v4237_v24  ;;  %v2734_v2 = vld [vmem:[%s7657_s5 + $0x50] sm:$0xff]  ;;  %v4247_v14 = vunpack.i.l.bf16 %v5382_v53  ;;  %v848_v63 = vld [vmem:[#allocation2 + $0x68] sm:$0xff]  ;;  %v5579_v31 = vpop.permute.xlu2 %4325  ;;  %v778_v24 = vld [vmem:[#allocation2 + $0x19] sm:$0xff] }
 0x20e   : > { %1892 = vmatmul.f32.gmra.mxu2 %v1487_v3  ;;  %2109 = vmatmul.f32.gmra.mxu0 %v1548_v10  ;;  %v5538_v3 = vpop.f32.mrf.mxu1  ;;  %v1490_v10 = vsel %vm561_vm1, %v5111_v43, %v4263_v55  ;;  %v4313_v43 = vunpack.i.h.bf16 %v5543_v15  ;;  %v4253_v44 = vunpack.i.h.bf16 %v5380_v28 }
 0x20f   : > { %2873 = vmatpush.msrb.mxu2 %v2734_v2  ;;  %v1471_v45 = vsel %vm561_vm1, %v5183_v60, %v4247_v14  ;;  %v4252_v60 = vunpack.i.l.bf16 %v5380_v28  ;;  %v1492_v28 = vsel %vm561_vm1, %v5129_v59, %v4278_v33  ;;  %v1473_v59 = vsel %vm561_vm1, %v5208_v46, %v4262_v58  ;;  %v2732_v46 = vld [vmem:[%s7657_s5 + $0x40] sm:$0xff]  ;;  %v2731_v14 = vld [vmem:[%s7657_s5 + $0x38] sm:$0xff] }
 0x210   : > { %v1552_v53 = vsel %vm561_vm1, %v848_v63, %v4313_v43  ;;  %v779_v43 = vld [vmem:[#allocation2 + $0x21] sm:$0xff]  ;;  %v907_v63 = vld [vmem:[#allocation2 + $0x32] sm:$0xff] }
 0x211   : > { %v1513_v41 = vsel %vm561_vm1, %v5355_v61, %v4252_v60  ;;  %v5581_v37 = vpop.permute.xlu0 %4285  ;;  %v4328_v61 = vunpack.i.h.bf16 %v5579_v31  ;;  %v4282_v60 = vunpack.i.l.bf16 %v5446_v13  ;;  %v908_v58 = vld [vmem:[#allocation2 + $0x3a] sm:$0xff] }
 0x212   : > { %v5522_v11 = vpop.permute.xlu1 %4305  ;;  %v4287_v8 = vunpack.i.l.bf16 %v5581_v37 }
 0x213   : > { %v4307_v27 = vunpack.i.l.bf16 %v5522_v11 }
 0x214   : > { %v1493_v57 = vsel %vm561_vm1, %v5591_v26, %v4287_v8  ;;  %v2730_v8 = vld [vmem:[%s7657_s5 + $0x30] sm:$0xff] }
 0x215   : > { %1818 = vmatmul.f32.gmra.mxu1 %v1468_v17  ;;  %1958 = vmatmul.f32.gmra.mxu3 %v1509_v49  ;;  %v1551_v16 = vsel %vm561_vm1, %v847_v0, %v4307_v27  ;;  %v1491_v17 = vsel %vm561_vm1, %v5105_v39, %v4272_v1  ;;  %v2733_v39 = vld [vmem:[%s7657_s5 + $0x48] sm:$0xff]  ;;  %v5619_v0 = vpop.permute.xlu2 %4340 }
 0x216   : > { %1895 = vmatmul.f32.gmra.mxu2 %v1488_v56  ;;  %2112 = vmatmul.f32.gmra.mxu0 %v1549_v54  ;;  %v5563_v48 = vpop.f32.mrf.mxu1  ;;  %v1472_v54 = vsel %vm561_vm1, %v5159_v29, %v4253_v44  ;;  %v4258_v29 = vunpack.i.h.bf16 %v5495_v4  ;;  %v5613_v27 = vld [vmem:[#allocation2 + $0x82] sm:$0xff] }
 0x217   : > { %2874 = vmatpush.msrb.mxu2 %v2733_v39 }
 0x219   : > { %2875 = vmatpush.msrb.mxu2 %v2732_v46  ;;  %v5607_v23 = vpop.permute.xlu0 %4300  ;;  %v781_v46 = vld [vmem:[#allocation2 + $0x39] sm:$0xff] }
 0x21a   : > { %v5561_v49 = vpop.permute.xlu1 %4320  ;;  %v4302_v2 = vunpack.i.l.bf16 %v5607_v23 }
 0x21b   : > { %v4322_v56 = vunpack.i.l.bf16 %v5561_v49  ;;  %2876 = vmatpush.msrb.mxu2 %v2731_v14  ;;  %v905_v14 = vld [vmem:[#allocation2 + $0x199] sm:$0xff] }
 0x21c   : > { %1415 = vrot.lane.b32.xlu1 %v905_v14, %s4470_s15 }
 0x21d   : > { %1821 = vmatmul.f32.gmra.mxu1 %v1469_v19  ;;  %1961 = vmatmul.f32.gmra.mxu3 %v1510_v25  ;;  %v1553_v22 = vsel %vm561_vm1, %v849_v38, %v4322_v56  ;;  %v1514_v19 = vsel %vm561_vm1, %v5384_v42, %v4258_v29  ;;  %v850_v25 = vld [vmem:[#allocation2 + $0x80] sm:$0xff]  ;;  %v4267_v42 = vunpack.i.l.bf16 %v5410_v36  ;;  %v4308_v56 = vunpack.i.h.bf16 %v5522_v11  ;;  %v5656_v11 = vpop.permute.xlu2 %4355 }
 0x21e   : > { %1898 = vmatmul.f32.gmra.mxu2 %v1489_v50  ;;  %2115 = vmatmul.f32.gmra.mxu0 %v1550_v18  ;;  %v5587_v6 = vpop.f32.mrf.mxu1  ;;  %v1554_v4 = vsel %vm561_vm1, %v850_v25, %v4328_v61  ;;  %v4268_v50 = vunpack.i.h.bf16 %v5410_v36  ;;  %v4293_v18 = vunpack.i.h.bf16 %v5469_v47  ;;  %v5649_v38 = vld [vmem:[#allocation2 + $0x9a] sm:$0xff]  ;;  %v4358_v25 = vunpack.i.h.bf16 %v5656_v11 }
 0x21f   : > { %v1496_v29 = vsel %vm561_vm1, %v5649_v38, %v4308_v56  ;;  %2877 = vmatpush.msrb.mxu2 %v2730_v8  ;;  %v856_v8 = vld [vmem:[#allocation2 + $0xc8] sm:$0xff] }
 0x220   : > { %v1474_v55 = vsel %vm561_vm1, %v5188_v62, %v4268_v50  ;;  %v1494_v36 = vsel %vm561_vm1, %v5613_v27, %v4293_v18  ;;  %v4343_v62 = vunpack.i.h.bf16 %v5619_v0  ;;  %v5670_v50 = vld [vmem:[#allocation2 + $0xaa] sm:$0xff] }
 0x221   : > { %v5631_v1 = vpop.permute.xlu0 %4315  ;;  %v854_v18 = vld [vmem:[#allocation2 + $0xb0] sm:$0xff] }
 0x222   : > { %v5598_v9 = vpop.permute.xlu1 %4335 }
 0x223   : > { %v4337_v20 = vunpack.i.l.bf16 %v5598_v9 }
 0x225   : > { %1824 = vmatmul.f32.gmra.mxu1 %v1470_v5  ;;  %1964 = vmatmul.f32.gmra.mxu3 %v1511_v35  ;;  %v1515_v5 = vsel %vm561_vm1, %v778_v24, %v4267_v42  ;;  %v851_v35 = vld [vmem:[#allocation2 + $0x90] sm:$0xff] }
 0x226   : > { %1901 = vmatmul.f32.gmra.mxu2 %v1490_v10  ;;  %2118 = vmatmul.f32.gmra.mxu0 %v1551_v16  ;;  %v1555_v47 = vsel %vm561_vm1, %v851_v35, %v4337_v20  ;;  %v4273_v10 = vunpack.i.h.bf16 %v5545_v52  ;;  %v909_v20 = vld [vmem:[#allocation2 + $0x4a] sm:$0xff] }
 0x228   : > { %v1516_v52 = vsel %vm561_vm1, %v779_v43, %v4273_v10  ;;  %v782_v43 = vld [vmem:[#allocation2 + $0x49] sm:$0xff] }
 0x229   : > { %v5658_v61 = vpop.permute.xlu0 %4330 }
 0x22a   : > { %v5640_v44 = vpop.permute.xlu1 %4350 }
 0x22b   : > { %v4352_v39 = vunpack.i.l.bf16 %v5640_v44 }
 0x22d   : > { %1827 = vmatmul.f32.gmra.mxu1 %v1471_v45  ;;  %1967 = vmatmul.f32.gmra.mxu3 %v1512_v7  ;;  %v5633_v45 = vld [vmem:[#allocation2 + $0x92] sm:$0xff] }
 0x22e   : > { %1904 = vmatmul.f32.gmra.mxu2 %v1491_v17  ;;  %2121 = vmatmul.f32.gmra.mxu0 %v1552_v53  ;;  %v852_v7 = vld [vmem:[#allocation2 + $0x98] sm:$0xff]  ;;  %v1495_v17 = vsel %vm561_vm1, %v5633_v45, %v4302_v2  ;;  %v2729_v2 = vld [vmem:[%s7657_s5 + $0x28] sm:$0xff] }
 0x22f   : > { %v1556_v53 = vsel %vm561_vm1, %v852_v7, %v4343_v62  ;;  %2878 = vmatpush.msrb.mxu2 %v2729_v2  ;;  %v855_v7 = vld [vmem:[#allocation2 + $0xc0] sm:$0xff]  ;;  %v5733_v2 = vld [vmem:[#allocation2 + $0xca] sm:$0xff] }
 0x231   : > { %v5680_v35 = vpop.permute.xlu0 %4345 }
 0x235   : > { %1830 = vmatmul.f32.gmra.mxu1 %v1472_v54  ;;  %1970 = vmatmul.f32.gmra.mxu3 %v1513_v41  ;;  %v780_v41 = vld [vmem:[#allocation2 + $0x31] sm:$0xff] }
 0x236   : > { %1907 = vmatmul.f32.gmra.mxu2 %v1492_v28  ;;  %2124 = vmatmul.f32.gmra.mxu0 %v1553_v22  ;;  %v1517_v28 = vsel %vm561_vm1, %v780_v41, %v4282_v60  ;;  %v853_v22 = vld [vmem:[#allocation2 + $0xa8] sm:$0xff]  ;;  %v4303_v60 = vunpack.i.h.bf16 %v5607_v23  ;;  %v4332_v41 = vunpack.i.l.bf16 %v5658_v61 }
 0x237   : > { %v1557_v13 = vsel %vm561_vm1, %v853_v22, %v4352_v39 }
 0x23d   : > { %1833 = vmatmul.f32.gmra.mxu1 %v1473_v59  ;;  %1973 = vmatmul.f32.gmra.mxu3 %v1514_v19  ;;  %v4288_v59 = vunpack.i.h.bf16 %v5581_v37  ;;  %v1558_v37 = vsel %vm561_vm1, %v854_v18, %v4358_v25 }
 0x23e   : > { %1910 = vmatmul.f32.gmra.mxu2 %v1493_v57  ;;  %2127 = vmatmul.f32.gmra.mxu0 %v1554_v4  ;;  %v4317_v57 = vunpack.i.l.bf16 %v5631_v1 }
 0x23f   : > { %v1518_v42 = vsel %vm561_vm1, %v781_v46, %v4288_v59  ;;  %v911_v59 = vld [vmem:[#allocation2 + $0x62] sm:$0xff] }
 0x240   : > { %v1497_v24 = vsel %vm561_vm1, %v5670_v50, %v4317_v57  ;;  %v2728_v46 = vld [vmem:[%s7657_s5 + $0x20] sm:$0xff] }
 0x241   : > { %2879 = vmatpush.msrb.mxu2 %v2728_v46 }
 0x242   : > { %v5609_v51 = vpop.f32.mrf.mxu1 }
 0x245   : > { %1836 = vmatmul.f32.gmra.mxu1 %v1474_v55  ;;  %1993 = vmatmul.f32.vlgmr.msrb.gmra.mxu3 %v1515_v5  ;;  %v5677_v55 = vpop.permute.xlu1 %4365  ;;  %v4297_v5 = vunpack.i.l.bf16 %v5493_v34  ;;  %v5692_v34 = vld [vmem:[#allocation2 + $0xb2] sm:$0xff] }
 0x246   : > { %1913 = vmatmul.f32.gmra.mxu2 %v1494_v36  ;;  %2130 = vmatmul.f32.gmra.mxu0 %v1555_v47  ;;  %v4323_v47 = vunpack.i.h.bf16 %v5561_v49  ;;  %v4367_v10 = vunpack.i.l.bf16 %v5677_v55 }
 0x248   : > { %v5622_v16 = vpop.f32.mrf.mxu3  ;;  %v1498_v49 = vsel %vm561_vm1, %v5692_v34, %v4323_v47  ;;  %v784_v47 = vld [vmem:[#allocation2 + $0x61] sm:$0xff] }
 0x24a   : > { %v5629_v32 = vpop.f32.mrf.mxu1 }
 0x24d   : > { %1996 = vmatmul.f32.gmra.mxu3 %v1516_v52  ;;  %4060 = vmatmul.msk.f32.vlgmr.msrb.gmra.mxu1 %vm561_vm1, %v907_v63  ;;  %v1519_v52 = vsel %vm561_vm1, %v782_v43, %v4297_v5  ;;  %v910_v63 = vld [vmem:[#allocation2 + $0x52] sm:$0xff]  ;;  %v5717_v57 = vpop.permute.xlu1 %4380 }
 0x24e   : > { %1916 = vmatmul.f32.gmra.mxu2 %v1495_v17  ;;  %2133 = vmatmul.f32.gmra.mxu0 %v1556_v53  ;;  %v1559_v17 = vsel %vm561_vm1, %v855_v7, %v4367_v10  ;;  %v5699_v53 = vpop.permute.xlu2 %4370  ;;  %v857_v43 = vld [vmem:[#allocation2 + $0xd8] sm:$0xff] }
 0x24f   : > { %v4373_v39 = vunpack.i.h.bf16 %v5699_v53 }
 0x250   : > { %v5643_v33 = vpop.f32.mrf.mxu3 }
 0x251   : > { %v1560_v25 = vsel %vm561_vm1, %v856_v8, %v4373_v39  ;;  %v5754_v8 = vld [vmem:[#allocation2 + $0xda] sm:$0xff] }
 0x252   : > { %v5647_v54 = vpop.f32.mrf.mxu1 }
 0x255   : > { %1999 = vmatmul.f32.gmra.mxu3 %v1517_v28  ;;  %4061 = vmatmul.msk.f32.gmra.mxu1 %vm561_vm1, %v908_v58  ;;  %v5706_v28 = vpop.permute.xlu0 %4360  ;;  %v783_v58 = vld [vmem:[#allocation2 + $0x51] sm:$0xff] }
 0x256   : > { %1919 = vmatmul.f32.gmra.mxu2 %v1496_v29  ;;  %2136 = vmatmul.f32.gmra.mxu0 %v1557_v13  ;;  %v5710_v29 = vld [vmem:[#allocation2 + $0xc2] sm:$0xff]  ;;  %v1520_v13 = vsel %vm561_vm1, %v783_v58, %v4303_v60  ;;  %v5740_v7 = vpop.permute.xlu2 %4385  ;;  %v4347_v60 = vunpack.i.l.bf16 %v5680_v35  ;;  %v2727_v58 = vld [vmem:[%s7657_s5 + $0x18] sm:$0xff] }
 0x257   : > { %v1499_v23 = vsel %vm561_vm1, %v5710_v29, %v4332_v41  ;;  %2880 = vmatpush.msrb.mxu2 %v2727_v58  ;;  %v5789_v58 = vpop.permute.xlu1 %4395 }
 0x258   : > { %v5664_v19 = vpop.f32.mrf.mxu3 }
 0x25a   : > { %v5668_v4 = vpop.f32.mrf.mxu1 }
 0x25d   : > { %2002 = vmatmul.f32.gmra.mxu3 %v1518_v42  ;;  %4062 = vmatmul.msk.f32.gmra.mxu1 %vm561_vm1, %v909_v20  ;;  %v4312_v42 = vunpack.i.l.bf16 %v5543_v15  ;;  %v4338_v20 = vunpack.i.h.bf16 %v5598_v9  ;;  %v5731_v10 = vpop.permute.xlu0 %4375 }
 0x25e   : > { %1922 = vmatmul.f32.gmra.mxu2 %v1497_v24  ;;  %2139 = vmatmul.f32.gmra.mxu0 %v1558_v37  ;;  %v4382_v24 = vunpack.i.l.bf16 %v5717_v57 }
 0x25f   : > { %v1521_v14 = vsel %vm561_vm1, %v784_v47, %v4312_v42  ;;  %v1500_v15 = vsel %vm561_vm1, %v5733_v2, %v4338_v20  ;;  %v4327_v42 = vunpack.i.l.bf16 %v5579_v31 }
 0x260   : > { %v5682_v36 = vpop.f32.mrf.mxu3  ;;  %v1561_v9 = vsel %vm561_vm1, %v857_v43, %v4382_v24  ;;  %v4353_v24 = vunpack.i.h.bf16 %v5640_v44  ;;  %v5782_v44 = vld [vmem:[%s7656_s4] ss:$0 sm:$0xff] }
 0x262   : > { %v5686_v62 = vpop.f32.mrf.mxu1 }
 0x265   : > { %2005 = vmatmul.f32.gmra.mxu3 %v1519_v52  ;;  %4063 = vmatmul.msk.f32.gmra.mxu1 %vm561_vm1, %v910_v63  ;;  %v912_v52 = vld [vmem:[#allocation2 + $0x6a] sm:$0xff]  ;;  %v4318_v63 = vunpack.i.h.bf16 %v5631_v1  ;;  %v5762_v46 = vpop.permute.xlu0 %4390 }
 0x266   : > { %1925 = vmatmul.f32.gmra.mxu2 %v1498_v49  ;;  %2142 = vmatmul.f32.gmra.mxu0 %v1559_v17  ;;  %v4388_v17 = vunpack.i.h.bf16 %v5740_v7  ;;  %v4393_v47 = vunpack.i.h.bf16 %v5762_v46 }
 0x268   : > { %v5702_v56 = vpop.f32.mrf.mxu3 }
 0x26a   : > { %v5708_v22 = vpop.f32.mrf.mxu1 }
 0x26d   : > { %2008 = vmatmul.f32.gmra.mxu3 %v1520_v13  ;;  %4064 = vmatmul.msk.f32.gmra.mxu1 %vm561_vm1, %v911_v59  ;;  %v785_v13 = vld [vmem:[#allocation2 + $0x69] sm:$0xff]  ;;  %v858_v59 = vld [vmem:[#allocation2 + $0xe0] sm:$0xff] }
 0x26e   : > { %1928 = vmatmul.f32.gmra.mxu2 %v1499_v23  ;;  %2145 = vmatmul.f32.gmra.mxu0 %v1560_v25  ;;  %v1522_v1 = vsel %vm561_vm1, %v785_v13, %v4318_v63  ;;  %v1501_v23 = vsel %vm561_vm1, %v5754_v8, %v4347_v60  ;;  %v1562_v25 = vsel %vm561_vm1, %v858_v59, %v4388_v17  ;;  %v859_v63 = vld [vmem:[#allocation2 + $0xf0] sm:$0xff]  ;;  %v4333_v59 = vunpack.i.h.bf16 %v5658_v61 }
 0x26f   : > { %v1563_v60 = vsel %vm561_vm1, %v859_v63, %v4393_v47  ;;  %v2726_v13 = vld [vmem:[%s7657_s5 + $0x10] sm:$0xff]  ;;  %v860_v63 = vld [vmem:[#allocation2 + $0xf8] sm:$0xff] }
 0x270   : > { %v5723_v18 = vpop.f32.mrf.mxu3  ;;  %2881 = vmatpush.msrb.mxu2 %v2726_v13  ;;  %v1844_v13 = vadd.f32 %v5782_v44, %v5643_v33  ;;  %v788_v33 = vld [vmem:[#allocation2 + $0x91] sm:$0xff] }
 0x271   : > { %v5727_v37 = vpop.f32.mrf.mxu2 }
 0x272   : > { %v5729_v5 = vpop.f32.mrf.mxu1 }
 0x275   : > { %2011 = vmatmul.f32.gmra.mxu3 %v1521_v14  ;;  %4065 = vmatmul.msk.f32.gmra.mxu1 %vm561_vm1, %v912_v52  ;;  %v906_v52 = vld [vmem:[#allocation2 + $0x1a1] sm:$0xff] }
 0x276   : > { %1931 = vmatmul.f32.gmra.mxu2 %v1500_v15  ;;  %2148 = vmatmul.f32.gmra.mxu0 %v1561_v9  ;;  %v5776_v9 = vld [vmem:[#allocation2 + $0xe2] sm:$0xff] }
 0x277   : > { %1417 = vrot.lane.b32.xlu2 %v906_v52, %s4470_s15  ;;  %v1502_v17 = vsel %vm561_vm1, %v5776_v9, %v4353_v24 }
 0x278   : > { %v5743_v49 = vpop.f32.mrf.mxu3 }
 0x279   : > { %v5747_v39 = vpop.f32.mrf.mxu2 }
 0x27a   : > { %v5749_v41 = vpop.f32.mrf.mxu1 }
 0x27d   : > { %2014 = vmatmul.f32.gmra.mxu3 %v1522_v1  ;;  %4066 = vmatmul.msk.f32.gmra.mxu1 %vm561_vm1, %v5591_v26  ;;  %v786_v26 = vld [vmem:[#allocation2 + $0x79] sm:$0xff]  ;;  %v1841_v1 = vadd.f32 %v5782_v44, %v5622_v16 }
 0x27e   : > { %1934 = vmatmul.f32.gmra.mxu2 %v1501_v23  ;;  %2151 = vmatmul.f32.gmra.mxu0 %v1562_v25  ;;  %v1523_v31 = vsel %vm561_vm1, %v786_v26, %v4327_v42  ;;  %v4362_v25 = vunpack.i.l.bf16 %v5706_v28  ;;  %v4398_v42 = vunpack.i.h.bf16 %v5789_v58  ;;  %v787_v26 = vld [vmem:[#allocation2 + $0x81] sm:$0xff] }
 0x27f   : > { %v1524_v16 = vsel %vm561_vm1, %v787_v26, %v4333_v59 }
 0x280   : > { %v5765_v20 = vpop.f32.mrf.mxu3 }
 0x281   : > { %v5769_v14 = vpop.f32.mrf.mxu2 }
 0x282   : > { %v5771_v43 = vpop.f32.mrf.mxu1 }
 0x283   : > { %v5773_v15 = vpop.f32.mrf.mxu0 }
 0x285   : > { %2017 = vmatmul.f32.gmra.mxu3 %v1523_v31  ;;  %4067 = vmatmul.msk.f32.gmra.mxu1 %vm561_vm1, %v5613_v27  ;;  %v5807_v31 = vld [vmem:[#allocation2 + $0xf2] sm:$0xff] }
 0x286   : > { %1937 = vmatmul.f32.gmra.mxu2 %v1502_v17  ;;  %2154 = vmatmul.f32.gmra.mxu0 %v1563_v60  ;;  %v1503_v61 = vsel %vm561_vm1, %v5807_v31, %v4362_v25  ;;  %v1564_v17 = vsel %vm561_vm1, %v860_v63, %v4398_v42  ;;  %v5815_v60 = vpop.permute.xlu2 %4400  ;;  %v4368_v25 = vunpack.i.h.bf16 %v5677_v55 }
 0x288   : > { %v1953_v23 = vpop.f32.mrf.mxu3 }
 0x289   : > { %v5799_v27 = vpop.f32.mrf.mxu2  ;;  %v5801_v24 = vadd.f32 %v1953_v23, %v1841_v1  ;;  %v4342_v1 = vunpack.i.l.bf16 %v5619_v0  ;;  %v4403_v23 = vunpack.i.h.bf16 %v5815_v60  ;;  %v5833_v0 = vld [vmem:[#allocation2 + $0xfa] sm:$0xff] }
 0x28a   : > { %v5803_v47 = vpop.f32.mrf.mxu1  ;;  %v1504_v55 = vsel %vm561_vm1, %v5833_v0, %v4368_v25 }
 0x28b   : > { %7696 = vst [vmem:[#allocation4_spill] sm:$0xff] %v5801_v24  ;;  %v5805_v52 = vpop.f32.mrf.mxu0  ;;  %v862_v24 = vld [vmem:[#allocation2 + $0x110] sm:$0xff] }
 0x28c   : > { %7697 = vst [vmem:[#allocation5_spill] sm:$0xff] %v5803_v47  ;;  %v5885_v47 = vld [vmem:[#allocation2 + $0x112] sm:$0xff] }
 0x28d   : > { %2020 = vmatmul.f32.gmra.mxu3 %v1524_v16  ;;  %4068 = vmatmul.msk.f32.gmra.mxu1 %vm561_vm1, %v5633_v45  ;;  %v2725_v45 = vld [vmem:[%s7657_s5 + $0x8] sm:$0xff] }
 0x28e   : > { %1940 = vmatmul.f32.gmra.mxu2 %v1503_v61  ;;  %2157 = vmatmul.f32.gmra.mxu0 %v1564_v17  ;;  %v1525_v61 = vsel %vm561_vm1, %v788_v33, %v4342_v1  ;;  %v861_v17 = vld [vmem:[#allocation2 + $0x108] sm:$0xff]  ;;  %v4377_v33 = vunpack.i.l.bf16 %v5731_v10 }
 0x28f   : > { %2882 = vmatpush.msrb.mxu2 %v2725_v45  ;;  %v1847_v45 = vadd.f32 %v5782_v44, %v5664_v19 }
 0x290   : > { %v1956_v59 = vpop.f32.mrf.mxu3 }
 0x291   : > { %v5822_v26 = vpop.f32.mrf.mxu2  ;;  %v5824_v42 = vadd.f32 %v1956_v59, %v1844_v13  ;;  %v1565_v13 = vsel %vm561_vm1, %v861_v17, %v4403_v23  ;;  %v5841_v59 = vpop.permute.xlu0 %4405 }
 0x292   : > { %v5826_v16 = vpop.f32.mrf.mxu1  ;;  %v4408_v25 = vunpack.i.h.bf16 %v5841_v59 }
 0x293   : > { %7698 = vst [vmem:[#allocation6_spill] sm:$0xff] %v5824_v42  ;;  %v5831_v63 = vpop.f32.mrf.mxu0  ;;  %v4348_v42 = vunpack.i.h.bf16 %v5680_v35 }
 0x294   : > { %7699 = vst [vmem:[#allocation7_spill] sm:$0xff] %v5826_v16  ;;  %v1566_v16 = vsel %vm561_vm1, %v862_v24, %v4408_v25  ;;  %v4357_v24 = vunpack.i.l.bf16 %v5656_v11  ;;  %v4383_v25 = vunpack.i.h.bf16 %v5717_v57 }
 0x295   : > { %2023 = vmatmul.f32.gmra.mxu3 %v1525_v61  ;;  %4069 = vmatmul.msk.f32.gmra.mxu1 %vm561_vm1, %v5649_v38 }
 0x296   : > { %1943 = vmatmul.f32.gmra.mxu2 %v1504_v55  ;;  %2160 = vmatmul.f32.gmra.mxu0 %v1565_v13  ;;  %v789_v55 = vld [vmem:[#allocation2 + $0x99] sm:$0xff]  ;;  %v5856_v13 = vld [vmem:[#allocation2 + $0x10a] sm:$0xff]  ;;  %v1506_v11 = vsel %vm561_vm1, %v5885_v47, %v4383_v25 }
 0x297   : > { %v1526_v19 = vsel %vm561_vm1, %v789_v55, %v4348_v42  ;;  %v1505_v35 = vsel %vm561_vm1, %v5856_v13, %v4377_v33  ;;  %v2755_v42 = vld [vmem:[%s7657_s5 + $0xf8] sm:$0xff]  ;;  %v1850_v33 = vadd.f32 %v5782_v44, %v5682_v36 }
 0x298   : > { %v1959_v1 = vpop.f32.mrf.mxu3  ;;  %2981 = vmatpush.msra.mxu3 %v2755_v42  ;;  %v5893_v42 = vpop.permute.xlu2 %4415 }
 0x299   : > { %v5848_v61 = vpop.f32.mrf.mxu2  ;;  %v5850_v23 = vadd.f32 %v1959_v1, %v1847_v45  ;;  %v5864_v45 = vpop.permute.xlu1 %4410  ;;  %v2724_v1 = vld [vmem:[%s7657_s5] sm:$0xff] }
 0x29a   : > { %v5852_v17 = vpop.f32.mrf.mxu1  ;;  %2883 = vmatpush.msrb.mxu2 %v2724_v1  ;;  %v863_v1 = vld [vmem:[#allocation2 + $0x120] sm:$0xff] }
 0x29b   : > { %7700 = vst [vmem:[#allocation8_spill] sm:$0xff] %v5850_v23  ;;  %v5854_v38 = vpop.f32.mrf.mxu0 }
 0x29c   : > { %7701 = vst [vmem:[#allocation9_spill] sm:$0xff] %v5852_v17  ;;  %v790_v17 = vld [vmem:[#allocation2 + $0xa9] sm:$0xff] }
 0x29d   : > { %2026 = vmatmul.f32.gmra.mxu3 %v1526_v19  ;;  %4070 = vmatmul.msk.f32.gmra.mxu1 %vm561_vm1, %v5670_v50  ;;  %v1527_v36 = vsel %vm561_vm1, %v790_v17, %v4357_v24  ;;  %v4418_v24 = vunpack.i.h.bf16 %v5893_v42 }
 0x29e   : > { %1946 = vmatmul.f32.gmra.mxu2 %v1505_v35  ;;  %2163 = vmatmul.f32.gmra.mxu0 %v1566_v16  ;;  %v4413_v16 = vunpack.i.h.bf16 %v5864_v45 }
 0x2a0   : > { %v1962_v50 = vpop.f32.mrf.mxu3  ;;  %v1567_v57 = vsel %vm561_vm1, %v863_v1, %v4413_v16  ;;  %v791_v1 = vld [vmem:[#allocation2 + $0xb1] sm:$0xff] }
 0x2a1   : > { %v5877_v55 = vpop.f32.mrf.mxu2  ;;  %v5879_v19 = vadd.f32 %v1962_v50, %v1850_v33  ;;  %v1853_v33 = vadd.f32 %v5782_v44, %v5702_v56  ;;  %v4363_v50 = vunpack.i.h.bf16 %v5706_v28  ;;  %v864_v28 = vld [vmem:[#allocation2 + $0x128] sm:$0xff] }
 0x2a2   : > { %v5881_v35 = vpop.f32.mrf.mxu1 }
 0x2a3   : > { %7702 = vst [vmem:[#allocation10_spill] sm:$0xff] %v5879_v19  ;;  %v5883_v23 = vpop.f32.mrf.mxu0  ;;  %v1528_v56 = vsel %vm561_vm1, %v791_v1, %v4363_v50 }
 0x2a5   : > { %2029 = vmatmul.f32.gmra.mxu3 %v1527_v36  ;;  %4071 = vmatmul.msk.f32.gmra.mxu1 %vm561_vm1, %v5692_v34  ;;  %v2803_v34 = vld [vmem:[%s7657_s5 + $0x278] sm:$0xff] }
 0x2a6   : > { %1949 = vmatmul.f32.gmra.mxu2 %v1506_v11  ;;  %2166 = vmatmul.f32.gmra.mxu0 %v1567_v57  ;;  %v1568_v11 = vsel %vm561_vm1, %v864_v28, %v4418_v24  ;;  %v5914_v57 = vpop.permute.xlu0 %4420  ;;  %v2787_v24 = vld [vmem:[%s7657_s5 + $0x1f8] sm:$0xff] }
 0x2a7   : > { %3320 = vmatpush.msra.mxu2 %v2803_v34  ;;  %v4423_v50 = vunpack.i.h.bf16 %v5914_v57  ;;  %3207 = vmatpush.msra.mxu1 %v2787_v24  ;;  %v4378_v24 = vunpack.i.h.bf16 %v5731_v10  ;;  %v866_v10 = vld [vmem:[#allocation2 + $0x140] sm:$0xff] }
 0x2a8   : > { %v1965_v17 = vpop.f32.mrf.mxu3 }
 0x2a9   : > { %v5899_v19 = vpop.f32.mrf.mxu2  ;;  %v5901_v25 = vadd.f32 %v1965_v17, %v1853_v33  ;;  %v4458_v33 = vld [vmem:[#allocation3] sm:$0xff]  ;;  %v1856_v17 = vadd.f32 %v5782_v44, %v5723_v18 }
 0x2aa   : > { %v5903_v16 = vpop.f32.mrf.mxu1  ;;  %v2754_v18 = vld [vmem:[%s7657_s5 + $0xf0] sm:$0xff] }
 0x2ab   : > { %7703 = vst [vmem:[#allocation11_spill] sm:$0xff] %v5901_v25  ;;  %v5908_v36 = vpop.f32.mrf.mxu0  ;;  %v4372_v25 = vunpack.i.l.bf16 %v5699_v53  ;;  %2982 = vmatpush.msra.mxu3 %v2754_v18 }
 0x2ac   : > { %7704 = vst [vmem:[#allocation12_spill] sm:$0xff] %v5903_v16  ;;  %v5941_v16 = vpop.permute.xlu1 %4425 }
 0x2ad   : > { %2032 = vmatmul.f32.gmra.mxu3 %v1528_v56  ;;  %4072 = vmatmul.msk.f32.gmra.mxu1 %vm561_vm1, %v5710_v29  ;;  %v2771_v29 = vld [vmem:[%s7657_s5 + $0x178] sm:$0xff]  ;;  %v4428_v18 = vunpack.i.h.bf16 %v5941_v16 }
 0x2ae   : > { %2169 = vmatmul.f32.gmra.mxu0 %v1568_v11  ;;  %2884 = vmatmul.f32.vlgmr.msrb.gmra.mxu2 %v4458_v33  ;;  %v792_v11 = vld [vmem:[#allocation2 + $0xc1] sm:$0xff] }
 0x2af   : > { %3094 = vmatpush.msra.mxu0 %v2771_v29  ;;  %v1859_v29 = vadd.f32 %v5782_v44, %v5743_v49 }
 0x2b0   : > { %v1968_v34 = vpop.f32.mrf.mxu3 }
 0x2b1   : > { %v5920_v1 = vpop.f32.mrf.mxu2  ;;  %v5922_v56 = vadd.f32 %v1968_v34, %v1856_v17  ;;  %v1529_v17 = vsel %vm561_vm1, %v792_v11, %v4372_v25  ;;  %v865_v34 = vld [vmem:[#allocation2 + $0x138] sm:$0xff] }
 0x2b2   : > { %v5933_v53 = vpop.f32.mrf.mxu1 }
 0x2b3   : > { %7705 = vst [vmem:[#allocation13_spill] sm:$0xff] %v5922_v56  ;;  %v5935_v28 = vpop.f32.mrf.mxu0  ;;  %v1569_v56 = vsel %vm561_vm1, %v865_v34, %v4423_v50  ;;  %v1862_v34 = vadd.f32 %v5782_v44, %v5765_v20  ;;  %v2753_v20 = vld [vmem:[%s7657_s5 + $0xe8] sm:$0xff] }
 0x2b4   : > { %7706 = vst [vmem:[#allocation14_spill] sm:$0xff] %v5933_v53  ;;  %2983 = vmatpush.msra.mxu3 %v2753_v20 }
 0x2b5   : > { %2035 = vmatmul.f32.gmra.mxu3 %v1529_v17  ;;  %4073 = vmatmul.msk.f32.gmra.mxu1 %vm561_vm1, %v5733_v2  ;;  %v2802_v2 = vld [vmem:[%s7657_s5 + $0x270] sm:$0xff]  ;;  %v1570_v17 = vsel %vm561_vm1, %v866_v10, %v4428_v18 }
 0x2b6   : > { %2172 = vmatmul.f32.gmra.mxu0 %v1569_v56  ;;  %2887 = vmatmul.f32.gmra.mxu2 %v4458_v33  ;;  %v793_v33 = vld [vmem:[#allocation2 + $0xc9] sm:$0xff] }
 0x2b7   : > { %3321 = vmatpush.msra.mxu2 %v2802_v2  ;;  %v1530_v49 = vsel %vm561_vm1, %v793_v33, %v4378_v24  ;;  %v2770_v18 = vld [vmem:[%s7657_s5 + $0x170] sm:$0xff] }
 0x2b8   : > { %v1971_v53 = vpop.f32.mrf.mxu3  ;;  %3095 = vmatpush.msra.mxu0 %v2770_v18  ;;  %v867_v10 = vld [vmem:[#allocation2 + $0x150] sm:$0xff] }
 0x2b9   : > { %v5947_v25 = vpop.f32.mrf.mxu2  ;;  %v5949_v11 = vadd.f32 %v1971_v53, %v1859_v29  ;;  %v5962_v53 = vpop.permute.xlu2 %4430  ;;  %v4387_v29 = vunpack.i.l.bf16 %v5740_v7 }
 0x2ba   : > { %v5951_v50 = vpop.f32.mrf.mxu1  ;;  %v4433_v2 = vunpack.i.h.bf16 %v5962_v53 }
 0x2bb   : > { %7707 = vst [vmem:[#allocation15_spill] sm:$0xff] %v5949_v11  ;;  %v5956_v56 = vpop.f32.mrf.mxu0 }
 0x2bc   : > { %7708 = vst [vmem:[#allocation16_spill] sm:$0xff] %v5951_v50 }
 0x2bd   : > { %2038 = vmatmul.f32.gmra.mxu3 %v1530_v49  ;;  %4074 = vmatmul.msk.f32.gmra.mxu1 %vm561_vm1, %v5754_v8  ;;  %v2786_v8 = vld [vmem:[%s7657_s5 + $0x1f0] sm:$0xff] }
 0x2be   : > { %2175 = vmatmul.f32.gmra.mxu0 %v1570_v17  ;;  %3208 = vmatpush.msra.mxu1 %v2786_v8  ;;  %v1769_v17 = vadd.f32 %v5782_v44, %v5416_v12  ;;  %v4392_v8 = vunpack.i.l.bf16 %v5762_v46  ;;  %v868_v46 = vld [vmem:[#allocation2 + $0x158] sm:$0xff] }
 0x2c0   : > { %v1974_v11 = vpop.f32.mrf.mxu3  ;;  %v1882_v18 = vadd.f32 %v5727_v37, %v1769_v17  ;;  %v1772_v17 = vadd.f32 %v5782_v44, %v5456_v21 }
 0x2c1   : > { %v5968_v50 = vpop.f32.mrf.mxu2  ;;  %v5970_v24 = vadd.f32 %v1974_v11, %v1862_v34  ;;  %v794_v11 = vld [vmem:[#allocation2 + $0xd9] sm:$0xff]  ;;  %v1571_v34 = vsel %vm561_vm1, %v867_v10, %v4433_v2  ;;  %v2801_v2 = vld [vmem:[%s7657_s5 + $0x268] sm:$0xff] }
 0x2c2   : > { %v5981_v7 = vpop.f32.mrf.mxu1  ;;  %v1531_v49 = vsel %vm561_vm1, %v794_v11, %v4387_v29  ;;  %v795_v10 = vld [vmem:[#allocation2 + $0xe1] sm:$0xff]  ;;  %3322 = vmatpush.msra.mxu2 %v2801_v2 }
 0x2c3   : > { %7709 = vst [vmem:[#allocation17_spill] sm:$0xff] %v5970_v24  ;;  %v5983_v33 = vpop.f32.mrf.mxu0  ;;  %v5991_v24 = vpop.permute.xlu0 %4435  ;;  %v1532_v37 = vsel %vm561_vm1, %v795_v10, %v4392_v8  ;;  %v4397_v8 = vunpack.i.l.bf16 %v5789_v58  ;;  %v2752_v10 = vld [vmem:[%s7657_s5 + $0xe0] sm:$0xff] }
 0x2c4   : > { %7710 = vst [vmem:[#allocation18_spill] sm:$0xff] %v5981_v7  ;;  %v4438_v29 = vunpack.i.h.bf16 %v5991_v24  ;;  %2984 = vmatpush.msra.mxu3 %v2752_v10 }
 0x2c5   : > { %2041 = vmatmul.f32.gmra.mxu3 %v1531_v49  ;;  %4075 = vmatmul.msk.f32.gmra.mxu1 %vm561_vm1, %v5776_v9 }
 0x2c6   : > { %2178 = vmatmul.f32.gmra.mxu0 %v1571_v34 }
 0x2c8   : > { %v1994_v20 = vpop.f32.mrf.mxu3 }
 0x2c9   : > { %v5996_v11 = vpop.f32.mrf.mxu2  ;;  %v1995_v7 = vadd.f32 %v1994_v20, %v1882_v18  ;;  %v1572_v18 = vsel %vm561_vm1, %v868_v46, %v4438_v29  ;;  %v6012_v20 = vpop.permute.xlu1 %4440  ;;  %v2768_v29 = vld [vmem:[%s7657_s5 + $0x160] sm:$0xff] }
 0x2ca   : > { %v2220_v12 = vpop.f32.mrf.mxu1  ;;  %v4443_v21 = vunpack.i.h.bf16 %v6012_v20 }
 0x2cb   : > { %v6001_v49 = vpop.f32.mrf.mxu0  ;;  %v2108_v9 = vadd.f32 %v5773_v15, %v1995_v7  ;;  %v1885_v15 = vadd.f32 %v5747_v39, %v1772_v17  ;;  %v2785_v39 = vld [vmem:[%s7657_s5 + $0x1e8] sm:$0xff]  ;;  %v796_v17 = vld [vmem:[#allocation2 + $0xf1] sm:$0xff] }
 0x2cc   : > { %3209 = vmatpush.msra.mxu1 %v2785_v39 }
 0x2cd   : > { %v6007_v34 = vadd.f32 %v2220_v12, %v2108_v9  ;;  %2044 = vmatmul.f32.gmra.mxu3 %v1532_v37  ;;  %4076 = vmatmul.msk.f32.gmra.mxu1 %vm561_vm1, %v5807_v31  ;;  %v2769_v31 = vld [vmem:[%s7657_s5 + $0x168] sm:$0xff] }
 0x2ce   : > { %2181 = vmatmul.f32.gmra.mxu0 %v1572_v18  ;;  %v1533_v18 = vsel %vm561_vm1, %v796_v17, %v4397_v8  ;;  %v2766_v8 = vld [vmem:[%s7657_s5 + $0x150] sm:$0xff] }
 0x2cf   : > { %v7660_v7 = vmax.f32 %v6007_v34, 0.0  ;;  %3096 = vmatpush.msra.mxu0 %v2769_v31  ;;  %v1775_v31 = vadd.f32 %v5782_v44, %v5482_v30  ;;  %v4402_v30 = vunpack.i.l.bf16 %v5815_v60  ;;  %v2800_v60 = vld [vmem:[%s7657_s5 + $0x260] sm:$0xff] }
 0x2d0   : > { %v1997_v2 = vpop.f32.mrf.mxu3  ;;  %3323 = vmatpush.msra.mxu2 %v2800_v60 }
 0x2d1   : > { %2403 = vst [vmem:[#allocation3 + $0x19] sm:$0xff] %v7660_v7  ;;  %v1998_v12 = vadd.f32 %v1997_v2, %v1885_v15  ;;  %v6029_v58 = vpop.f32.mrf.mxu2  ;;  %v869_v15 = vld [vmem:[#allocation2 + $0x168] sm:$0xff]  ;;  %3097 = vmatpush.msra.mxu0 %v2768_v29  ;;  %v2767_v2 = vld [vmem:[%s7657_s5 + $0x158] sm:$0xff] }
 0x2d2   : > { %v2223_v9 = vpop.f32.mrf.mxu1  ;;  %v1573_v7 = vsel %vm561_vm1, %v869_v15, %v4443_v21 }
 0x2d3   : > { %v6034_v37 = vpop.f32.mrf.mxu0  ;;  %v2111_v46 = vadd.f32 %v5805_v52, %v1998_v12  ;;  %v6048_v52 = vpop.permute.xlu2 %4445  ;;  %v1888_v12 = vadd.f32 %v5769_v14, %v1775_v31  ;;  %3098 = vmatpush.msra.mxu0 %v2767_v2  ;;  %v2765_v14 = vld [vmem:[%s7657_s5 + $0x148] sm:$0xff]  ;;  %v870_v31 = vld [vmem:[#allocation2 + $0x170] sm:$0xff] }
 0x2d4   : > { %v4448_v21 = vunpack.i.h.bf16 %v6048_v52 }
 0x2d5   : > { %v6043_v39 = vadd.f32 %v2223_v9, %v2111_v46  ;;  %2047 = vmatmul.f32.gmra.mxu3 %v1533_v18  ;;  %4077 = vmatmul.msk.f32.gmra.mxu1 %vm561_vm1, %v5833_v0  ;;  %v797_v18 = vld [vmem:[#allocation2 + $0xf9] sm:$0xff] }
 0x2d6   : > { %2184 = vmatmul.f32.gmra.mxu0 %v1573_v7  ;;  %v1534_v2 = vsel %vm561_vm1, %v797_v18, %v4402_v30  ;;  %v2763_v30 = vld [vmem:[%s7657_s5 + $0x138] sm:$0xff] }
 0x2d7   : > { %v7662_v29 = vmax.f32 %v6043_v39, 0.0  ;;  %3099 = vmatpush.msra.mxu0 %v2766_v8  ;;  %v2764_v8 = vld [vmem:[%s7657_s5 + $0x140] sm:$0xff] }
 0x2d8   : > { %v2000_v9 = vpop.f32.mrf.mxu3  ;;  %v6056_v10 = vld [vmem:[#allocation3 + $0x18] sm:$0xff] }
 0x2d9   : > { %2404 = vst [vmem:[#allocation3 + $0x21] sm:$0xff] %v7662_v29  ;;  %v2001_v0 = vadd.f32 %v2000_v9, %v1888_v12  ;;  %2890 = vmatmul.f32.gmra.mxu2 %v6056_v10  ;;  %3100 = vmatpush.msra.mxu0 %v2765_v14  ;;  %v6071_v15 = vpop.f32.mrf.mxu2  ;;  %v1778_v12 = vadd.f32 %v5782_v44, %v5513_v40  ;;  %v4407_v40 = vunpack.i.l.bf16 %v5841_v59  ;;  %v2784_v59 = vld [vmem:[%s7657_s5 + $0x1e0] sm:$0xff] }
 0x2da   : > { %v2226_v7 = vpop.f32.mrf.mxu1  ;;  %3210 = vmatpush.msra.mxu1 %v2784_v59 }
 0x2db   : > { %v6068_v46 = vpop.f32.mrf.mxu0  ;;  %v2114_v17 = vadd.f32 %v5831_v63, %v2001_v0  ;;  %v1574_v63 = vsel %vm561_vm1, %v870_v31, %v4448_v21  ;;  %v6084_v0 = vpop.permute.xlu0 %4450  ;;  %v1891_v14 = vadd.f32 %v5799_v27, %v1778_v12  ;;  %3101 = vmatpush.msra.mxu0 %v2764_v8  ;;  %v798_v12 = vld [vmem:[#allocation2 + $0x109] sm:$0xff] }
 0x2dc   : > { %v4453_v21 = vunpack.i.h.bf16 %v6084_v0 }
 0x2dd   : > { %v6079_v9 = vadd.f32 %v2226_v7, %v2114_v17  ;;  %2050 = vmatmul.f32.gmra.mxu3 %v1534_v2  ;;  %4078 = vmatmul.msk.f32.gmra.mxu1 %vm561_vm1, %v5856_v13  ;;  %v2762_v13 = vld [vmem:[%s7657_s5 + $0x130] sm:$0xff]  ;;  %v2751_v2 = vld [vmem:[%s7657_s5 + $0xd8] sm:$0xff] }
 0x2de   : > { %2187 = vmatmul.f32.gmra.mxu0 %v1574_v63  ;;  %v1535_v63 = vsel %vm561_vm1, %v798_v12, %v4407_v40  ;;  %2985 = vmatpush.msra.mxu3 %v2751_v2  ;;  %v2760_v40 = vld [vmem:[%s7657_s5 + $0x120] sm:$0xff]  ;;  %v2799_v2 = vld [vmem:[%s7657_s5 + $0x258] sm:$0xff] }
 0x2df   : > { %v7661_v60 = vmax.f32 %v6079_v9, 0.0  ;;  %3102 = vmatpush.msra.mxu0 %v2763_v30  ;;  %v2761_v30 = vld [vmem:[%s7657_s5 + $0x128] sm:$0xff]  ;;  %v799_v12 = vld [vmem:[#allocation2 + $0x111] sm:$0xff]  ;;  %3324 = vmatpush.msra.mxu2 %v2799_v2 }
 0x2e0   : > { %v2003_v7 = vpop.f32.mrf.mxu3  ;;  %v6092_v17 = vld [vmem:[#allocation3 + $0x20] sm:$0xff] }
 0x2e1   : > { %2405 = vst [vmem:[#allocation3 + $0x31] sm:$0xff] %v7661_v60  ;;  %v2004_v18 = vadd.f32 %v2003_v7, %v1891_v14  ;;  %2893 = vmatmul.f32.gmra.mxu2 %v6092_v17  ;;  %3103 = vmatpush.msra.mxu0 %v2762_v13  ;;  %v871_v14 = vld [vmem:[#allocation2 + $0x180] sm:$0xff]  ;;  %v1781_v7 = vadd.f32 %v5782_v44, %v5538_v3  ;;  %v1414_v13 = vpop.permute.xlu1 %1413 }
 0x2e2   : > { %v2229_v27 = vpop.f32.mrf.mxu1  ;;  %v1575_v29 = vsel %vm561_vm1, %v871_v14, %v4453_v21  ;;  %v872_v14 = vld [vmem:[#allocation2 + $0x188] sm:$0xff] }
 0x2e3   : > { %v6107_v31 = vpop.f32.mrf.mxu0  ;;  %v2117_v8 = vadd.f32 %v5854_v38, %v2004_v18  ;;  %v6121_v38 = vpop.f32.mrf.mxu2  ;;  %v1894_v18 = vadd.f32 %v5822_v26, %v1781_v7  ;;  %3104 = vmatpush.msra.mxu0 %v2761_v30  ;;  %v927_v30 = vld [vmem:[#allocation2 + $0x122] sm:$0xff]  ;;  %v2758_v7 = vld [vmem:[%s7657_s5 + $0x110] sm:$0xff] }
 0x2e5   : > { %v6116_v60 = vadd.f32 %v2229_v27, %v2117_v8  ;;  %2053 = vmatmul.f32.gmra.mxu3 %v1535_v63  ;;  %4079 = vmatmul.msk.f32.gmra.mxu1 %vm561_vm1, %v5885_v47  ;;  %v4412_v27 = vunpack.i.l.bf16 %v5864_v45  ;;  %v2759_v47 = vld [vmem:[%s7657_s5 + $0x118] sm:$0xff] }
 0x2e6   : > { %2190 = vmatmul.f32.gmra.mxu0 %v1575_v29 }
 0x2e7   : > { %v7664_v3 = vmax.f32 %v6116_v60, 0.0  ;;  %3105 = vmatpush.msra.mxu0 %v2760_v40  ;;  %v1536_v63 = vsel %vm561_vm1, %v799_v12, %v4412_v27  ;;  %v1784_v40 = vadd.f32 %v5782_v44, %v5563_v48  ;;  %v6156_v27 = vpop.permute.xlu2 %1287  ;;  %v4417_v48 = vunpack.i.l.bf16 %v5893_v42  ;;  %v873_v12 = vld [vmem:[#allocation2 + $0x198] sm:$0xff] }
 0x2e8   : > { %v2006_v59 = vpop.f32.mrf.mxu3  ;;  %v6129_v21 = vld [vmem:[#allocation3 + $0x30] sm:$0xff]  ;;  %v2783_v42 = vld [vmem:[%s7657_s5 + $0x1d8] sm:$0xff] }
 0x2e9   : > { %2406 = vst [vmem:[#allocation3 + $0x39] sm:$0xff] %v7664_v3  ;;  %v2007_v29 = vadd.f32 %v2006_v59, %v1894_v18  ;;  %2896 = vmatmul.f32.gmra.mxu2 %v6129_v21  ;;  %3106 = vmatpush.msra.mxu0 %v2759_v47  ;;  %v1576_v59 = vsel %vm561_vm1, %v872_v14, %v1414_v13  ;;  %v1416_v2 = vpop.permute.xlu1 %1415  ;;  %v2750_v14 = vld [vmem:[%s7657_s5 + $0xd0] sm:$0xff] }
 0x2ea   : > { %v2232_v26 = vpop.f32.mrf.mxu1  ;;  %v1897_v47 = vadd.f32 %v5848_v61, %v1784_v40  ;;  %3211 = vmatpush.msra.mxu1 %v2783_v42  ;;  %2986 = vmatpush.msra.mxu3 %v2750_v14 }
 0x2eb   : > { %v6140_v45 = vpop.f32.mrf.mxu0  ;;  %v2120_v8 = vadd.f32 %v5883_v23, %v2007_v29  ;;  %v2757_v23 = vld [vmem:[%s7657_s5 + $0x108] sm:$0xff]  ;;  %3107 = vmatpush.msra.mxu0 %v2758_v7 }
 0x2ed   : > { %v6149_v18 = vadd.f32 %v2232_v26, %v2120_v8  ;;  %2056 = vmatmul.f32.gmra.mxu3 %v1536_v63  ;;  %4080 = vmatmul.msk.f32.gmra.mxu1 %vm561_vm1, %v927_v30  ;;  %v6161_v26 = vpop.f32.mrf.mxu2  ;;  %v2756_v63 = vld [vmem:[%s7657_s5 + $0x100] sm:$0xff] }
 0x2ee   : > { %2193 = vmatmul.f32.gmra.mxu0 %v1576_v59  ;;  %v800_v59 = vld [vmem:[#allocation2 + $0x121] sm:$0xff] }
 0x2ef   : > { %v7663_v29 = vmax.f32 %v6149_v18, 0.0  ;;  %3108 = vmatpush.msra.mxu0 %v2757_v23  ;;  %v1537_v23 = vsel %vm561_vm1, %v800_v59, %v4417_v48  ;;  %v1418_v48 = vpop.permute.xlu2 %1417 }
 0x2f0   : > { %v2009_v13 = vpop.f32.mrf.mxu3  ;;  %v6163_v8 = vld [vmem:[#allocation3 + $0x38] sm:$0xff] }
 0x2f1   : > { %2407 = vst [vmem:[#allocation3 + $0x49] sm:$0xff] %v7663_v29  ;;  %v2010_v61 = vadd.f32 %v2009_v13, %v1897_v47  ;;  %2899 = vmatmul.f32.gmra.mxu2 %v6163_v8  ;;  %v1577_v47 = vsel %vm561_vm1, %v873_v12, %v1416_v2  ;;  %3109 = vmatpush.msra.mxu0 %v2756_v63  ;;  %v928_v13 = vld [vmem:[#allocation2 + $0x12a] sm:$0xff]  ;;  %v874_v63 = vld [vmem:[#allocation2 + $0x1a0] sm:$0xff] }
 0x2f2   : > { %v2235_v30 = vpop.f32.mrf.mxu1  ;;  %v1787_v29 = vadd.f32 %v5782_v44, %v5587_v6  ;;  %v1578_v59 = vsel %vm561_vm1, %v874_v63, %v1418_v48 }
 0x2f3   : > { %v6177_v7 = vpop.f32.mrf.mxu0  ;;  %v2123_v40 = vadd.f32 %v5908_v36, %v2010_v61  ;;  %v4422_v61 = vunpack.i.l.bf16 %v5914_v57 }
 0x2f4   : > { %v1900_v42 = vadd.f32 %v5877_v55, %v1787_v29  ;;  %v2798_v55 = vld [vmem:[%s7657_s5 + $0x250] sm:$0xff] }
 0x2f5   : > { %v6184_v3 = vadd.f32 %v2235_v30, %v2123_v40  ;;  %2059 = vmatmul.f32.gmra.mxu3 %v1537_v23  ;;  %4081 = vmatmul.msk.f32.gmra.mxu1 %vm561_vm1, %v928_v13  ;;  %v6195_v14 = vpop.f32.mrf.mxu2  ;;  %v801_v40 = vld [vmem:[#allocation2 + $0x129] sm:$0xff]  ;;  %v929_v23 = vld [vmem:[#allocation2 + $0x13a] sm:$0xff]  ;;  %v1790_v13 = vadd.f32 %v5782_v44, %v5609_v51 }
 0x2f6   : > { %2196 = vmatmul.f32.gmra.mxu0 %v1577_v47  ;;  %3325 = vmatpush.msra.mxu2 %v2798_v55  ;;  %v1538_v47 = vsel %vm561_vm1, %v801_v40, %v4422_v61  ;;  %v2782_v51 = vld [vmem:[%s7657_s5 + $0x1d0] sm:$0xff] }
 0x2f7   : > { %v7676_v36 = vmax.f32 %v6184_v3, 0.0  ;;  %3212 = vmatpush.msra.mxu1 %v2782_v51  ;;  %v2499_v40 = vld [vmem:[#allocation3 + $0x2] sm:$0xff] }
 0x2f8   : > { %v2012_v2 = vpop.f32.mrf.mxu3  ;;  %v6190_v12 = vld [vmem:[#allocation3 + $0x48] sm:$0xff] }
 0x2f9   : > { %2408 = vst [vmem:[#allocation3 + $0x51] sm:$0xff] %v7676_v36  ;;  %v2013_v6 = vadd.f32 %v2012_v2, %v1900_v42  ;;  %2902 = vmatmul.f32.gmra.mxu2 %v6190_v12  ;;  %v1903_v2 = vadd.f32 %v5899_v19, %v1790_v13  ;;  %v2749_v19 = vld [vmem:[%s7657_s5 + $0xc8] sm:$0xff]  ;;  %v1793_v13 = vadd.f32 %v5782_v44, %v5629_v32 }
 0x2fa   : > { %v2238_v30 = vpop.f32.mrf.mxu1  ;;  %2987 = vmatpush.msra.mxu3 %v2749_v19 }
 0x2fb   : > { %v6200_v29 = vpop.f32.mrf.mxu0  ;;  %v2126_v57 = vadd.f32 %v5935_v28, %v2013_v6  ;;  %v4427_v6 = vunpack.i.l.bf16 %v5941_v16 }
 0x2fd   : > { %v6207_v42 = vadd.f32 %v2238_v30, %v2126_v57  ;;  %2062 = vmatmul.f32.gmra.mxu3 %v1538_v47  ;;  %4082 = vmatmul.msk.f32.gmra.mxu1 %vm561_vm1, %v929_v23  ;;  %v802_v57 = vld [vmem:[#allocation2 + $0x139] sm:$0xff]  ;;  %v930_v23 = vld [vmem:[#allocation2 + $0x142] sm:$0xff] }
 0x2fe   : > { %2199 = vmatmul.f32.gmra.mxu0 %v1578_v59  ;;  %v6227_v59 = vpop.f32.mrf.mxu2  ;;  %v1539_v47 = vsel %vm561_vm1, %v802_v57, %v4427_v6  ;;  %v803_v57 = vld [vmem:[#allocation2 + $0x141] sm:$0xff] }
 0x2ff   : > { %v7673_v28 = vmax.f32 %v6207_v42, 0.0 }
 0x300   : > { %v2015_v48 = vpop.f32.mrf.mxu3  ;;  %v6213_v63 = vld [vmem:[#allocation3 + $0x50] sm:$0xff] }
 0x301   : > { %2409 = vst [vmem:[#allocation3 + $0x61] sm:$0xff] %v7673_v28  ;;  %v2016_v61 = vadd.f32 %v2015_v48, %v1903_v2  ;;  %2905 = vmatmul.f32.gmra.mxu2 %v6213_v63  ;;  %v1906_v48 = vadd.f32 %v5920_v1, %v1793_v13 }
 0x302   : > { %v2241_v30 = vpop.f32.mrf.mxu1 }
 0x303   : > { %v6224_v16 = vpop.f32.mrf.mxu0  ;;  %v2129_v55 = vadd.f32 %v5956_v56, %v2016_v61  ;;  %v4432_v61 = vunpack.i.l.bf16 %v5962_v53  ;;  %v2500_v53 = vld [vmem:[#allocation3 + $0xa] sm:$0xff] }
 0x305   : > { %v6232_v2 = vadd.f32 %v2241_v30, %v2129_v55  ;;  %2065 = vmatmul.f32.gmra.mxu3 %v1539_v47  ;;  %4083 = vmatmul.msk.f32.gmra.mxu1 %vm561_vm1, %v930_v23  ;;  %v2797_v30 = vld [vmem:[%s7657_s5 + $0x248] sm:$0xff]  ;;  %v931_v47 = vld [vmem:[#allocation2 + $0x152] sm:$0xff]  ;;  %v1796_v23 = vadd.f32 %v5782_v44, %v5647_v54 }
 0x306   : > { %3110 = vmatmul.f32.vlgmr.msra.gmra.mxu0 %v2499_v40  ;;  %3326 = vmatpush.msra.mxu2 %v2797_v30  ;;  %v1540_v40 = vsel %vm561_vm1, %v803_v57, %v4432_v61 }
 0x307   : > { %v7672_v56 = vmax.f32 %v6232_v2, 0.0 }
 0x308   : > { %v2018_v51 = vpop.f32.mrf.mxu3  ;;  %v6238_v19 = vld [vmem:[#allocation3 + $0x60] sm:$0xff] }
 0x309   : > { %2410 = vst [vmem:[#allocation3 + $0x69] sm:$0xff] %v7672_v56  ;;  %v2019_v6 = vadd.f32 %v2018_v51, %v1906_v48  ;;  %2908 = vmatmul.f32.gmra.mxu2 %v6238_v19  ;;  %v6255_v48 = vpop.f32.mrf.mxu2  ;;  %v1909_v51 = vadd.f32 %v5947_v25, %v1796_v23  ;;  %v2748_v25 = vld [vmem:[%s7657_s5 + $0xc0] sm:$0xff]  ;;  %v1799_v23 = vadd.f32 %v5782_v44, %v5668_v4 }
 0x30a   : > { %v2244_v32 = vpop.f32.mrf.mxu1  ;;  %2988 = vmatpush.msra.mxu3 %v2748_v25 }
 0x30b   : > { %v6246_v55 = vpop.f32.mrf.mxu0  ;;  %v2132_v1 = vadd.f32 %v5983_v33, %v2019_v6  ;;  %v4437_v6 = vunpack.i.l.bf16 %v5991_v24 }
 0x30d   : > { %v6252_v13 = vadd.f32 %v2244_v32, %v2132_v1  ;;  %2068 = vmatmul.f32.gmra.mxu3 %v1540_v40  ;;  %4084 = vmatmul.msk.f32.gmra.mxu1 %vm561_vm1, %v931_v47  ;;  %v2781_v32 = vld [vmem:[%s7657_s5 + $0x1c8] sm:$0xff]  ;;  %v932_v47 = vld [vmem:[#allocation2 + $0x15a] sm:$0xff] }
 0x30e   : > { %3113 = vmatmul.f32.gmra.mxu0 %v2500_v53  ;;  %3213 = vmatpush.msra.mxu1 %v2781_v32  ;;  %v804_v53 = vld [vmem:[#allocation2 + $0x151] sm:$0xff]  ;;  %v1912_v32 = vadd.f32 %v5968_v50, %v1799_v23  ;;  %v805_v23 = vld [vmem:[#allocation2 + $0x159] sm:$0xff] }
 0x30f   : > { %v7666_v33 = vmax.f32 %v6252_v13, 0.0  ;;  %v1541_v40 = vsel %vm561_vm1, %v804_v53, %v4437_v6  ;;  %v2746_v50 = vld [vmem:[%s7657_s5 + $0xb0] sm:$0xff] }
 0x310   : > { %v2021_v30 = vpop.f32.mrf.mxu3  ;;  %v6260_v61 = vld [vmem:[#allocation3 + $0x68] sm:$0xff] }
 0x311   : > { %2411 = vst [vmem:[#allocation3 + $0x79] sm:$0xff] %v7666_v33  ;;  %v2022_v54 = vadd.f32 %v2021_v30, %v1909_v51  ;;  %2911 = vmatmul.f32.gmra.mxu2 %v6260_v61  ;;  %v2501_v30 = vld [vmem:[#allocation3 + $0x1a] sm:$0xff]  ;;  %v2502_v33 = vld [vmem:[#allocation3 + $0x22] sm:$0xff] }
 0x312   : > { %v2247_v1 = vpop.f32.mrf.mxu1 }
 0x313   : > { %v6271_v24 = vpop.f32.mrf.mxu0  ;;  %v2135_v57 = vadd.f32 %v6001_v49, %v2022_v54  ;;  %v4442_v49 = vunpack.i.l.bf16 %v6012_v20  ;;  %v6283_v54 = vpop.f32.mrf.mxu2  ;;  %v2796_v20 = vld [vmem:[%s7657_s5 + $0x240] sm:$0xff] }
 0x314   : > { %3327 = vmatpush.msra.mxu2 %v2796_v20 }
 0x315   : > { %v6277_v51 = vadd.f32 %v2247_v1, %v2135_v57  ;;  %2071 = vmatmul.f32.gmra.mxu3 %v1541_v40  ;;  %4085 = vmatmul.msk.f32.gmra.mxu1 %vm561_vm1, %v932_v47  ;;  %v2747_v1 = vld [vmem:[%s7657_s5 + $0xb8] sm:$0xff] }
 0x316   : > { %3116 = vmatmul.f32.gmra.mxu0 %v2501_v30  ;;  %2989 = vmatpush.msra.mxu3 %v2747_v1  ;;  %v1542_v30 = vsel %vm561_vm1, %v805_v23, %v4442_v49 }
 0x317   : > { %v7665_v25 = vmax.f32 %v6277_v51, 0.0 }
 0x318   : > { %v2024_v6 = vpop.f32.mrf.mxu3  ;;  %v6285_v53 = vld [vmem:[#allocation3 + $0x78] sm:$0xff]  ;;  %2990 = vmatpush.msra.mxu3 %v2746_v50 }
 0x319   : > { %2412 = vst [vmem:[#allocation3 + $0x81] sm:$0xff] %v7665_v25  ;;  %v2025_v4 = vadd.f32 %v2024_v6, %v1912_v32  ;;  %2914 = vmatmul.f32.gmra.mxu2 %v6285_v53  ;;  %v933_v32 = vld [vmem:[#allocation2 + $0x16a] sm:$0xff]  ;;  %v1802_v6 = vadd.f32 %v5782_v44, %v5686_v62 }
 0x31a   : > { %v2250_v57 = vpop.f32.mrf.mxu1  ;;  %v2745_v50 = vld [vmem:[%s7657_s5 + $0xa8] sm:$0xff] }
 0x31b   : > { %v6299_v40 = vpop.f32.mrf.mxu0  ;;  %v2138_v47 = vadd.f32 %v6034_v37, %v2025_v4  ;;  %v1915_v1 = vadd.f32 %v5996_v11, %v1802_v6  ;;  %v4447_v37 = vunpack.i.l.bf16 %v6048_v52  ;;  %v2744_v11 = vld [vmem:[%s7657_s5 + $0xa0] sm:$0xff]  ;;  %2991 = vmatpush.msra.mxu3 %v2745_v50  ;;  %v2743_v6 = vld [vmem:[%s7657_s5 + $0x98] sm:$0xff]  ;;  %v2778_v50 = vld [vmem:[%s7657_s5 + $0x1b0] sm:$0xff] }
 0x31c   : > { %v2780_v52 = vld [vmem:[%s7657_s5 + $0x1c0] sm:$0xff] }
 0x31d   : > { %v6305_v25 = vadd.f32 %v2250_v57, %v2138_v47  ;;  %2074 = vmatmul.f32.gmra.mxu3 %v1542_v30  ;;  %4086 = vmatmul.msk.f32.gmra.mxu1 %vm561_vm1, %v933_v32  ;;  %v2779_v47 = vld [vmem:[%s7657_s5 + $0x1b8] sm:$0xff]  ;;  %v806_v32 = vld [vmem:[#allocation2 + $0x169] sm:$0xff] }
 0x31e   : > { %3119 = vmatmul.f32.gmra.mxu0 %v2502_v33  ;;  %v6325_v33 = vpop.f32.mrf.mxu2  ;;  %3214 = vmatpush.msra.mxu1 %v2780_v52  ;;  %v1805_v52 = vadd.f32 %v5782_v44, %v5708_v22 }
 0x31f   : > { %v7667_v20 = vmax.f32 %v6305_v25, 0.0  ;;  %2992 = vmatpush.msra.mxu3 %v2744_v11 }
 0x320   : > { %v2027_v4 = vpop.f32.mrf.mxu3  ;;  %v6311_v49 = vld [vmem:[#allocation3 + $0x80] sm:$0xff]  ;;  %3215 = vmatpush.msra.mxu1 %v2779_v47  ;;  %v4452_v47 = vunpack.i.l.bf16 %v6084_v0  ;;  %v2740_v0 = vld [vmem:[%s7657_s5 + $0x80] sm:$0xff] }
 0x321   : > { %2413 = vst [vmem:[#allocation3 + $0x91] sm:$0xff] %v7667_v20  ;;  %v2028_v62 = vadd.f32 %v2027_v4, %v1915_v1  ;;  %2917 = vmatmul.f32.gmra.mxu2 %v6311_v49  ;;  %v1543_v1 = vsel %vm561_vm1, %v806_v32, %v4447_v37  ;;  %v934_v4 = vld [vmem:[#allocation2 + $0x172] sm:$0xff]  ;;  %2993 = vmatpush.msra.mxu3 %v2743_v6  ;;  %v2776_v6 = vld [vmem:[%s7657_s5 + $0x1a0] sm:$0xff] }
 0x322   : > { %v2253_v57 = vpop.f32.mrf.mxu1  ;;  %v2742_v37 = vld [vmem:[%s7657_s5 + $0x90] sm:$0xff]  ;;  %3216 = vmatpush.msra.mxu1 %v2778_v50 }
 0x323   : > { %v6330_v23 = vpop.f32.mrf.mxu0  ;;  %v2141_v30 = vadd.f32 %v6068_v46, %v2028_v62  ;;  %v2503_v46 = vld [vmem:[#allocation3 + $0x32] sm:$0xff]  ;;  %v1918_v62 = vadd.f32 %v6029_v58, %v1805_v52  ;;  %2994 = vmatpush.msra.mxu3 %v2742_v37  ;;  %v807_v50 = vld [vmem:[#allocation2 + $0x171] sm:$0xff] }
 0x324   : > { %v2777_v58 = vld [vmem:[%s7657_s5 + $0x1a8] sm:$0xff]  ;;  %v2775_v52 = vld [vmem:[%s7657_s5 + $0x198] sm:$0xff]  ;;  %v1544_v37 = vsel %vm561_vm1, %v807_v50, %v4452_v47 }
 0x325   : > { %v6342_v20 = vadd.f32 %v2253_v57, %v2141_v30  ;;  %2077 = vmatmul.f32.gmra.mxu3 %v1543_v1  ;;  %4087 = vmatmul.msk.f32.gmra.mxu1 %vm561_vm1, %v934_v4  ;;  %v2741_v30 = vld [vmem:[%s7657_s5 + $0x88] sm:$0xff] }
 0x326   : > { %3122 = vmatmul.f32.gmra.mxu0 %v2503_v46  ;;  %2995 = vmatpush.msra.mxu3 %v2741_v30  ;;  %v6374_v46 = vpop.f32.mrf.mxu2  ;;  %v2504_v47 = vld [vmem:[#allocation3 + $0x3a] sm:$0xff] }
 0x327   : > { %v7668_v11 = vmax.f32 %v6342_v20, 0.0  ;;  %3217 = vmatpush.msra.mxu1 %v2777_v58  ;;  %v2774_v58 = vld [vmem:[%s7657_s5 + $0x190] sm:$0xff] }
 0x328   : > { %v2030_v22 = vpop.f32.mrf.mxu3  ;;  %v6351_v44 = vld [vmem:[#allocation3 + $0x90] sm:$0xff]  ;;  %2996 = vmatpush.msra.mxu3 %v2740_v0 }
 0x329   : > { %2414 = vst [vmem:[#allocation3 + $0x99] sm:$0xff] %v7668_v11  ;;  %v2031_v57 = vadd.f32 %v2030_v22, %v1918_v62  ;;  %2920 = vmatmul.f32.gmra.mxu2 %v6351_v44  ;;  %v935_v62 = vld [vmem:[#allocation2 + $0x182] sm:$0xff]  ;;  %3218 = vmatpush.msra.mxu1 %v2776_v6  ;;  %v2795_v22 = vld [vmem:[%s7657_s5 + $0x238] sm:$0xff] }
 0x32a   : > { %v2256_v32 = vpop.f32.mrf.mxu1  ;;  %3328 = vmatpush.msra.mxu2 %v2795_v22 }
 0x32b   : > { %v6368_v1 = vpop.f32.mrf.mxu0  ;;  %v2144_v4 = vadd.f32 %v6107_v31, %v2031_v57  ;;  %v6383_v31 = vld [vmem:[%s7656_s4] ss:$0 sm:$0xff]  ;;  %3219 = vmatpush.msra.mxu1 %v2775_v52 }
 0x32c   : > { %v1808_v57 = vadd.f32 %v6383_v31, %v5729_v5 }
 0x32d   : > { %v6387_v30 = vadd.f32 %v2256_v32, %v2144_v4  ;;  %2080 = vmatmul.f32.gmra.mxu3 %v1544_v37  ;;  %4088 = vmatmul.msk.f32.gmra.mxu1 %vm561_vm1, %v935_v62  ;;  %v2773_v32 = vld [vmem:[%s7657_s5 + $0x188] sm:$0xff] }
 0x32e   : > { %3125 = vmatmul.f32.gmra.mxu0 %v2504_v47  ;;  %v1921_v0 = vadd.f32 %v6071_v15, %v1808_v57  ;;  %3220 = vmatpush.msra.mxu1 %v2774_v58  ;;  %v2772_v15 = vld [vmem:[%s7657_s5 + $0x180] sm:$0xff]  ;;  %v936_v57 = vld [vmem:[#allocation2 + $0x18a] sm:$0xff]  ;;  %v1811_v47 = vadd.f32 %v6383_v31, %v5749_v41 }
 0x32f   : > { %v7670_v6 = vmax.f32 %v6387_v30, 0.0  ;;  %v808_v62 = vld [vmem:[#allocation2 + $0x181] sm:$0xff] }
 0x330   : > { %v2033_v50 = vpop.f32.mrf.mxu3  ;;  %v6395_v11 = vld [vmem:[#allocation3 + $0x98] sm:$0xff]  ;;  %3221 = vmatpush.msra.mxu1 %v2773_v32  ;;  %v1545_v22 = vsel %vm561_vm1, %v808_v62, %v6156_v27  ;;  %v937_v62 = vld [vmem:[#allocation2 + $0x19a] sm:$0xff] }
 0x331   : > { %2415 = vst [vmem:[#allocation3 + $0xa9] sm:$0xff] %v7670_v6  ;;  %v2034_v5 = vadd.f32 %v2033_v50, %v1921_v0  ;;  %2923 = vmatmul.f32.gmra.mxu2 %v6395_v11  ;;  %v2505_v0 = vld [vmem:[#allocation3 + $0x4a] sm:$0xff]  ;;  %v6416_v50 = vpop.f32.mrf.mxu2 }
 0x332   : > { %v2259_v4 = vpop.f32.mrf.mxu1  ;;  %3222 = vmatpush.msra.mxu1 %v2772_v15  ;;  %v1290_v15 = vpop.permute.xlu0 %1289 }
 0x333   : > { %v6406_v52 = vpop.f32.mrf.mxu0  ;;  %v2147_v37 = vadd.f32 %v6140_v45, %v2034_v5  ;;  %v1924_v45 = vadd.f32 %v6121_v38, %v1811_v47 }
 0x335   : > { %v6413_v58 = vadd.f32 %v2259_v4, %v2147_v37  ;;  %2083 = vmatmul.f32.gmra.mxu3 %v1545_v22  ;;  %4089 = vmatmul.msk.f32.gmra.mxu1 %vm561_vm1, %v936_v57  ;;  %v2794_v4 = vld [vmem:[%s7657_s5 + $0x230] sm:$0xff] }
 0x336   : > { %3128 = vmatmul.f32.gmra.mxu0 %v2505_v0  ;;  %3329 = vmatpush.msra.mxu2 %v2794_v4  ;;  %v809_v57 = vld [vmem:[#allocation2 + $0x189] sm:$0xff]  ;;  %v1814_v0 = vadd.f32 %v6383_v31, %v5771_v43 }
 0x337   : > { %v7669_v5 = vmax.f32 %v6413_v58, 0.0  ;;  %v1546_v47 = vsel %vm561_vm1, %v809_v57, %v1290_v15  ;;  %v7711_v57 = vld [vmem:[#allocation5_spill] sm:$0xff] }
 0x338   : > { %v2036_v32 = vpop.f32.mrf.mxu3  ;;  %v6420_v27 = vld [vmem:[#allocation3 + $0xa8] sm:$0xff] }
 0x339   : > { %2416 = vst [vmem:[#allocation3 + $0xb1] sm:$0xff] %v7669_v5  ;;  %v2037_v41 = vadd.f32 %v2036_v32, %v1924_v45  ;;  %2926 = vmatmul.f32.gmra.mxu2 %v6420_v27  ;;  %v2506_v32 = vld [vmem:[#allocation3 + $0x52] sm:$0xff]  ;;  %v1927_v5 = vadd.f32 %v6161_v26, %v1814_v0  ;;  %v6439_v6 = vpop.f32.mrf.mxu2 }
 0x33a   : > { %v2262_v37 = vpop.f32.mrf.mxu1 }
 0x33b   : > { %v6428_v38 = vpop.f32.mrf.mxu0  ;;  %v2150_v22 = vadd.f32 %v6177_v7, %v2037_v41 }
 0x33d   : > { %v6434_v45 = vadd.f32 %v2262_v37, %v2150_v22  ;;  %2086 = vmatmul.f32.gmra.mxu3 %v1546_v47  ;;  %4090 = vmatmul.msk.f32.gmra.mxu1 %vm561_vm1, %v937_v62  ;;  %v938_v37 = vld [vmem:[#allocation2 + $0x1a2] sm:$0xff]  ;;  %v2467_v62 = vld [vmem:[#allocation3 + $0x1] sm:$0xff]  ;;  %v1817_v47 = vadd.f32 %v6383_v31, %v7711_v57 }
 0x33e   : > { %3131 = vmatmul.f32.gmra.mxu0 %v2506_v32  ;;  %v2507_v32 = vld [vmem:[#allocation3 + $0x62] sm:$0xff] }
 0x33f   : > { %v7671_v4 = vmax.f32 %v6434_v45, 0.0 }
 0x340   : > { %v2039_v7 = vpop.f32.mrf.mxu3  ;;  %v6441_v41 = vld [vmem:[#allocation3 + $0xb0] sm:$0xff] }
 0x341   : > { %2417 = vst [vmem:[#allocation3 + $0xc1] sm:$0xff] %v7671_v4  ;;  %v2040_v43 = vadd.f32 %v2039_v7, %v1927_v5  ;;  %2929 = vmatmul.f32.gmra.mxu2 %v6441_v41  ;;  %v1930_v5 = vadd.f32 %v6195_v14, %v1817_v47  ;;  %v6458_v28 = vpop.f32.mrf.mxu2 }
 0x342   : > { %v2265_v15 = vpop.f32.mrf.mxu1 }
 0x343   : > { %v6446_v22 = vpop.f32.mrf.mxu0  ;;  %v2153_v26 = vadd.f32 %v6200_v29, %v2040_v43  ;;  %v2793_v43 = vld [vmem:[%s7657_s5 + $0x228] sm:$0xff] }
 0x344   : > { %3330 = vmatpush.msra.mxu2 %v2793_v43 }
 0x345   : > { %v6451_v0 = vadd.f32 %v2265_v15, %v2153_v26  ;;  %4091 = vmatmul.msk.f32.gmra.mxu1 %vm561_vm1, %v938_v37  ;;  %2997 = vmatmul.f32.vlgmr.msra.gmra.mxu3 %v2467_v62  ;;  %v2468_v37 = vld [vmem:[#allocation3 + $0x9] sm:$0xff] }
 0x346   : > { %3134 = vmatmul.f32.gmra.mxu0 %v2507_v32  ;;  %v7712_v26 = vld [vmem:[#allocation7_spill] sm:$0xff] }
 0x347   : > { %v7674_v7 = vmax.f32 %v6451_v0, 0.0  ;;  %v1820_v57 = vadd.f32 %v6383_v31, %v7712_v26 }
 0x348   : > { %v2042_v4 = vpop.f32.mrf.mxu3  ;;  %v6456_v56 = vld [vmem:[#allocation3 + $0xc0] sm:$0xff] }
 0x349   : > { %2418 = vst [vmem:[#allocation3 + $0xc9] sm:$0xff] %v7674_v7  ;;  %v2043_v29 = vadd.f32 %v2042_v4, %v1930_v5  ;;  %2932 = vmatmul.f32.gmra.mxu2 %v6456_v56  ;;  %v2508_v4 = vld [vmem:[#allocation3 + $0x6a] sm:$0xff]  ;;  %v1933_v32 = vadd.f32 %v6227_v59, %v1820_v57  ;;  %v7714_v57 = vmax.f32 %v6007_v34, 0.0 }
 0x34a   : > { %v2268_v15 = vpop.f32.mrf.mxu1  ;;  %v2792_v34 = vld [vmem:[%s7657_s5 + $0x220] sm:$0xff] }
 0x34b   : > { %v6466_v14 = vpop.f32.mrf.mxu0  ;;  %v2156_v62 = vadd.f32 %v6224_v16, %v2043_v29  ;;  %3331 = vmatpush.msra.mxu2 %v2792_v34 }
 0x34d   : > { %v6471_v47 = vadd.f32 %v2268_v15, %v2156_v62  ;;  %3000 = vmatmul.f32.gmra.mxu3 %v2468_v37  ;;  %3223 = vmatmul.f32.vlgmr.msra.gmra.mxu1 %v6056_v10  ;;  %v6481_v15 = vpop.f32.mrf.mxu2  ;;  %v7713_v62 = vld [vmem:[#allocation9_spill] sm:$0xff] }
 0x34e   : > { %3137 = vmatmul.f32.gmra.mxu0 %v2508_v4  ;;  %v1823_v59 = vadd.f32 %v6383_v31, %v7713_v62  ;;  %v2509_v4 = vld [vmem:[#allocation3 + $0x7a] sm:$0xff] }
 0x34f   : > { %v7675_v5 = vmax.f32 %v6471_v47, 0.0 }
 0x350   : > { %v2045_v7 = vpop.f32.mrf.mxu3  ;;  %v6476_v43 = vld [vmem:[#allocation3 + $0xc8] sm:$0xff] }
 0x351   : > { %2419 = vst [vmem:[#allocation3 + $0xd9] sm:$0xff] %v7675_v5  ;;  %v2046_v16 = vadd.f32 %v2045_v7, %v1933_v32  ;;  %2935 = vmatmul.f32.gmra.mxu2 %v6476_v43  ;;  %v1936_v7 = vadd.f32 %v6255_v48, %v1823_v59  ;;  %v2510_v59 = vld [vmem:[#allocation3 + $0x82] sm:$0xff] }
 0x352   : > { %v2271_v29 = vpop.f32.mrf.mxu1 }
 0x353   : > { %v6483_v37 = vpop.f32.mrf.mxu0  ;;  %v2159_v10 = vadd.f32 %v6246_v55, %v2046_v16 }
 0x355   : > { %v6488_v26 = vadd.f32 %v2271_v29, %v2159_v10  ;;  %3003 = vmatmul.f32.gmra.mxu3 %v7714_v57  ;;  %3226 = vmatmul.f32.gmra.mxu1 %v6092_v17  ;;  %v1826_v10 = vadd.f32 %v6383_v31, %v5881_v35 }
 0x356   : > { %3140 = vmatmul.f32.gmra.mxu0 %v2509_v4 }
 0x357   : > { %v7686_v32 = vmax.f32 %v6488_v26, 0.0  ;;  %v1939_v57 = vadd.f32 %v6283_v54, %v1826_v10  ;;  %v7717_v10 = vmax.f32 %v6079_v9, 0.0  ;;  %v2791_v9 = vld [vmem:[%s7657_s5 + $0x218] sm:$0xff] }
 0x358   : > { %v2048_v5 = vpop.f32.mrf.mxu3  ;;  %v6495_v36 = vld [vmem:[#allocation3 + $0xd8] sm:$0xff]  ;;  %3332 = vmatpush.msra.mxu2 %v2791_v9 }
 0x359   : > { %2420 = vst [vmem:[#allocation3 + $0xe1] sm:$0xff] %v7686_v32  ;;  %v2049_v55 = vadd.f32 %v2048_v5, %v1936_v7  ;;  %2938 = vmatmul.f32.gmra.mxu2 %v6495_v36  ;;  %v7715_v5 = vmax.f32 %v6043_v39, 0.0 }
 0x35a   : > { %v2274_v16 = vpop.f32.mrf.mxu1 }
 0x35b   : > { %v6503_v17 = vpop.f32.mrf.mxu0  ;;  %v2162_v48 = vadd.f32 %v6271_v24, %v2049_v55 }
 0x35c   : > { %v6506_v29 = vpop.f32.mrf.mxu2 }
 0x35d   : > { %v6510_v62 = vadd.f32 %v2274_v16, %v2162_v48  ;;  %3006 = vmatmul.f32.gmra.mxu3 %v7715_v5  ;;  %3229 = vmatmul.f32.gmra.mxu1 %v6129_v21  ;;  %v7716_v16 = vld [vmem:[#allocation12_spill] sm:$0xff] }
 0x35e   : > { %3143 = vmatmul.f32.gmra.mxu0 %v2510_v59  ;;  %v1829_v54 = vadd.f32 %v6383_v31, %v7716_v16  ;;  %v2511_v5 = vld [vmem:[#allocation3 + $0x92] sm:$0xff]  ;;  %v7718_v16 = vld [vmem:[#allocation14_spill] sm:$0xff] }
 0x35f   : > { %v7684_v4 = vmax.f32 %v6510_v62, 0.0 }
 0x360   : > { %v2051_v7 = vpop.f32.mrf.mxu3  ;;  %v6517_v24 = vld [vmem:[#allocation3 + $0xe0] sm:$0xff]  ;;  %v1942_v59 = vadd.f32 %v6325_v33, %v1829_v54  ;;  %v1832_v54 = vadd.f32 %v6383_v31, %v7718_v16  ;;  %v7720_v16 = vld [vmem:[#allocation16_spill] sm:$0xff] }
 0x361   : > { %2421 = vst [vmem:[#allocation3 + $0xf1] sm:$0xff] %v7684_v4  ;;  %v2052_v35 = vadd.f32 %v2051_v7, %v1939_v57  ;;  %2941 = vmatmul.f32.gmra.mxu2 %v6517_v24 }
 0x362   : > { %v2277_v55 = vpop.f32.mrf.mxu1 }
 0x363   : > { %v6522_v39 = vpop.f32.mrf.mxu0  ;;  %v2165_v34 = vadd.f32 %v6299_v40, %v2052_v35 }
 0x364   : > { %v6525_v21 = vpop.f32.mrf.mxu2 }
 0x365   : > { %v6529_v48 = vadd.f32 %v2277_v55, %v2165_v34  ;;  %3009 = vmatmul.f32.gmra.mxu3 %v7717_v10  ;;  %3232 = vmatmul.f32.gmra.mxu1 %v6163_v8 }
 0x366   : > { %3146 = vmatmul.f32.gmra.mxu0 %v2511_v5  ;;  %v7719_v5 = vmax.f32 %v6116_v60, 0.0 }
 0x367   : > { %v7677_v57 = vmax.f32 %v6529_v48, 0.0 }
 0x368   : > { %v2054_v7 = vpop.f32.mrf.mxu3  ;;  %v6536_v40 = vld [vmem:[#allocation3 + $0xf0] sm:$0xff] }
 0x369   : > { %2422 = vst [vmem:[#allocation3 + $0xf9] sm:$0xff] %v7677_v57  ;;  %v2055_v35 = vadd.f32 %v2054_v7, %v1942_v59  ;;  %2944 = vmatmul.f32.gmra.mxu2 %v6536_v40  ;;  %v2512_v59 = vld [vmem:[#allocation3 + $0x9a] sm:$0xff]  ;;  %v1945_v7 = vadd.f32 %v6374_v46, %v1832_v54  ;;  %v1835_v46 = vadd.f32 %v6383_v31, %v7720_v16 }
 0x36a   : > { %v2280_v55 = vpop.f32.mrf.mxu1  ;;  %v7722_v16 = vld [vmem:[#allocation18_spill] sm:$0xff] }
 0x36b   : > { %v6544_v8 = vpop.f32.mrf.mxu0  ;;  %v2168_v33 = vadd.f32 %v6330_v23, %v2055_v35 }
 0x36c   : > { %v6547_v34 = vpop.f32.mrf.mxu2 }
 0x36d   : > { %v6551_v10 = vadd.f32 %v2280_v55, %v2168_v33  ;;  %3012 = vmatmul.f32.gmra.mxu3 %v7719_v5  ;;  %3235 = vmatmul.f32.gmra.mxu1 %v6190_v12  ;;  %v7721_v5 = vmax.f32 %v6149_v18, 0.0  ;;  %v2790_v18 = vld [vmem:[%s7657_s5 + $0x210] sm:$0xff] }
 0x36e   : > { %3149 = vmatmul.f32.gmra.mxu0 %v2512_v59  ;;  %v2513_v59 = vld [vmem:[#allocation3 + $0xaa] sm:$0xff]  ;;  %3333 = vmatpush.msra.mxu2 %v2790_v18 }
 0x36f   : > { %v7678_v9 = vmax.f32 %v6551_v10, 0.0 }
 0x370   : > { %v2057_v57 = vpop.f32.mrf.mxu3  ;;  %v6558_v23 = vld [vmem:[#allocation3 + $0xf8] sm:$0xff] }
 0x371   : > { %2423 = vst [vmem:[#allocation3 + $0x109] sm:$0xff] %v7678_v9  ;;  %v2058_v35 = vadd.f32 %v2057_v57, %v1945_v7  ;;  %2947 = vmatmul.f32.gmra.mxu2 %v6558_v23  ;;  %v1948_v57 = vadd.f32 %v6416_v50, %v1835_v46  ;;  %v1838_v46 = vadd.f32 %v6383_v31, %v7722_v16  ;;  %v2515_v16 = vld [vmem:[#allocation3 + $0xc2] sm:$0xff] }
 0x372   : > { %v2283_v55 = vpop.f32.mrf.mxu1 }
 0x373   : > { %v6563_v60 = vpop.f32.mrf.mxu0  ;;  %v2171_v33 = vadd.f32 %v6368_v1, %v2058_v35 }
 0x374   : > { %v6566_v12 = vpop.f32.mrf.mxu2 }
 0x375   : > { %v6570_v54 = vadd.f32 %v2283_v55, %v2171_v33  ;;  %3015 = vmatmul.f32.gmra.mxu3 %v7721_v5  ;;  %3238 = vmatmul.f32.gmra.mxu1 %v6213_v63 }
 0x376   : > { %3152 = vmatmul.f32.gmra.mxu0 %v2513_v59  ;;  %v2514_v59 = vld [vmem:[#allocation3 + $0xb2] sm:$0xff] }
 0x377   : > { %v7679_v7 = vmax.f32 %v6570_v54, 0.0 }
 0x378   : > { %v2060_v9 = vpop.f32.mrf.mxu3  ;;  %v6577_v1 = vld [vmem:[#allocation3 + $0x108] sm:$0xff] }
 0x379   : > { %2424 = vst [vmem:[#allocation3 + $0x111] sm:$0xff] %v7679_v7  ;;  %v2061_v35 = vadd.f32 %v2060_v9, %v1948_v57  ;;  %2950 = vmatmul.f32.gmra.mxu2 %v6577_v1  ;;  %v7723_v9 = vmax.f32 %v6184_v3, 0.0  ;;  %v1951_v57 = vadd.f32 %v6439_v6, %v1838_v46  ;;  %v7724_v6 = vmax.f32 %v6207_v42, 0.0  ;;  %v2789_v42 = vld [vmem:[%s7657_s5 + $0x208] sm:$0xff] }
 0x37a   : > { %v2286_v55 = vpop.f32.mrf.mxu1  ;;  %3334 = vmatpush.msra.mxu2 %v2789_v42 }
 0x37b   : > { %v6585_v63 = vpop.f32.mrf.mxu0  ;;  %v2174_v50 = vadd.f32 %v6406_v52, %v2061_v35 }
 0x37c   : > { %v6588_v33 = vpop.f32.mrf.mxu2 }
 0x37d   : > { %v6592_v5 = vadd.f32 %v2286_v55, %v2174_v50  ;;  %3018 = vmatmul.f32.gmra.mxu3 %v7723_v9  ;;  %3241 = vmatmul.f32.gmra.mxu1 %v6238_v19 }
 0x37e   : > { %3155 = vmatmul.f32.gmra.mxu0 %v2514_v59 }
 0x37f   : > { %v7683_v18 = vmax.f32 %v6592_v5, 0.0 }
 0x380   : > { %v2063_v7 = vpop.f32.mrf.mxu3  ;;  %v6599_v52 = vld [vmem:[#allocation3 + $0x110] sm:$0xff] }
 0x381   : > { %2425 = vst [vmem:[#allocation3 + $0x121] sm:$0xff] %v7683_v18  ;;  %v2064_v31 = vadd.f32 %v2063_v7, %v1951_v57  ;;  %2953 = vmatmul.f32.gmra.mxu2 %v6599_v52 }
 0x382   : > { %v2289_v35 = vpop.f32.mrf.mxu1 }
 0x383   : > { %v2177_v3 = vadd.f32 %v6428_v38, %v2064_v31  ;;  %v6605_v55 = vpop.f32.mrf.mxu0  ;;  %v7725_v38 = vld [vmem:[#allocation4_spill] sm:$0xff] }
 0x384   : > { %v6607_v19 = vpop.f32.mrf.mxu2 }
 0x385   : > { %v6609_v50 = vadd.f32 %v2289_v35, %v2177_v3  ;;  %3021 = vmatmul.f32.gmra.mxu3 %v7724_v6  ;;  %3244 = vmatmul.f32.gmra.mxu1 %v6260_v61  ;;  %v7726_v6 = vmax.f32 %v6232_v2, 0.0 }
 0x386   : > { %3158 = vmatmul.f32.gmra.mxu0 %v2515_v16  ;;  %v2516_v16 = vld [vmem:[#allocation3 + $0xca] sm:$0xff] }
 0x387   : > { %v7680_v7 = vmax.f32 %v6609_v50, 0.0 }
 0x388   : > { %v2066_v46 = vpop.f32.mrf.mxu3  ;;  %v6615_v9 = vld [vmem:[#allocation3 + $0x120] sm:$0xff] }
 0x389   : > { %2426 = vst [vmem:[#allocation3 + $0x129] sm:$0xff] %v7680_v7  ;;  %v2067_v59 = vadd.f32 %v2066_v46, %v7725_v38  ;;  %2956 = vmatmul.f32.gmra.mxu2 %v6615_v9 }
 0x38a   : > { %v2292_v57 = vpop.f32.mrf.mxu1 }
 0x38b   : > { %v2180_v61 = vadd.f32 %v6446_v22, %v2067_v59  ;;  %v6625_v31 = vpop.f32.mrf.mxu0  ;;  %v7727_v22 = vld [vmem:[#allocation6_spill] sm:$0xff] }
 0x38c   : > { %v6627_v35 = vpop.f32.mrf.mxu2 }
 0x38d   : > { %v6629_v3 = vadd.f32 %v2292_v57, %v2180_v61  ;;  %3024 = vmatmul.f32.gmra.mxu3 %v7726_v6  ;;  %3247 = vmatmul.f32.gmra.mxu1 %v6285_v53  ;;  %v7728_v6 = vmax.f32 %v6252_v13, 0.0  ;;  %v2788_v13 = vld [vmem:[%s7657_s5 + $0x200] sm:$0xff] }
 0x38e   : > { %3161 = vmatmul.f32.gmra.mxu0 %v2516_v16  ;;  %v2517_v16 = vld [vmem:[#allocation3 + $0xda] sm:$0xff]  ;;  %3335 = vmatpush.msra.mxu2 %v2788_v13 }
 0x38f   : > { %v7681_v46 = vmax.f32 %v6629_v3, 0.0 }
 0x390   : > { %v2069_v38 = vpop.f32.mrf.mxu3  ;;  %v6635_v7 = vld [vmem:[#allocation3 + $0x128] sm:$0xff] }
 0x391   : > { %2427 = vst [vmem:[#allocation3 + $0x139] sm:$0xff] %v7681_v46  ;;  %v2070_v59 = vadd.f32 %v2069_v38, %v7727_v22  ;;  %2959 = vmatmul.f32.gmra.mxu2 %v6635_v7 }
 0x392   : > { %v2295_v42 = vpop.f32.mrf.mxu1 }
 0x393   : > { %v2183_v2 = vadd.f32 %v6466_v14, %v2070_v59  ;;  %v6642_v57 = vpop.f32.mrf.mxu0  ;;  %v7729_v14 = vld [vmem:[#allocation8_spill] sm:$0xff] }
 0x394   : > { %v6644_v61 = vpop.f32.mrf.mxu2 }
 0x395   : > { %v6646_v53 = vadd.f32 %v2295_v42, %v2183_v2  ;;  %3027 = vmatmul.f32.gmra.mxu3 %v7728_v6  ;;  %3250 = vmatmul.f32.gmra.mxu1 %v6311_v49 }
 0x396   : > { %3164 = vmatmul.f32.gmra.mxu0 %v2517_v16 }
 0x397   : > { %v7682_v38 = vmax.f32 %v6646_v53, 0.0 }
 0x398   : > { %v2072_v22 = vpop.f32.mrf.mxu3  ;;  %v6652_v46 = vld [vmem:[#allocation3 + $0x138] sm:$0xff] }
 0x399   : > { %2428 = vst [vmem:[#allocation3 + $0x141] sm:$0xff] %v7682_v38  ;;  %v2073_v59 = vadd.f32 %v2072_v22, %v7729_v14  ;;  %2962 = vmatmul.f32.gmra.mxu2 %v6652_v46  ;;  %v7730_v38 = vmax.f32 %v6277_v51, 0.0  ;;  %v2518_v22 = vld [vmem:[#allocation3 + $0xe2] sm:$0xff] }
 0x39a   : > { %v2298_v42 = vpop.f32.mrf.mxu1  ;;  %v2819_v51 = vld [vmem:[%s7657_s5 + $0x2f8] sm:$0xff] }
 0x39b   : > { %v2186_v49 = vadd.f32 %v6483_v37, %v2073_v59  ;;  %v6662_v2 = vpop.f32.mrf.mxu0  ;;  %v7731_v37 = vld [vmem:[#allocation10_spill] sm:$0xff]  ;;  %3433 = vmatpush.msrb.mxu3 %v2819_v51 }
 0x39c   : > { %v6664_v6 = vpop.f32.mrf.mxu2 }
 0x39d   : > { %v6666_v16 = vadd.f32 %v2298_v42, %v2186_v49  ;;  %3030 = vmatmul.f32.gmra.mxu3 %v7730_v38  ;;  %3253 = vmatmul.f32.gmra.mxu1 %v6351_v44 }
 0x39e   : > { %3167 = vmatmul.f32.gmra.mxu0 %v2518_v22  ;;  %v7733_v22 = vmax.f32 %v6305_v25, 0.0  ;;  %v2867_v25 = vld [vmem:[%s7657_s5 + $0x478] sm:$0xff] }
 0x39f   : > { %v7685_v14 = vmax.f32 %v6666_v16, 0.0  ;;  %3772 = vmatpush.msrb.mxu2 %v2867_v25 }
 0x3a0   : > { %v2075_v18 = vpop.f32.mrf.mxu3  ;;  %v6672_v4 = vld [vmem:[#allocation3 + $0x140] sm:$0xff] }
 0x3a1   : > { %2429 = vst [vmem:[#allocation3 + $0x151] sm:$0xff] %v7685_v14  ;;  %v2076_v59 = vadd.f32 %v2075_v18, %v7731_v37  ;;  %2965 = vmatmul.f32.gmra.mxu2 %v6672_v4  ;;  %v2519_v18 = vld [vmem:[#allocation3 + $0xf2] sm:$0xff] }
 0x3a2   : > { %v2301_v38 = vpop.f32.mrf.mxu1 }
 0x3a3   : > { %v2189_v44 = vadd.f32 %v6503_v17, %v2076_v59  ;;  %v6682_v13 = vpop.f32.mrf.mxu0  ;;  %v7734_v17 = vld [vmem:[#allocation11_spill] sm:$0xff] }
 0x3a4   : > { %v6684_v42 = vpop.f32.mrf.mxu2 }
 0x3a5   : > { %v6686_v49 = vadd.f32 %v2301_v38, %v2189_v44  ;;  %3033 = vmatmul.f32.gmra.mxu3 %v7733_v22  ;;  %3256 = vmatmul.f32.gmra.mxu1 %v6395_v11 }
 0x3a6   : > { %3170 = vmatmul.f32.gmra.mxu0 %v2519_v18  ;;  %v7736_v18 = vmax.f32 %v6342_v20, 0.0 }
 0x3a7   : > { %7732 = vst [vmem:[#allocation5_spill] sm:$0xff] %v6686_v49  ;;  %v7687_v37 = vmax.f32 %v6686_v49, 0.0 }
 0x3a8   : > { %v2078_v14 = vpop.f32.mrf.mxu3  ;;  %v6692_v32 = vld [vmem:[#allocation3 + $0x150] sm:$0xff] }
 0x3a9   : > { %2430 = vst [vmem:[#allocation3 + $0x159] sm:$0xff] %v7687_v37  ;;  %v2079_v59 = vadd.f32 %v2078_v14, %v7734_v17  ;;  %2968 = vmatmul.f32.gmra.mxu2 %v6692_v32  ;;  %v2520_v14 = vld [vmem:[#allocation3 + $0xfa] sm:$0xff]  ;;  %v2835_v17 = vld [vmem:[%s7657_s5 + $0x378] sm:$0xff] }
 0x3aa   : > { %v2304_v51 = vpop.f32.mrf.mxu1  ;;  %3546 = vmatpush.msrb.mxu0 %v2835_v17 }
 0x3ab   : > { %v2192_v11 = vadd.f32 %v6522_v39, %v2079_v59  ;;  %v6702_v38 = vpop.f32.mrf.mxu0  ;;  %v6717_v39 = vld [vmem:[%s7657_s5 + $0x3f8] sm:$0xff]  ;;  %v2818_v59 = vld [vmem:[%s7657_s5 + $0x2f0] sm:$0xff] }
 0x3ac   : > { %v6704_v44 = vpop.f32.mrf.mxu2  ;;  %7737 = vst [vmem:[#allocation9_spill] sm:$0xff] %v6717_v39  ;;  %3659 = vmatpush.msrb.mxu1 %v6717_v39  ;;  %3434 = vmatpush.msrb.mxu3 %v2818_v59  ;;  %v7740_v39 = vmax.f32 %v6387_v30, 0.0  ;;  %v2521_v59 = vld [vmem:[#allocation3 + $0x10a] sm:$0xff]  ;;  %v2866_v30 = vld [vmem:[%s7657_s5 + $0x470] sm:$0xff] }
 0x3ad   : > { %v6706_v22 = vadd.f32 %v2304_v51, %v2192_v11  ;;  %3036 = vmatmul.f32.gmra.mxu3 %v7736_v18  ;;  %3259 = vmatmul.f32.gmra.mxu1 %v6420_v27  ;;  %v7738_v51 = vld [vmem:[#allocation13_spill] sm:$0xff] }
 0x3ae   : > { %3173 = vmatmul.f32.gmra.mxu0 %v2520_v14  ;;  %3773 = vmatpush.msrb.mxu2 %v2866_v30 }
 0x3af   : > { %7735 = vst [vmem:[#allocation7_spill] sm:$0xff] %v6706_v22  ;;  %v7690_v20 = vmax.f32 %v6706_v22, 0.0 }
 0x3b0   : > { %v2081_v27 = vpop.f32.mrf.mxu3  ;;  %v6724_v25 = vld [vmem:[#allocation3 + $0x158] sm:$0xff] }
 0x3b1   : > { %2431 = vst [vmem:[#allocation3 + $0x169] sm:$0xff] %v7690_v20  ;;  %v2082_v11 = vadd.f32 %v2081_v27, %v7738_v51  ;;  %2971 = vmatmul.f32.gmra.mxu2 %v6724_v25 }
 0x3b2   : > { %v2307_v18 = vpop.f32.mrf.mxu1 }
 0x3b3   : > { %v2195_v14 = vadd.f32 %v6544_v8, %v2082_v11  ;;  %v6731_v37 = vpop.f32.mrf.mxu0  ;;  %v7741_v8 = vld [vmem:[#allocation15_spill] sm:$0xff] }
 0x3b4   : > { %v6733_v49 = vpop.f32.mrf.mxu2 }
 0x3b5   : > { %v6735_v17 = vadd.f32 %v2307_v18, %v2195_v14  ;;  %3039 = vmatmul.f32.gmra.mxu3 %v7740_v39  ;;  %3262 = vmatmul.f32.gmra.mxu1 %v6441_v41 }
 0x3b6   : > { %3176 = vmatmul.f32.gmra.mxu0 %v2521_v59  ;;  %v7743_v59 = vmax.f32 %v6413_v58, 0.0  ;;  %v2817_v58 = vld [vmem:[%s7657_s5 + $0x2e8] sm:$0xff] }
 0x3b7   : > { %7739 = vst [vmem:[#allocation12_spill] sm:$0xff] %v6735_v17  ;;  %v7692_v27 = vmax.f32 %v6735_v17, 0.0  ;;  %v2522_v17 = vld [vmem:[#allocation3 + $0x112] sm:$0xff]  ;;  %3435 = vmatpush.msrb.mxu3 %v2817_v58 }
 0x3b8   : > { %v2084_v51 = vpop.f32.mrf.mxu3  ;;  %v6741_v20 = vld [vmem:[#allocation3 + $0x168] sm:$0xff] }
 0x3b9   : > { %2432 = vst [vmem:[#allocation3 + $0x171] sm:$0xff] %v7692_v27  ;;  %v2085_v11 = vadd.f32 %v2084_v51, %v7741_v8  ;;  %2974 = vmatmul.f32.gmra.mxu2 %v6741_v20  ;;  %v2834_v51 = vld [vmem:[%s7657_s5 + $0x370] sm:$0xff] }
 0x3ba   : > { %v2310_v39 = vpop.f32.mrf.mxu1  ;;  %3547 = vmatpush.msrb.mxu0 %v2834_v51  ;;  %v2523_v51 = vld [vmem:[#allocation3 + $0x122] sm:$0xff] }
 0x3bb   : > { %v2198_v41 = vadd.f32 %v6563_v60, %v2085_v11  ;;  %v6759_v8 = vpop.f32.mrf.mxu0  ;;  %v6764_v60 = vld [vmem:[%s7657_s5 + $0x3f0] sm:$0xff] }
 0x3bc   : > { %v6751_v18 = vpop.f32.mrf.mxu2  ;;  %3660 = vmatpush.msrb.mxu1 %v6764_v60 }
 0x3bd   : > { %7742 = vst [vmem:[#allocation14_spill] sm:$0xff] %v6751_v18  ;;  %v2311_v14 = vadd.f32 %v2310_v39, %v2198_v41  ;;  %3042 = vmatmul.f32.gmra.mxu3 %v7743_v59  ;;  %3265 = vmatmul.f32.gmra.mxu1 %v6456_v56  ;;  %v7744_v39 = vld [vmem:[#allocation17_spill] sm:$0xff] }
 0x3be   : > { %3179 = vmatmul.f32.gmra.mxu0 %v2522_v17 }
 0x3bf   : > { %v2346_v11 = vmax.f32 %v2311_v14, 0.0  ;;  %v7745_v14 = vmax.f32 %v6434_v45, 0.0 }
 0x3c0   : > { %v2087_v56 = vpop.f32.mrf.mxu3  ;;  %v6770_v30 = vld [vmem:[#allocation3 + $0x170] sm:$0xff] }
 0x3c1   : > { %2433 = vst [vmem:[#allocation3 + $0x181] sm:$0xff] %v2346_v11  ;;  %v2088_v17 = vadd.f32 %v2087_v56, %v7744_v39  ;;  %2977 = vmatmul.f32.gmra.mxu2 %v6770_v30  ;;  %v2563_v56 = vld [vmem:[#allocation3 + $0x19] sm:$0xff] }
 0x3c2   : > { %v2313_v41 = vpop.f32.mrf.mxu1 }
 0x3c3   : > { %v2201_v59 = vadd.f32 %v6585_v63, %v2088_v17  ;;  %v6780_v58 = vpop.f32.mrf.mxu0  ;;  %v2865_v63 = vld [vmem:[%s7657_s5 + $0x468] sm:$0xff] }
 0x3c4   : > { %v6775_v27 = vpop.f32.mrf.mxu2  ;;  %3774 = vmatpush.msrb.mxu2 %v2865_v63 }
 0x3c5   : > { %v2314_v18 = vadd.f32 %v2313_v41, %v2201_v59  ;;  %3045 = vmatmul.f32.gmra.mxu3 %v7745_v14  ;;  %3268 = vmatmul.f32.gmra.mxu1 %v6476_v43  ;;  %v2524_v59 = vld [vmem:[#allocation3 + $0x12a] sm:$0xff]  ;;  %v2564_v14 = vld [vmem:[#allocation3 + $0x21] sm:$0xff] }
 0x3c6   : > { %3182 = vmatmul.f32.gmra.mxu0 %v2523_v51  ;;  %v2831_v51 = vld [vmem:[%s7657_s5 + $0x358] sm:$0xff] }
 0x3c7   : > { %v2347_v22 = vmax.f32 %v2314_v18, 0.0  ;;  %v7746_v18 = vmax.f32 %v6451_v0, 0.0  ;;  %v2816_v0 = vld [vmem:[%s7657_s5 + $0x2e0] sm:$0xff] }
 0x3c8   : > { %v2998_v11 = vpop.f32.mrf.mxu3  ;;  %3436 = vmatpush.msrb.mxu3 %v2816_v0  ;;  %v2828_v0 = vld [vmem:[%s7657_s5 + $0x340] sm:$0xff] }
 0x3c9   : > { %2434 = vst [vmem:[#allocation3 + $0x189] sm:$0xff] %v2347_v22  ;;  %v2999_v39 = vadd.f32 %v2998_v11, %v6458_v28  ;;  %3336 = vmatmul.f32.vlgmr.msra.gmra.mxu2 %v2563_v56  ;;  %v2833_v28 = vld [vmem:[%s7657_s5 + $0x368] sm:$0xff]  ;;  %v2832_v22 = vld [vmem:[%s7657_s5 + $0x360] sm:$0xff] }
 0x3ca   : > { %v3224_v17 = vpop.f32.mrf.mxu1  ;;  %3548 = vmatpush.msrb.mxu0 %v2833_v28 }
 0x3cb   : > { %v3112_v45 = vadd.f32 %v6605_v55, %v2999_v39  ;;  %v6803_v55 = vld [vmem:[%s7657_s5 + $0x3e8] sm:$0xff]  ;;  %v6813_v56 = vpop.f32.mrf.mxu0 }
 0x3cc   : > { %v6787_v41 = vpop.f32.mrf.mxu2  ;;  %3661 = vmatpush.msrb.mxu1 %v6803_v55  ;;  %3549 = vmatpush.msrb.mxu0 %v2832_v22  ;;  %v6829_v22 = vld [vmem:[#allocation3 + $0x31] sm:$0xff] }
 0x3cd   : > { %v6789_v43 = vadd.f32 %v3224_v17, %v3112_v45  ;;  %3048 = vmatmul.f32.gmra.mxu3 %v7746_v18  ;;  %3271 = vmatmul.f32.gmra.mxu1 %v6495_v36  ;;  %v2830_v45 = vld [vmem:[%s7657_s5 + $0x350] sm:$0xff] }
 0x3ce   : > { %3185 = vmatmul.f32.gmra.mxu0 %v2524_v59  ;;  %v7747_v59 = vmax.f32 %v6471_v47, 0.0  ;;  %v2864_v47 = vld [vmem:[%s7657_s5 + $0x460] sm:$0xff] }
 0x3cf   : > { %3550 = vmatpush.msrb.mxu0 %v2831_v51  ;;  %3775 = vmatpush.msrb.mxu2 %v2864_v47 }
 0x3d0   : > { %v3001_v36 = vpop.f32.mrf.mxu3 }
 0x3d1   : > { %v3002_v11 = vadd.f32 %v3001_v36, %v6481_v15  ;;  %3339 = vmatmul.f32.gmra.mxu2 %v2564_v14  ;;  %v2525_v15 = vld [vmem:[#allocation3 + $0x13a] sm:$0xff]  ;;  %3551 = vmatpush.msrb.mxu0 %v2830_v45  ;;  %v2526_v45 = vld [vmem:[#allocation3 + $0x142] sm:$0xff] }
 0x3d2   : > { %v3227_v39 = vpop.f32.mrf.mxu1 }
 0x3d3   : > { %v3115_v63 = vadd.f32 %v6625_v31, %v3002_v11  ;;  %v2829_v31 = vld [vmem:[%s7657_s5 + $0x348] sm:$0xff]  ;;  %v6840_v51 = vpop.f32.mrf.mxu0 }
 0x3d4   : > { %v6816_v17 = vpop.f32.mrf.mxu2  ;;  %3552 = vmatpush.msrb.mxu0 %v2829_v31  ;;  %v6864_v31 = vld [vmem:[#allocation3 + $0x39] sm:$0xff] }
 0x3d5   : > { %v6821_v18 = vadd.f32 %v3227_v39, %v3115_v63  ;;  %3051 = vmatmul.f32.gmra.mxu3 %v7747_v59  ;;  %3274 = vmatmul.f32.gmra.mxu1 %v6517_v24  ;;  %v7748_v63 = vmax.f32 %v6488_v26, 0.0  ;;  %v6858_v59 = vld [vmem:[%s7657_s5 + $0x3e0] sm:$0xff] }
 0x3d6   : > { %3188 = vmatmul.f32.gmra.mxu0 %v2525_v15  ;;  %v2815_v15 = vld [vmem:[%s7657_s5 + $0x2d8] sm:$0xff]  ;;  %3662 = vmatpush.msrb.mxu1 %v6858_v59 }
 0x3d7   : > { %3553 = vmatpush.msrb.mxu0 %v2828_v0  ;;  %3437 = vmatpush.msrb.mxu3 %v2815_v15  ;;  %v2822_v15 = vld [vmem:[%s7657_s5 + $0x310] sm:$0xff] }
 0x3d8   : > { %v3004_v28 = vpop.f32.mrf.mxu3 }
 0x3d9   : > { %v3005_v36 = vadd.f32 %v3004_v28, %v6506_v29  ;;  %3342 = vmatmul.f32.gmra.mxu2 %v6829_v22  ;;  %v2827_v29 = vld [vmem:[%s7657_s5 + $0x338] sm:$0xff] }
 0x3da   : > { %v3230_v24 = vpop.f32.mrf.mxu1  ;;  %3554 = vmatpush.msrb.mxu0 %v2827_v29  ;;  %v7749_v29 = vmax.f32 %v6510_v62, 0.0 }
 0x3db   : > { %v3118_v14 = vadd.f32 %v6642_v57, %v3005_v36  ;;  %v2826_v57 = vld [vmem:[%s7657_s5 + $0x330] sm:$0xff] }
 0x3dc   : > { %v6842_v11 = vpop.f32.mrf.mxu2  ;;  %3555 = vmatpush.msrb.mxu0 %v2826_v57  ;;  %v6887_v57 = vld [vmem:[#allocation3 + $0x49] sm:$0xff] }
 0x3dd   : > { %v6847_v39 = vadd.f32 %v3230_v24, %v3118_v14  ;;  %3054 = vmatmul.f32.gmra.mxu3 %v7748_v63  ;;  %3277 = vmatmul.f32.gmra.mxu1 %v6536_v40  ;;  %v2825_v40 = vld [vmem:[%s7657_s5 + $0x328] sm:$0xff]  ;;  %v2824_v24 = vld [vmem:[%s7657_s5 + $0x320] sm:$0xff] }
 0x3de   : > { %3191 = vmatmul.f32.gmra.mxu0 %v2526_v45  ;;  %v2527_v63 = vld [vmem:[#allocation3 + $0x152] sm:$0xff] }
 0x3df   : > { %3556 = vmatpush.msrb.mxu0 %v2825_v40 }
 0x3e0   : > { %v3007_v26 = vpop.f32.mrf.mxu3 }
 0x3e1   : > { %v3008_v28 = vadd.f32 %v3007_v26, %v6525_v21  ;;  %3345 = vmatmul.f32.gmra.mxu2 %v6864_v31  ;;  %v6882_v21 = vpop.f32.mrf.mxu0  ;;  %3557 = vmatpush.msrb.mxu0 %v2824_v24  ;;  %v2528_v24 = vld [vmem:[#allocation3 + $0x15a] sm:$0xff] }
 0x3e2   : > { %v3233_v0 = vpop.f32.mrf.mxu1 }
 0x3e3   : > { %v3121_v36 = vadd.f32 %v6662_v2, %v3008_v28  ;;  %v2823_v2 = vld [vmem:[%s7657_s5 + $0x318] sm:$0xff] }
 0x3e4   : > { %v6872_v47 = vpop.f32.mrf.mxu2  ;;  %3558 = vmatpush.msrb.mxu0 %v2823_v2  ;;  %v6922_v2 = vld [vmem:[#allocation3 + $0x51] sm:$0xff] }
 0x3e5   : > { %v6877_v14 = vadd.f32 %v3233_v0, %v3121_v36  ;;  %3057 = vmatmul.f32.gmra.mxu3 %v7749_v29  ;;  %3280 = vmatmul.f32.gmra.mxu1 %v6558_v23  ;;  %v2863_v23 = vld [vmem:[%s7657_s5 + $0x458] sm:$0xff]  ;;  %v2821_v0 = vld [vmem:[%s7657_s5 + $0x308] sm:$0xff] }
 0x3e6   : > { %3194 = vmatmul.f32.gmra.mxu0 %v2527_v63  ;;  %3776 = vmatpush.msrb.mxu2 %v2863_v23  ;;  %v6914_v29 = vld [vmem:[%s7657_s5 + $0x3d8] sm:$0xff]  ;;  %v2814_v63 = vld [vmem:[%s7657_s5 + $0x2d0] sm:$0xff] }
 0x3e7   : > { %3559 = vmatpush.msrb.mxu0 %v2822_v15  ;;  %3663 = vmatpush.msrb.mxu1 %v6914_v29 }
 0x3e8   : > { %v3010_v45 = vpop.f32.mrf.mxu3  ;;  %3438 = vmatpush.msrb.mxu3 %v2814_v63 }
 0x3e9   : > { %v3011_v62 = vadd.f32 %v3010_v45, %v6547_v34  ;;  %3348 = vmatmul.f32.gmra.mxu2 %v6887_v57  ;;  %v7750_v34 = vmax.f32 %v6529_v48, 0.0  ;;  %3560 = vmatpush.msrb.mxu0 %v2821_v0  ;;  %v6920_v48 = vpop.f32.mrf.mxu0  ;;  %v2529_v0 = vld [vmem:[#allocation3 + $0x16a] sm:$0xff] }
 0x3ea   : > { %v3236_v26 = vpop.f32.mrf.mxu1 }
 0x3eb   : > { %v3124_v40 = vadd.f32 %v6682_v13, %v3011_v62  ;;  %v2820_v13 = vld [vmem:[%s7657_s5 + $0x300] sm:$0xff] }
 0x3ec   : > { %v6898_v28 = vpop.f32.mrf.mxu2  ;;  %3561 = vmatpush.msrb.mxu0 %v2820_v13 }
 0x3ed   : > { %v6903_v36 = vadd.f32 %v3236_v26, %v3124_v40  ;;  %3060 = vmatmul.f32.gmra.mxu3 %v7750_v34  ;;  %3283 = vmatmul.f32.gmra.mxu1 %v6577_v1  ;;  %v7751_v40 = vmax.f32 %v6551_v10, 0.0 }
 0x3ee   : > { %3197 = vmatmul.f32.gmra.mxu0 %v2528_v24  ;;  %v6934_v24 = vld [vmem:[#allocation3 + $0x61] sm:$0xff] }
 0x3f0   : > { %v3013_v1 = vpop.f32.mrf.mxu3 }
 0x3f1   : > { %v3014_v45 = vadd.f32 %v3013_v1, %v6566_v12  ;;  %3351 = vmatmul.f32.gmra.mxu2 %v6922_v2  ;;  %v6941_v13 = vpop.f32.mrf.mxu0 }
 0x3f2   : > { %v3239_v15 = vpop.f32.mrf.mxu1 }
 0x3f3   : > { %v3127_v62 = vadd.f32 %v6702_v38, %v3014_v45  ;;  %v2862_v38 = vld [vmem:[%s7657_s5 + $0x450] sm:$0xff]  ;;  %v7752_v45 = vmax.f32 %v6570_v54, 0.0 }
 0x3f4   : > { %v6927_v23 = vpop.f32.mrf.mxu2  ;;  %3777 = vmatpush.msrb.mxu2 %v2862_v38 }
 0x3f5   : > { %v6929_v26 = vadd.f32 %v3239_v15, %v3127_v62  ;;  %3063 = vmatmul.f32.gmra.mxu3 %v7751_v40  ;;  %3286 = vmatmul.f32.gmra.mxu1 %v6599_v52  ;;  %v6954_v15 = vld [vmem:[%s7657_s5 + $0x3d0] sm:$0xff]  ;;  %v6960_v40 = vld [vmem:[#allocation3 + $0x69] sm:$0xff] }
 0x3f6   : > { %3200 = vmatmul.f32.gmra.mxu0 %v2529_v0  ;;  %3664 = vmatpush.msrb.mxu1 %v6954_v15 }
 0x3f8   : > { %v3016_v34 = vpop.f32.mrf.mxu3 }
 0x3f9   : > { %v3017_v12 = vadd.f32 %v3016_v34, %v6588_v33  ;;  %3354 = vmatmul.f32.gmra.mxu2 %v6934_v24  ;;  %v2530_v33 = vld [vmem:[#allocation3 + $0x172] sm:$0xff]  ;;  %v6965_v34 = vpop.f32.mrf.mxu0 }
 0x3fa   : > { %v3242_v63 = vpop.f32.mrf.mxu1 }
 0x3fb   : > { %v3130_v10 = vadd.f32 %v6731_v37, %v3017_v12  ;;  %v2813_v37 = vld [vmem:[%s7657_s5 + $0x2c8] sm:$0xff] }
 0x3fc   : > { %v6944_v1 = vpop.f32.mrf.mxu2  ;;  %3439 = vmatpush.msrb.mxu3 %v2813_v37 }
 0x3fd   : > { %v6946_v52 = vadd.f32 %v3242_v63, %v3130_v10  ;;  %3066 = vmatmul.f32.gmra.mxu3 %v7752_v45  ;;  %3289 = vmatmul.f32.gmra.mxu1 %v6615_v9  ;;  %v7753_v63 = vmax.f32 %v6592_v5, 0.0  ;;  %v2628_v10 = vld [vmem:[#allocation3 + $0x30] sm:$0xff] }
 0x3fe   : > { %3203 = vmatmul.f32.gmra.mxu0 %v2530_v33 }
 0x400   : > { %v3019_v62 = vpop.f32.mrf.mxu3 }
 0x401   : > { %v3020_v54 = vadd.f32 %v3019_v62, %v6607_v19  ;;  %3357 = vmatmul.f32.gmra.mxu2 %v6960_v40  ;;  %v6974_v19 = vld [vmem:[#allocation3 + $0x79] sm:$0xff] }
 0x402   : > { %v3245_v9 = vpop.f32.mrf.mxu1 }
 0x403   : > { %v3133_v0 = vadd.f32 %v6759_v8, %v3020_v54  ;;  %v2861_v8 = vld [vmem:[%s7657_s5 + $0x448] sm:$0xff]  ;;  %v7754_v54 = vmax.f32 %v6609_v50, 0.0 }
 0x404   : > { %v6967_v12 = vpop.f32.mrf.mxu2  ;;  %3778 = vmatpush.msrb.mxu2 %v2861_v8 }
 0x405   : > { %v6969_v38 = vadd.f32 %v3245_v9, %v3133_v0  ;;  %3069 = vmatmul.f32.gmra.mxu3 %v7753_v63  ;;  %3292 = vmatmul.f32.gmra.mxu1 %v6635_v7  ;;  %v6989_v9 = vpop.f32.mrf.mxu0  ;;  %v6994_v0 = vld [vmem:[%s7657_s5 + $0x3c8] sm:$0xff]  ;;  %v7000_v63 = vld [vmem:[#allocation3 + $0x81] sm:$0xff] }
 0x406   : > { %3562 = vmatmul.f32.vlgmr.msrb.gmra.mxu0 %v2628_v10  ;;  %3665 = vmatpush.msrb.mxu1 %v6994_v0 }
 0x408   : > { %v3022_v45 = vpop.f32.mrf.mxu3 }
 0x409   : > { %v3023_v33 = vadd.f32 %v3022_v45, %v6627_v35  ;;  %3360 = vmatmul.f32.gmra.mxu2 %v6974_v19  ;;  %v2629_v35 = vld [vmem:[#allocation3 + $0x38] sm:$0xff] }
 0x40a   : > { %v3248_v37 = vpop.f32.mrf.mxu1 }
 0x40b   : > { %v3136_v5 = vadd.f32 %v6780_v58, %v3023_v33  ;;  %v2812_v58 = vld [vmem:[%s7657_s5 + $0x2c0] sm:$0xff] }
 0x40c   : > { %v6982_v62 = vpop.f32.mrf.mxu2  ;;  %3440 = vmatpush.msrb.mxu3 %v2812_v58 }
 0x40d   : > { %v6984_v7 = vadd.f32 %v3248_v37, %v3136_v5  ;;  %3072 = vmatmul.f32.gmra.mxu3 %v7754_v54  ;;  %3295 = vmatmul.f32.gmra.mxu1 %v6652_v46  ;;  %v7755_v37 = vmax.f32 %v6629_v3, 0.0  ;;  %v2630_v5 = vld [vmem:[#allocation3 + $0x48] sm:$0xff]  ;;  %v7015_v54 = vpop.f32.mrf.mxu0  ;;  %v2860_v3 = vld [vmem:[%s7657_s5 + $0x440] sm:$0xff] }
 0x40e   : > { %3565 = vmatmul.f32.gmra.mxu0 %v2629_v35  ;;  %3779 = vmatpush.msrb.mxu2 %v2860_v3  ;;  %v2806_v3 = vld [vmem:[%s7657_s5 + $0x290] sm:$0xff] }
 0x410   : > { %v3025_v50 = vpop.f32.mrf.mxu3 }
 0x411   : > { %v3026_v46 = vadd.f32 %v3025_v50, %v6644_v61  ;;  %3363 = vmatmul.f32.gmra.mxu2 %v7000_v63  ;;  %v2811_v61 = vld [vmem:[%s7657_s5 + $0x2b8] sm:$0xff] }
 0x412   : > { %v3251_v10 = vpop.f32.mrf.mxu1  ;;  %3441 = vmatpush.msrb.mxu3 %v2811_v61  ;;  %v2808_v61 = vld [vmem:[%s7657_s5 + $0x2a0] sm:$0xff] }
 0x413   : > { %v3139_v45 = vadd.f32 %v6813_v56, %v3026_v46  ;;  %v7017_v56 = vld [vmem:[#allocation3 + $0x91] sm:$0xff] }
 0x414   : > { %v7005_v33 = vpop.f32.mrf.mxu2 }
 0x415   : > { %v7007_v8 = vadd.f32 %v3251_v10, %v3139_v45  ;;  %3075 = vmatmul.f32.gmra.mxu3 %v7755_v37  ;;  %3298 = vmatmul.f32.gmra.mxu1 %v6672_v4  ;;  %v2810_v4 = vld [vmem:[%s7657_s5 + $0x2b0] sm:$0xff]  ;;  %v2631_v45 = vld [vmem:[#allocation3 + $0x50] sm:$0xff] }
 0x416   : > { %3568 = vmatmul.f32.gmra.mxu0 %v2630_v5  ;;  %3442 = vmatpush.msrb.mxu3 %v2810_v4  ;;  %v2809_v5 = vld [vmem:[%s7657_s5 + $0x2a8] sm:$0xff] }
 0x418   : > { %v3028_v35 = vpop.f32.mrf.mxu3  ;;  %3443 = vmatpush.msrb.mxu3 %v2809_v5  ;;  %v2632_v5 = vld [vmem:[#allocation3 + $0x60] sm:$0xff] }
 0x419   : > { %v3029_v58 = vadd.f32 %v3028_v35, %v6664_v6  ;;  %3366 = vmatmul.f32.gmra.mxu2 %v7017_v56  ;;  %v7757_v6 = vmax.f32 %v6646_v53, 0.0  ;;  %v7049_v53 = vld [vmem:[%s7657_s5 + $0x3b8] sm:$0xff] }
 0x41a   : > { %v3254_v50 = vpop.f32.mrf.mxu1  ;;  %3444 = vmatpush.msrb.mxu3 %v2808_v61 }
 0x41b   : > { %v3142_v46 = vadd.f32 %v6840_v51, %v3029_v58  ;;  %v7044_v51 = vld [vmem:[%s7657_s5 + $0x3c0] sm:$0xff]  ;;  %v7055_v58 = vld [vmem:[#allocation3 + $0x99] sm:$0xff] }
 0x41c   : > { %v7028_v10 = vpop.f32.mrf.mxu2  ;;  %3666 = vmatpush.msrb.mxu1 %v7044_v51 }
 0x41d   : > { %v7030_v37 = vadd.f32 %v3254_v50, %v3142_v46  ;;  %3078 = vmatmul.f32.gmra.mxu3 %v7757_v6  ;;  %3301 = vmatmul.f32.gmra.mxu1 %v6692_v32  ;;  %v2807_v32 = vld [vmem:[%s7657_s5 + $0x298] sm:$0xff]  ;;  %v7066_v50 = vld [vmem:[%s7657_s5 + $0x3b0] sm:$0xff]  ;;  %v7068_v46 = vpop.f32.mrf.mxu0 }
 0x41e   : > { %3571 = vmatmul.f32.gmra.mxu0 %v2631_v45  ;;  %3667 = vmatpush.msrb.mxu1 %v7049_v53 }
 0x41f   : > { %7756 = vst [vmem:[#allocation16_spill] sm:$0xff] %v7030_v37  ;;  %3445 = vmatpush.msrb.mxu3 %v2807_v32  ;;  %v2805_v37 = vld [vmem:[%s7657_s5 + $0x288] sm:$0xff]  ;;  %v2804_v32 = vld [vmem:[%s7657_s5 + $0x280] sm:$0xff] }
 0x420   : > { %v3031_v35 = vpop.f32.mrf.mxu3  ;;  %3668 = vmatpush.msrb.mxu1 %v7066_v50 }
 0x421   : > { %v3032_v4 = vadd.f32 %v3031_v35, %v6684_v42  ;;  %3369 = vmatmul.f32.gmra.mxu2 %v7055_v58  ;;  %3446 = vmatpush.msrb.mxu3 %v2806_v3  ;;  %v7760_v35 = vmax.f32 %v6666_v16, 0.0  ;;  %v7093_v16 = vld [vmem:[%s7657_s5 + $0x3a0] sm:$0xff]  ;;  %v7101_v3 = vld [vmem:[%s7657_s5 + $0x398] sm:$0xff] }
 0x422   : > { %v3257_v45 = vpop.f32.mrf.mxu1 }
 0x423   : > { %v3145_v6 = vadd.f32 %v6882_v21, %v3032_v4  ;;  %v7085_v21 = vld [vmem:[%s7657_s5 + $0x3a8] sm:$0xff]  ;;  %3447 = vmatpush.msrb.mxu3 %v2805_v37  ;;  %v7096_v4 = vld [vmem:[#allocation3 + $0xa9] sm:$0xff] }
 0x424   : > { %v7072_v42 = vpop.f32.mrf.mxu2  ;;  %3669 = vmatpush.msrb.mxu1 %v7085_v21  ;;  %v2859_v37 = vld [vmem:[%s7657_s5 + $0x438] sm:$0xff] }
 0x425   : > { %7758 = vst [vmem:[#allocation18_spill] sm:$0xff] %v7072_v42  ;;  %v7074_v61 = vadd.f32 %v3257_v45, %v3145_v6  ;;  %3081 = vmatmul.f32.gmra.mxu3 %v7760_v35  ;;  %3304 = vmatmul.f32.gmra.mxu1 %v6724_v25 }
 0x426   : > { %3574 = vmatmul.f32.gmra.mxu0 %v2632_v5  ;;  %3448 = vmatpush.msrb.mxu3 %v2804_v32  ;;  %v7761_v5 = vld [vmem:[#allocation9_spill] sm:$0xff]  ;;  %v7117_v32 = vpop.f32.mrf.mxu0 }
 0x427   : > { %7759 = vst [vmem:[#allocation4_spill] sm:$0xff] %v7074_v61  ;;  %3670 = vmatpush.msrb.mxu1 %v7093_v16  ;;  %3780 = vmatpush.msrb.mxu2 %v2859_v37  ;;  %v7764_v37 = vld [vmem:[#allocation5_spill] sm:$0xff] }
 0x428   : > { %v3034_v25 = vpop.f32.mrf.mxu3  ;;  %4132 = vmatpush.msra.mxu3 %v7761_v5  ;;  %v7765_v42 = vmax.f32 %v7764_v37, 0.0  ;;  %v7134_v5 = vld [vmem:[%s7657_s5 + $0x380] sm:$0xff] }
 0x429   : > { %v3035_v45 = vadd.f32 %v3034_v25, %v6704_v44  ;;  %3372 = vmatmul.f32.gmra.mxu2 %v7096_v4  ;;  %3671 = vmatpush.msrb.mxu1 %v7101_v3  ;;  %v7115_v44 = vld [vmem:[%s7657_s5 + $0x390] sm:$0xff] }
 0x42a   : > { %v3260_v6 = vpop.f32.mrf.mxu1  ;;  %4133 = vmatpush.msra.mxu3 %v6764_v60 }
 0x42b   : > { %v3148_v35 = vadd.f32 %v6920_v48, %v3035_v45  ;;  %v2633_v48 = vld [vmem:[#allocation3 + $0x68] sm:$0xff]  ;;  %v2837_v45 = vld [vmem:[%s7657_s5 + $0x388] sm:$0xff]  ;;  %3672 = vmatpush.msrb.mxu1 %v7115_v44 }
 0x42c   : > { %v7119_v25 = vpop.f32.mrf.mxu2  ;;  %4134 = vmatpush.msra.mxu3 %v6803_v55 }
 0x42d   : > { %7762 = vst [vmem:[#allocation6_spill] sm:$0xff] %v7119_v25  ;;  %v7122_v61 = vadd.f32 %v3260_v6, %v3148_v35  ;;  %3084 = vmatmul.f32.gmra.mxu3 %v7765_v42  ;;  %3307 = vmatmul.f32.gmra.mxu1 %v6741_v20  ;;  %v7137_v6 = vld [vmem:[#allocation3 + $0xb1] sm:$0xff]  ;;  %v7155_v25 = vld [vmem:[#allocation3 + $0xc1] sm:$0xff] }
 0x42e   : > { %3577 = vmatmul.f32.gmra.mxu0 %v2633_v48  ;;  %3673 = vmatpush.msrb.mxu1 %v2837_v45  ;;  %v7766_v48 = vld [vmem:[#allocation7_spill] sm:$0xff] }
 0x42f   : > { %7763 = vst [vmem:[#allocation8_spill] sm:$0xff] %v7122_v61  ;;  %4135 = vmatpush.msra.mxu3 %v6858_v59  ;;  %v7767_v61 = vmax.f32 %v7766_v48, 0.0 }
 0x430   : > { %v3037_v60 = vpop.f32.mrf.mxu3  ;;  %3674 = vmatpush.msrb.mxu1 %v7134_v5 }
 0x431   : > { %v3038_v20 = vadd.f32 %v3037_v60, %v6733_v49  ;;  %3375 = vmatmul.f32.gmra.mxu2 %v7137_v6  ;;  %4136 = vmatpush.msra.mxu3 %v6914_v29  ;;  %v2634_v49 = vld [vmem:[#allocation3 + $0x78] sm:$0xff]  ;;  %v7152_v60 = vpop.f32.mrf.mxu0  ;;  %v7768_v29 = vld [vmem:[#allocation14_spill] sm:$0xff] }
 0x432   : > { %v3263_v42 = vpop.f32.mrf.mxu1 }
 0x433   : > { %v3151_v35 = vadd.f32 %v6941_v13, %v3038_v20  ;;  %4137 = vmatpush.msra.mxu3 %v6954_v15 }
 0x434   : > { %v7145_v37 = vpop.f32.mrf.mxu2 }
 0x435   : > { %v7147_v55 = vadd.f32 %v3263_v42, %v3151_v35  ;;  %3087 = vmatmul.f32.gmra.mxu3 %v7767_v61  ;;  %3310 = vmatmul.f32.gmra.mxu1 %v6770_v30  ;;  %v2858_v61 = vld [vmem:[%s7657_s5 + $0x430] sm:$0xff]  ;;  %v7769_v35 = vld [vmem:[#allocation12_spill] sm:$0xff] }
 0x436   : > { %3580 = vmatmul.f32.gmra.mxu0 %v2634_v49  ;;  %4138 = vmatpush.msra.mxu3 %v6994_v0  ;;  %v7167_v42 = vld [vmem:[#allocation3 + $0x180] sm:$0xff]  ;;  %v7770_v48 = vmax.f32 %v7769_v35, 0.0 }
 0x437   : > { %3781 = vmatpush.msrb.mxu2 %v2858_v61  ;;  %v2635_v49 = vld [vmem:[#allocation3 + $0x80] sm:$0xff] }
 0x438   : > { %v3040_v59 = vpop.f32.mrf.mxu3  ;;  %4139 = vmatpush.msra.mxu3 %v7044_v51 }
 0x439   : > { %v3041_v13 = vadd.f32 %v3040_v59, %v7768_v29  ;;  %3378 = vmatmul.f32.gmra.mxu2 %v7155_v25  ;;  %v7176_v51 = vpop.f32.mrf.mxu0  ;;  %v7178_v59 = vld [vmem:[#allocation3 + $0xc9] sm:$0xff] }
 0x43a   : > { %v3266_v30 = vpop.f32.mrf.mxu1  ;;  %4140 = vmatpush.msra.mxu3 %v7049_v53 }
 0x43b   : > { %v3154_v20 = vadd.f32 %v6965_v34, %v3041_v13 }
 0x43c   : > { %v7165_v15 = vpop.f32.mrf.mxu2  ;;  %4141 = vmatpush.msra.mxu3 %v7066_v50  ;;  %v2595_v50 = vld [vmem:[#allocation3 + $0x1a] sm:$0xff] }
 0x43d   : > { %v7170_v0 = vadd.f32 %v3266_v30, %v3154_v20  ;;  %3090 = vmatmul.f32.gmra.mxu3 %v7770_v48  ;;  %3313 = vmatmul.f32.gmra.mxu1 %v7167_v42  ;;  %v7187_v30 = vld [vmem:[#allocation3 + $0x188] sm:$0xff] }
 0x43e   : > { %3583 = vmatmul.f32.gmra.mxu0 %v2635_v49  ;;  %4142 = vmatpush.msra.mxu3 %v7085_v21 }
 0x440   : > { %v3043_v34 = vpop.f32.mrf.mxu3  ;;  %4143 = vmatpush.msra.mxu3 %v7093_v16  ;;  %v7194_v16 = vld [vmem:[#allocation3 + $0xd9] sm:$0xff] }
 0x441   : > { %v3044_v53 = vadd.f32 %v3043_v34, %v6775_v27  ;;  %3381 = vmatmul.f32.gmra.mxu2 %v7178_v59  ;;  %v2636_v27 = vld [vmem:[#allocation3 + $0x90] sm:$0xff]  ;;  %v7201_v35 = vpop.f32.mrf.mxu0  ;;  %v2596_v34 = vld [vmem:[#allocation3 + $0x22] sm:$0xff] }
 0x442   : > { %v3269_v29 = vpop.f32.mrf.mxu1  ;;  %4144 = vmatpush.msra.mxu3 %v7101_v3  ;;  %v2857_v3 = vld [vmem:[%s7657_s5 + $0x428] sm:$0xff] }
 0x443   : > { %v3157_v13 = vadd.f32 %v6989_v9, %v3044_v53  ;;  %3782 = vmatpush.msrb.mxu2 %v2857_v3  ;;  %v2638_v3 = vld [vmem:[#allocation3 + $0xa8] sm:$0xff] }
 0x444   : > { %v7185_v61 = vpop.f32.mrf.mxu2  ;;  %4145 = vmatpush.msra.mxu3 %v7115_v44 }
 0x445   : > { %v7190_v20 = vadd.f32 %v3269_v29, %v3157_v13  ;;  %3316 = vmatmul.f32.gmra.mxu1 %v7187_v30  ;;  %3449 = vmatmul.f32.vlgmr.msrb.gmra.mxu3 %v2595_v50  ;;  %v7211_v13 = vld [vmem:[#allocation3 + $0xe1] sm:$0xff] }
 0x446   : > { %3586 = vmatmul.f32.gmra.mxu0 %v2636_v27  ;;  %4146 = vmatpush.msra.mxu3 %v2837_v45  ;;  %v2637_v45 = vld [vmem:[#allocation3 + $0x98] sm:$0xff] }
 0x448   : > { %v3046_v21 = vpop.f32.mrf.mxu3  ;;  %4147 = vmatpush.msra.mxu3 %v7134_v5 }
 0x449   : > { %v3047_v9 = vadd.f32 %v3046_v21, %v6787_v41  ;;  %3384 = vmatmul.f32.gmra.mxu2 %v7194_v16  ;;  %v7216_v27 = vpop.f32.mrf.mxu0 }
 0x44a   : > { %v3272_v48 = vpop.f32.mrf.mxu1 }
 0x44b   : > { %v3160_v44 = vadd.f32 %v7015_v54, %v3047_v9 }
 0x44c   : > { %v3337_v49 = vpop.f32.mrf.mxu2 }
 0x44d   : > { %v7205_v53 = vadd.f32 %v3272_v48, %v3160_v44  ;;  %v7208_v41 = vadd.f32 %v3337_v49, %v6789_v43  ;;  %3452 = vmatmul.f32.gmra.mxu3 %v2596_v34  ;;  %3675 = vmatmul.f32.vlgmr.msrb.gmra.mxu1 %v6829_v22  ;;  %v7218_v43 = vld [vmem:[#allocation3 + $0x32] sm:$0xff] }
 0x44e   : > { %3589 = vmatmul.f32.gmra.mxu0 %v2637_v45  ;;  %v7227_v48 = vld [vmem:[#allocation3 + $0xf1] sm:$0xff]  ;;  %v7235_v45 = vld [vmem:[#allocation3 + $0x3a] sm:$0xff] }
 0x44f   : > { %v2856_v44 = vld [vmem:[%s7657_s5 + $0x420] sm:$0xff] }
 0x450   : > { %v3049_v29 = vpop.f32.mrf.mxu3  ;;  %3783 = vmatpush.msrb.mxu2 %v2856_v44  ;;  %v2640_v44 = vld [vmem:[#allocation3 + $0xc0] sm:$0xff] }
 0x451   : > { %v3050_v50 = vadd.f32 %v3049_v29, %v6816_v17  ;;  %3387 = vmatmul.f32.gmra.mxu2 %v7211_v13 }
 0x452   : > { %v3275_v54 = vpop.f32.mrf.mxu1 }
 0x453   : > { %v3163_v5 = vadd.f32 %v7068_v46, %v3050_v50  ;;  %v7244_v50 = vpop.f32.mrf.mxu0 }
 0x454   : > { %v3340_v21 = vpop.f32.mrf.mxu2 }
 0x455   : > { %v7220_v9 = vadd.f32 %v3275_v54, %v3163_v5  ;;  %v7223_v22 = vadd.f32 %v3340_v21, %v6821_v18  ;;  %3455 = vmatmul.f32.gmra.mxu3 %v7218_v43  ;;  %3678 = vmatmul.f32.gmra.mxu1 %v6864_v31  ;;  %v7246_v5 = vld [vmem:[#allocation3 + $0xf9] sm:$0xff] }
 0x456   : > { %3592 = vmatmul.f32.gmra.mxu0 %v2638_v3 }
 0x458   : > { %v3052_v17 = vpop.f32.mrf.mxu3 }
 0x459   : > { %v3053_v46 = vadd.f32 %v3052_v17, %v6842_v11  ;;  %3390 = vmatmul.f32.gmra.mxu2 %v7227_v48  ;;  %v2639_v11 = vld [vmem:[#allocation3 + $0xb0] sm:$0xff] }
 0x45a   : > { %v3278_v49 = vpop.f32.mrf.mxu1  ;;  %v7251_v17 = vld [vmem:[#allocation3 + $0x4a] sm:$0xff] }
 0x45b   : > { %v3166_v18 = vadd.f32 %v7117_v32, %v3053_v46 }
 0x45c   : > { %v3343_v34 = vpop.f32.mrf.mxu2 }
 0x45d   : > { %v7237_v31 = vadd.f32 %v3278_v49, %v3166_v18  ;;  %v7240_v29 = vadd.f32 %v3343_v34, %v6847_v39  ;;  %3458 = vmatmul.f32.gmra.mxu3 %v7235_v45  ;;  %3681 = vmatmul.f32.gmra.mxu1 %v6887_v57  ;;  %v7262_v18 = vld [vmem:[#allocation3 + $0x109] sm:$0xff] }
 0x45e   : > { %3595 = vmatmul.f32.gmra.mxu0 %v2639_v11 }
 0x460   : > { %v3055_v54 = vpop.f32.mrf.mxu3 }
 0x461   : > { %v3056_v32 = vadd.f32 %v3055_v54, %v6872_v47  ;;  %3393 = vmatmul.f32.gmra.mxu2 %v7246_v5  ;;  %v7260_v47 = vpop.f32.mrf.mxu0 }
 0x462   : > { %v3281_v21 = vpop.f32.mrf.mxu1 }
 0x463   : > { %v3169_v3 = vadd.f32 %v7152_v60, %v3056_v32 }
 0x464   : > { %v3346_v39 = vpop.f32.mrf.mxu2 }
 0x465   : > { %v7253_v46 = vadd.f32 %v3281_v21, %v3169_v3  ;;  %v7256_v57 = vadd.f32 %v3346_v39, %v6877_v14  ;;  %3461 = vmatmul.f32.gmra.mxu3 %v7251_v17  ;;  %3684 = vmatmul.f32.gmra.mxu1 %v6922_v2  ;;  %v2855_v14 = vld [vmem:[%s7657_s5 + $0x418] sm:$0xff]  ;;  %v7270_v2 = vld [vmem:[#allocation3 + $0x52] sm:$0xff] }
 0x466   : > { %3598 = vmatmul.f32.gmra.mxu0 %v2640_v44  ;;  %3784 = vmatpush.msrb.mxu2 %v2855_v14  ;;  %v7279_v39 = vld [vmem:[#allocation3 + $0x111] sm:$0xff]  ;;  %v7286_v14 = vld [vmem:[#allocation3 + $0x62] sm:$0xff] }
 0x468   : > { %v3058_v49 = vpop.f32.mrf.mxu3 }
 0x469   : > { %v3059_v60 = vadd.f32 %v3058_v49, %v6898_v28  ;;  %3396 = vmatmul.f32.gmra.mxu2 %v7262_v18  ;;  %v2641_v28 = vld [vmem:[#allocation3 + $0xc8] sm:$0xff] }
 0x46a   : > { %v3284_v34 = vpop.f32.mrf.mxu1 }
 0x46b   : > { %v3172_v11 = vadd.f32 %v7176_v51, %v3059_v60  ;;  %v7283_v51 = vpop.f32.mrf.mxu0 }
 0x46c   : > { %v3349_v54 = vpop.f32.mrf.mxu2 }
 0x46d   : > { %v7272_v32 = vadd.f32 %v3284_v34, %v3172_v11  ;;  %v7275_v21 = vadd.f32 %v3349_v54, %v6903_v36  ;;  %3464 = vmatmul.f32.gmra.mxu3 %v7270_v2  ;;  %3687 = vmatmul.f32.gmra.mxu1 %v6934_v24  ;;  %v2642_v11 = vld [vmem:[#allocation3 + $0xd8] sm:$0xff]  ;;  %v7295_v54 = vld [vmem:[#allocation3 + $0x121] sm:$0xff] }
 0x46e   : > { %3601 = vmatmul.f32.gmra.mxu0 %v2641_v28 }
 0x470   : > { %v3061_v3 = vpop.f32.mrf.mxu3 }
 0x471   : > { %v3062_v44 = vadd.f32 %v3061_v3, %v6927_v23  ;;  %3399 = vmatmul.f32.gmra.mxu2 %v7279_v39 }
 0x472   : > { %v3287_v49 = vpop.f32.mrf.mxu1 }
 0x473   : > { %v3175_v60 = vadd.f32 %v7201_v35, %v3062_v44  ;;  %v2854_v35 = vld [vmem:[%s7657_s5 + $0x410] sm:$0xff]  ;;  %v7303_v44 = vpop.f32.mrf.mxu0 }
 0x474   : > { %v3352_v36 = vpop.f32.mrf.mxu2  ;;  %3785 = vmatpush.msrb.mxu2 %v2854_v35 }
 0x475   : > { %v7288_v34 = vadd.f32 %v3287_v49, %v3175_v60  ;;  %v7291_v24 = vadd.f32 %v3352_v36, %v6929_v26  ;;  %3467 = vmatmul.f32.gmra.mxu3 %v7286_v14  ;;  %3690 = vmatmul.f32.gmra.mxu1 %v6960_v40  ;;  %v7305_v40 = vld [vmem:[#allocation3 + $0x6a] sm:$0xff] }
 0x476   : > { %3604 = vmatmul.f32.gmra.mxu0 %v2642_v11 }
 0x478   : > { %v3064_v23 = vpop.f32.mrf.mxu3 }
 0x479   : > { %v3065_v28 = vadd.f32 %v3064_v23, %v6944_v1  ;;  %3402 = vmatmul.f32.gmra.mxu2 %v7295_v54  ;;  %v2643_v1 = vld [vmem:[#allocation3 + $0xe0] sm:$0xff]  ;;  %v7314_v23 = vld [vmem:[#allocation3 + $0x129] sm:$0xff] }
 0x47a   : > { %v3290_v3 = vpop.f32.mrf.mxu1 }
 0x47b   : > { %v3178_v26 = vadd.f32 %v7216_v27, %v3065_v28 }
 0x47c   : > { %v3355_v49 = vpop.f32.mrf.mxu2 }
 0x47d   : > { %v7307_v60 = vadd.f32 %v3290_v3, %v3178_v26  ;;  %v7310_v36 = vadd.f32 %v3355_v49, %v6946_v52  ;;  %3470 = vmatmul.f32.gmra.mxu3 %v7305_v40  ;;  %3693 = vmatmul.f32.gmra.mxu1 %v6974_v19  ;;  %v7319_v26 = vld [vmem:[#allocation3 + $0x7a] sm:$0xff]  ;;  %v2644_v19 = vld [vmem:[#allocation3 + $0xf0] sm:$0xff] }
 0x47e   : > { %3607 = vmatmul.f32.gmra.mxu0 %v2643_v1  ;;  %v3192_v1 = vpop.f32.mrf.mxu0 }
 0x480   : > { %v3067_v11 = vpop.f32.mrf.mxu3 }
 0x481   : > { %v3068_v27 = vadd.f32 %v3067_v11, %v6967_v12  ;;  %3405 = vmatmul.f32.gmra.mxu2 %v7314_v23  ;;  %v7328_v11 = vld [vmem:[#allocation3 + $0x139] sm:$0xff] }
 0x482   : > { %v3293_v28 = vpop.f32.mrf.mxu1 }
 0x483   : > { %v3181_v35 = vadd.f32 %v7244_v50, %v3068_v27  ;;  %v2853_v27 = vld [vmem:[%s7657_s5 + $0x408] sm:$0xff] }
 0x484   : > { %v3358_v3 = vpop.f32.mrf.mxu2  ;;  %3786 = vmatpush.msrb.mxu2 %v2853_v27 }
 0x485   : > { %v7321_v52 = vadd.f32 %v3293_v28, %v3181_v35  ;;  %v7324_v49 = vadd.f32 %v3358_v3, %v6969_v38  ;;  %3473 = vmatmul.f32.gmra.mxu3 %v7319_v26  ;;  %3696 = vmatmul.f32.gmra.mxu1 %v7000_v63  ;;  %v7336_v3 = vld [vmem:[#allocation3 + $0x82] sm:$0xff] }
 0x486   : > { %3610 = vmatmul.f32.gmra.mxu0 %v2644_v19 }
 0x487   : > { %7771 = vst [vmem:[#allocation10_spill] sm:$0xff] %v7321_v52 }
 0x488   : > { %7772 = vst [vmem:[#allocation11_spill] sm:$0xff] %v7324_v49  ;;  %v3070_v12 = vpop.f32.mrf.mxu3  ;;  %v7345_v49 = vld [vmem:[#allocation3 + $0x141] sm:$0xff] }
 0x489   : > { %v3071_v50 = vadd.f32 %v3070_v12, %v6982_v62  ;;  %3408 = vmatmul.f32.gmra.mxu2 %v7328_v11  ;;  %v2645_v62 = vld [vmem:[#allocation3 + $0xf8] sm:$0xff]  ;;  %v3195_v12 = vpop.f32.mrf.mxu0 }
 0x48a   : > { %v3296_v38 = vpop.f32.mrf.mxu1 }
 0x48b   : > { %v3184_v28 = vadd.f32 %v7260_v47, %v3071_v50 }
 0x48c   : > { %v3361_v35 = vpop.f32.mrf.mxu2 }
 0x48d   : > { %v7338_v63 = vadd.f32 %v3296_v38, %v3184_v28  ;;  %v7341_v19 = vadd.f32 %v3361_v35, %v6984_v7  ;;  %3476 = vmatmul.f32.gmra.mxu3 %v7336_v3  ;;  %3699 = vmatmul.f32.gmra.mxu1 %v7017_v56  ;;  %v7350_v7 = vld [vmem:[#allocation3 + $0x92] sm:$0xff]  ;;  %v2646_v56 = vld [vmem:[#allocation3 + $0x108] sm:$0xff] }
 0x48e   : > { %3613 = vmatmul.f32.gmra.mxu0 %v2645_v62 }
 0x490   : > { %v3073_v52 = vpop.f32.mrf.mxu3 }
 0x491   : > { %v3074_v47 = vadd.f32 %v3073_v52, %v7005_v33  ;;  %3411 = vmatmul.f32.gmra.mxu2 %v7345_v49  ;;  %v7359_v52 = vld [vmem:[#allocation3 + $0x151] sm:$0xff] }
 0x492   : > { %v3299_v50 = vpop.f32.mrf.mxu1  ;;  %7775 = vst [vmem:[#allocation17_spill] sm:$0xff] %v7359_v52 }
 0x493   : > { %v3187_v27 = vadd.f32 %v7283_v51, %v3074_v47  ;;  %v2852_v51 = vld [vmem:[%s7657_s5 + $0x400] sm:$0xff]  ;;  %v3198_v47 = vpop.f32.mrf.mxu0 }
 0x494   : > { %v3364_v38 = vpop.f32.mrf.mxu2  ;;  %3787 = vmatpush.msrb.mxu2 %v2852_v51  ;;  %v7780_v51 = vld [vmem:[#allocation18_spill] sm:$0xff] }
 0x495   : > { %v7352_v28 = vadd.f32 %v3299_v50, %v3187_v27  ;;  %v7355_v35 = vadd.f32 %v3364_v38, %v7007_v8  ;;  %3479 = vmatmul.f32.gmra.mxu3 %v7350_v7  ;;  %3702 = vmatmul.f32.gmra.mxu1 %v7055_v58  ;;  %v7367_v38 = vld [vmem:[#allocation3 + $0x9a] sm:$0xff] }
 0x496   : > { %3616 = vmatmul.f32.gmra.mxu0 %v2646_v56  ;;  %v7777_v56 = vld [vmem:[#allocation16_spill] sm:$0xff] }
 0x497   : > { %7773 = vst [vmem:[#allocation13_spill] sm:$0xff] %v7352_v28  ;;  %v7376_v28 = vld [vmem:[#allocation3 + $0x159] sm:$0xff] }
 0x498   : > { %7774 = vst [vmem:[#allocation15_spill] sm:$0xff] %v7355_v35  ;;  %v3076_v33 = vpop.f32.mrf.mxu3 }
 0x499   : > { %v3077_v62 = vadd.f32 %v3076_v33, %v7028_v10  ;;  %3414 = vmatmul.f32.gmra.mxu2 %v7359_v52  ;;  %v2647_v10 = vld [vmem:[#allocation3 + $0x110] sm:$0xff]  ;;  %7779 = vst [vmem:[#allocation7_spill] sm:$0xff] %v7376_v28 }
 0x49a   : > { %v3302_v8 = vpop.f32.mrf.mxu1 }
 0x49b   : > { %v3190_v50 = vadd.f32 %v7303_v44, %v3077_v62 }
 0x49c   : > { %v3367_v27 = vpop.f32.mrf.mxu2 }
 0x49d   : > { %v7369_v58 = vadd.f32 %v3302_v8, %v3190_v50  ;;  %v7372_v35 = vadd.f32 %v3367_v27, %v7777_v56  ;;  %3482 = vmatmul.f32.gmra.mxu3 %v7367_v38  ;;  %3705 = vmatmul.f32.gmra.mxu1 %v7096_v4  ;;  %v3201_v8 = vpop.f32.mrf.mxu0  ;;  %v7781_v56 = vld [vmem:[#allocation4_spill] sm:$0xff]  ;;  %v2648_v4 = vld [vmem:[#allocation3 + $0x120] sm:$0xff] }
 0x49e   : > { %3619 = vmatmul.f32.gmra.mxu0 %v2647_v10 }
 0x49f   : > { %7776 = vst [vmem:[#allocation9_spill] sm:$0xff] %v7369_v58  ;;  %v7380_v58 = vld [vmem:[#allocation3 + $0xaa] sm:$0xff] }
 0x4a0   : > { %7778 = vst [vmem:[#allocation5_spill] sm:$0xff] %v7372_v35  ;;  %v3079_v33 = vpop.f32.mrf.mxu3 }
 0x4a1   : > { %v3080_v52 = vadd.f32 %v3079_v33, %v7780_v51  ;;  %3417 = vmatmul.f32.gmra.mxu2 %v7376_v28  ;;  %v7389_v33 = vld [vmem:[#allocation3 + $0x169] sm:$0xff]  ;;  %v7783_v51 = vld [vmem:[#allocation6_spill] sm:$0xff] }
 0x4a2   : > { %v3305_v44 = vpop.f32.mrf.mxu1 }
 0x4a3   : > { %v3193_v62 = vadd.f32 %v3192_v1, %v3080_v52 }
 0x4a4   : > { %v3370_v50 = vpop.f32.mrf.mxu2 }
 0x4a5   : > { %v7382_v27 = vadd.f32 %v3305_v44, %v3193_v62  ;;  %v7385_v35 = vadd.f32 %v3370_v50, %v7781_v56  ;;  %3485 = vmatmul.f32.gmra.mxu3 %v7380_v58  ;;  %3708 = vmatmul.f32.gmra.mxu1 %v7137_v6  ;;  %v7393_v62 = vld [vmem:[#allocation3 + $0xb2] sm:$0xff]  ;;  %v2649_v6 = vld [vmem:[#allocation3 + $0x128] sm:$0xff] }
 0x4a6   : > { %3622 = vmatmul.f32.gmra.mxu0 %v2648_v4  ;;  %v7785_v56 = vld [vmem:[#allocation8_spill] sm:$0xff]  ;;  %v3204_v4 = vpop.f32.mrf.mxu0 }
 0x4a7   : > { %7782 = vst [vmem:[#allocation14_spill] sm:$0xff] %v7385_v35 }
 0x4a8   : > { %v3082_v10 = vpop.f32.mrf.mxu3 }
 0x4a9   : > { %v3083_v1 = vadd.f32 %v3082_v10, %v7783_v51  ;;  %3420 = vmatmul.f32.gmra.mxu2 %v7389_v33  ;;  %v7402_v51 = vld [vmem:[#allocation3 + $0x171] sm:$0xff] }
 0x4aa   : > { %v3308_v52 = vpop.f32.mrf.mxu1 }
 0x4ab   : > { %v3196_v28 = vadd.f32 %v3195_v12, %v3083_v1 }
 0x4ac   : > { %v3373_v44 = vpop.f32.mrf.mxu2 }
 0x4ad   : > { %v7395_v50 = vadd.f32 %v3308_v52, %v3196_v28  ;;  %v7398_v35 = vadd.f32 %v3373_v44, %v7785_v56  ;;  %3488 = vmatmul.f32.gmra.mxu3 %v7393_v62  ;;  %3711 = vmatmul.f32.gmra.mxu1 %v7155_v25  ;;  %v2650_v25 = vld [vmem:[#allocation3 + $0x138] sm:$0xff] }
 0x4ae   : > { %3625 = vmatmul.f32.gmra.mxu0 %v2649_v6  ;;  %v3563_v6 = vpop.f32.mrf.mxu0 }
 0x4af   : > { %7784 = vst [vmem:[#allocation12_spill] sm:$0xff] %v7395_v50  ;;  %v7406_v50 = vld [vmem:[#allocation3 + $0xc2] sm:$0xff] }
 0x4b0   : > { %7786 = vst [vmem:[#allocation16_spill] sm:$0xff] %v7398_v35  ;;  %v3085_v10 = vpop.f32.mrf.mxu3  ;;  %v7419_v35 = vld [vmem:[#allocation3 + $0xca] sm:$0xff] }
 0x4b1   : > { %v3086_v12 = vadd.f32 %v3085_v10, %v7145_v37  ;;  %3423 = vmatmul.f32.gmra.mxu2 %v7402_v51  ;;  %v7415_v10 = vld [vmem:[#allocation3 + $0x181] sm:$0xff] }
 0x4b2   : > { %v3311_v1 = vpop.f32.mrf.mxu1 }
 0x4b3   : > { %v3199_v28 = vadd.f32 %v3198_v47, %v3086_v12 }
 0x4b4   : > { %v3376_v52 = vpop.f32.mrf.mxu2 }
 0x4b5   : > { %v7408_v44 = vadd.f32 %v3311_v1, %v3199_v28  ;;  %v7411_v56 = vadd.f32 %v3376_v52, %v7147_v55  ;;  %3491 = vmatmul.f32.gmra.mxu3 %v7406_v50  ;;  %3714 = vmatmul.f32.gmra.mxu1 %v7178_v59  ;;  %v2651_v59 = vld [vmem:[#allocation3 + $0x140] sm:$0xff] }
 0x4b6   : > { %3628 = vmatmul.f32.gmra.mxu0 %v2650_v25 }
 0x4b7   : > { %7787 = vst [vmem:[#allocation18_spill] sm:$0xff] %v7411_v56  ;;  %v7432_v56 = vld [vmem:[#allocation3 + $0xda] sm:$0xff] }
 0x4b8   : > { %v3088_v37 = vpop.f32.mrf.mxu3 }
 0x4b9   : > { %v3089_v47 = vadd.f32 %v3088_v37, %v7165_v15  ;;  %3426 = vmatmul.f32.gmra.mxu2 %v7415_v10  ;;  %v7428_v15 = vld [vmem:[#allocation3 + $0x189] sm:$0xff] }
 0x4ba   : > { %v3314_v12 = vpop.f32.mrf.mxu1 }
 0x4bb   : > { %v3202_v1 = vadd.f32 %v3201_v8, %v3089_v47  ;;  %v3566_v8 = vpop.f32.mrf.mxu0 }
 0x4bc   : > { %v3379_v28 = vpop.f32.mrf.mxu2 }
 0x4bd   : > { %v7421_v55 = vadd.f32 %v3314_v12, %v3202_v1  ;;  %v7424_v52 = vadd.f32 %v3379_v28, %v7170_v0  ;;  %3494 = vmatmul.f32.gmra.mxu3 %v7419_v35  ;;  %3717 = vmatmul.f32.gmra.mxu1 %v7194_v16  ;;  %v2652_v16 = vld [vmem:[#allocation3 + $0x150] sm:$0xff] }
 0x4be   : > { %3631 = vmatmul.f32.gmra.mxu0 %v2651_v59 }
 0x4c0   : > { %v3091_v25 = vpop.f32.mrf.mxu3 }
 0x4c1   : > { %v3092_v37 = vadd.f32 %v3091_v25, %v7185_v61  ;;  %3429 = vmatmul.f32.gmra.mxu2 %v7428_v15 }
 0x4c2   : > { %v3317_v12 = vpop.f32.mrf.mxu1 }
 0x4c3   : > { %v3205_v47 = vadd.f32 %v3204_v4, %v3092_v37  ;;  %v3569_v25 = vpop.f32.mrf.mxu0 }
 0x4c4   : > { %v3382_v1 = vpop.f32.mrf.mxu2 }
 0x4c5   : > { %v7434_v0 = vadd.f32 %v3317_v12, %v3205_v47  ;;  %v7437_v28 = vadd.f32 %v3382_v1, %v7190_v20  ;;  %3497 = vmatmul.f32.gmra.mxu3 %v7432_v56  ;;  %3720 = vmatmul.f32.gmra.mxu1 %v7211_v13  ;;  %v7445_v47 = vld [vmem:[#allocation3 + $0xe2] sm:$0xff]  ;;  %v2653_v12 = vld [vmem:[#allocation3 + $0x158] sm:$0xff] }
 0x4c6   : > { %3634 = vmatmul.f32.gmra.mxu0 %v2652_v16  ;;  %v7456_v1 = vld [vmem:[#allocation3 + $0xf2] sm:$0xff] }
 0x4c8   : > { %v3450_v61 = vpop.f32.mrf.mxu3 }
 0x4c9   : > { %v3451_v59 = vadd.f32 %v3450_v61, %v7208_v41  ;;  %3788 = vmatmul.f32.vlgmr.msrb.gmra.mxu2 %v7218_v43 }
 0x4cb   : > { %v7443_v4 = vadd.f32 %v3563_v6, %v3451_v59  ;;  %v7467_v59 = vld [vmem:[#allocation3 + $0xfa] sm:$0xff] }
 0x4cc   : > { %v3385_v37 = vpop.f32.mrf.mxu2 }
 0x4cd   : > { %v7448_v20 = vadd.f32 %v3385_v37, %v7205_v53  ;;  %3500 = vmatmul.f32.gmra.mxu3 %v7445_v47  ;;  %3723 = vmatmul.f32.gmra.mxu1 %v7227_v48  ;;  %v2654_v53 = vld [vmem:[#allocation3 + $0x168] sm:$0xff]  ;;  %v3572_v48 = vpop.f32.mrf.mxu0  ;;  %v2655_v37 = vld [vmem:[#allocation3 + $0x170] sm:$0xff] }
 0x4ce   : > { %3637 = vmatmul.f32.gmra.mxu0 %v2653_v12 }
 0x4d0   : > { %v3453_v13 = vpop.f32.mrf.mxu3 }
 0x4d1   : > { %v3454_v41 = vadd.f32 %v3453_v13, %v7223_v22  ;;  %3791 = vmatmul.f32.gmra.mxu2 %v7235_v45  ;;  %v7478_v13 = vld [vmem:[#allocation3 + $0x10a] sm:$0xff] }
 0x4d3   : > { %v7454_v43 = vadd.f32 %v3566_v8, %v3454_v41 }
 0x4d4   : > { %v3388_v6 = vpop.f32.mrf.mxu2 }
 0x4d5   : > { %v7459_v16 = vadd.f32 %v3388_v6, %v7220_v9  ;;  %3503 = vmatmul.f32.gmra.mxu3 %v7456_v1  ;;  %3726 = vmatmul.f32.gmra.mxu1 %v7246_v5  ;;  %v3575_v5 = vpop.f32.mrf.mxu0 }
 0x4d6   : > { %3640 = vmatmul.f32.gmra.mxu0 %v2654_v53  ;;  %v7490_v53 = vld [vmem:[#allocation3 + $0x112] sm:$0xff] }
 0x4d8   : > { %v3456_v61 = vpop.f32.mrf.mxu3 }
 0x4d9   : > { %v3457_v22 = vadd.f32 %v3456_v61, %v7240_v29  ;;  %3794 = vmatmul.f32.gmra.mxu2 %v7251_v17  ;;  %v7502_v61 = vld [vmem:[#allocation3 + $0x122] sm:$0xff] }
 0x4db   : > { %v7465_v45 = vadd.f32 %v3569_v25, %v3457_v22 }
 0x4dc   : > { %v3391_v8 = vpop.f32.mrf.mxu2 }
 0x4dd   : > { %v7470_v9 = vadd.f32 %v3391_v8, %v7237_v31  ;;  %3506 = vmatmul.f32.gmra.mxu3 %v7467_v59  ;;  %3729 = vmatmul.f32.gmra.mxu1 %v7262_v18  ;;  %v7513_v8 = vld [vmem:[#allocation3 + $0x12a] sm:$0xff] }
 0x4de   : > { %3643 = vmatmul.f32.gmra.mxu0 %v2655_v37 }
 0x4e0   : > { %v3459_v12 = vpop.f32.mrf.mxu3 }
 0x4e1   : > { %v3460_v29 = vadd.f32 %v3459_v12, %v7256_v57  ;;  %3797 = vmatmul.f32.gmra.mxu2 %v7270_v2  ;;  %v3578_v57 = vpop.f32.mrf.mxu0 }
 0x4e3   : > { %v7476_v17 = vadd.f32 %v3572_v48, %v3460_v29 }
 0x4e4   : > { %v3394_v25 = vpop.f32.mrf.mxu2 }
 0x4e5   : > { %v7481_v31 = vadd.f32 %v3394_v25, %v7253_v46  ;;  %3509 = vmatmul.f32.gmra.mxu3 %v7478_v13  ;;  %3732 = vmatmul.f32.gmra.mxu1 %v7279_v39  ;;  %v7526_v25 = vld [vmem:[#allocation3 + $0x13a] sm:$0xff] }
 0x4e6   : > { %3646 = vmatmul.f32.gmra.mxu0 %v7167_v42 }
 0x4e8   : > { %v3462_v18 = vpop.f32.mrf.mxu3 }
 0x4e9   : > { %v3463_v41 = vadd.f32 %v3462_v18, %v7275_v21  ;;  %3800 = vmatmul.f32.gmra.mxu2 %v7286_v14  ;;  %v3581_v14 = vpop.f32.mrf.mxu0 }
 0x4eb   : > { %v7488_v2 = vadd.f32 %v3575_v5, %v3463_v41  ;;  %v7520_v5 = vpop.f32.mrf.mxu1 }
 0x4ec   : > { %v3397_v6 = vpop.f32.mrf.mxu2 }
 0x4ed   : > { %v7493_v46 = vadd.f32 %v3397_v6, %v7272_v32  ;;  %3512 = vmatmul.f32.gmra.mxu3 %v7490_v53  ;;  %3735 = vmatmul.f32.gmra.mxu1 %v7295_v54  ;;  %v4460_v54 = vld [vmem:[#allocation3] sm:$0xff] }
 0x4ee   : > { %3649 = vmatmul.f32.gmra.mxu0 %v7187_v30  ;;  %v7537_v6 = vld [vmem:[#allocation3 + $0x142] sm:$0xff] }
 0x4f0   : > { %v3465_v42 = vpop.f32.mrf.mxu3 }
 0x4f1   : > { %v3466_v21 = vadd.f32 %v3465_v42, %v7291_v24  ;;  %3803 = vmatmul.f32.gmra.mxu2 %v7305_v40 }
 0x4f3   : > { %v7500_v39 = vadd.f32 %v3578_v57, %v3466_v21  ;;  %v3679_v57 = vpop.f32.mrf.mxu1  ;;  %v7790_v21 = vld [vmem:[#allocation17_spill] sm:$0xff] }
 0x4f4   : > { %v3400_v48 = vpop.f32.mrf.mxu2 }
 0x4f5   : > { %v7505_v32 = vadd.f32 %v3400_v48, %v7288_v34  ;;  %3515 = vmatmul.f32.gmra.mxu3 %v7502_v61  ;;  %3738 = vmatmul.f32.gmra.mxu1 %v7314_v23  ;;  %v3584_v34 = vpop.f32.mrf.mxu0  ;;  %v7791_v48 = vld [vmem:[#allocation13_spill] sm:$0xff] }
 0x4f6   : > { %3652 = vmatmul.f32.gmra.mxu0 %v4460_v54 }
 0x4f8   : > { %v3468_v30 = vpop.f32.mrf.mxu3 }
 0x4f9   : > { %v3469_v24 = vadd.f32 %v3468_v30, %v7310_v36  ;;  %3806 = vmatmul.f32.gmra.mxu2 %v7319_v26  ;;  %v7788_v36 = vld [vmem:[#allocation11_spill] sm:$0xff]  ;;  %v7553_v30 = vld [vmem:[#allocation3 + $0x15a] sm:$0xff] }
 0x4fb   : > { %v7511_v40 = vadd.f32 %v3581_v14, %v3469_v24  ;;  %v7545_v14 = vld [vmem:[#allocation3 + $0x152] sm:$0xff] }
 0x4fc   : > { %v3403_v22 = vpop.f32.mrf.mxu2  ;;  %v7793_v24 = vld [vmem:[#allocation9_spill] sm:$0xff] }
 0x4fd   : > { %v7516_v37 = vadd.f32 %v3403_v22, %v7307_v60  ;;  %3518 = vmatmul.f32.gmra.mxu3 %v7513_v8  ;;  %3741 = vmatmul.f32.gmra.mxu1 %v7328_v11  ;;  %v7789_v60 = vld [vmem:[#allocation10_spill] sm:$0xff] }
 0x4fe   : > { %3655 = vmatmul.f32.gmra.mxu0 %v4460_v54 }
 0x500   : > { %v3471_v23 = vpop.f32.mrf.mxu3 }
 0x501   : > { %v3472_v12 = vadd.f32 %v3471_v23, %v7788_v36  ;;  %3809 = vmatmul.f32.gmra.mxu2 %v7336_v3  ;;  %v7561_v23 = vld [vmem:[#allocation3 + $0x16a] sm:$0xff] }
 0x503   : > { %v7524_v26 = vadd.f32 %v3584_v34, %v3472_v12 }
 0x504   : > { %v3406_v29 = vpop.f32.mrf.mxu2 }
 0x505   : > { %v7529_v18 = vadd.f32 %v3406_v29, %v7789_v60  ;;  %3521 = vmatmul.f32.gmra.mxu3 %v7526_v25  ;;  %3744 = vmatmul.f32.gmra.mxu1 %v7345_v49  ;;  %v7569_v29 = vld [vmem:[#allocation3 + $0x172] sm:$0xff] }
 0x508   : > { %v3474_v11 = vpop.f32.mrf.mxu3 }
 0x509   : > { %v7534_v41 = vadd.f32 %v3474_v11, %v7341_v19  ;;  %3812 = vmatmul.f32.gmra.mxu2 %v7350_v7  ;;  %v3682_v19 = vpop.f32.mrf.mxu1  ;;  %v7792_v7 = vld [vmem:[#allocation7_spill] sm:$0xff] }
 0x50a   : > { %v7577_v11 = vld [vmem:[#allocation3 + $0x182] sm:$0xff] }
 0x50c   : > { %v3409_v3 = vpop.f32.mrf.mxu2 }
 0x50d   : > { %v7540_v42 = vadd.f32 %v3409_v3, %v7338_v63  ;;  %3524 = vmatmul.f32.gmra.mxu3 %v7537_v6  ;;  %3747 = vmatmul.f32.gmra.mxu1 %v7790_v21  ;;  %v7585_v21 = vld [vmem:[#allocation3 + $0x18a] sm:$0xff] }
 0x511   : > { %3815 = vmatmul.f32.gmra.mxu2 %v7367_v38  ;;  %v3685_v38 = vpop.f32.mrf.mxu1 }
 0x514   : > { %v3412_v49 = vpop.f32.mrf.mxu2 }
 0x515   : > { %v7548_v54 = vadd.f32 %v3412_v49, %v7791_v48  ;;  %3527 = vmatmul.f32.gmra.mxu3 %v7545_v14  ;;  %3750 = vmatmul.f32.gmra.mxu1 %v7792_v7 }
 0x519   : > { %3818 = vmatmul.f32.gmra.mxu2 %v7380_v58  ;;  %v3688_v58 = vpop.f32.mrf.mxu1 }
 0x51c   : > { %v3415_v63 = vpop.f32.mrf.mxu2 }
 0x51d   : > { %v7556_v22 = vadd.f32 %v3415_v63, %v7793_v24  ;;  %3530 = vmatmul.f32.gmra.mxu3 %v7553_v30  ;;  %3753 = vmatmul.f32.gmra.mxu1 %v7389_v33  ;;  %v7794_v33 = vld [vmem:[#allocation12_spill] sm:$0xff] }
 0x521   : > { %3821 = vmatmul.f32.gmra.mxu2 %v7393_v62 }
 0x524   : > { %v3418_v34 = vpop.f32.mrf.mxu2 }
 0x525   : > { %v7564_v36 = vadd.f32 %v3418_v34, %v7382_v27  ;;  %3533 = vmatmul.f32.gmra.mxu3 %v7561_v23  ;;  %3756 = vmatmul.f32.gmra.mxu1 %v7402_v51  ;;  %v3691_v27 = vpop.f32.mrf.mxu1  ;;  %v3587_v34 = vpop.f32.mrf.mxu0 }
 0x529   : > { %3824 = vmatmul.f32.gmra.mxu2 %v7406_v50  ;;  %v2690_v50 = vld [vmem:[#allocation3 + $0x199] sm:$0xff] }
 0x52c   : > { %v3421_v12 = vpop.f32.mrf.mxu2 }
 0x52d   : > { %v7572_v60 = vadd.f32 %v3421_v12, %v7794_v33  ;;  %3536 = vmatmul.f32.gmra.mxu3 %v7569_v29  ;;  %3759 = vmatmul.f32.gmra.mxu1 %v7415_v10  ;;  %v3694_v10 = vpop.f32.mrf.mxu1 }
 0x531   : > { %3827 = vmatmul.f32.gmra.mxu2 %v7419_v35 }
 0x534   : > { %v3424_v62 = vpop.f32.mrf.mxu2 }
 0x535   : > { %v7580_v51 = vadd.f32 %v3424_v62, %v7408_v44  ;;  %3539 = vmatmul.f32.gmra.mxu3 %v7577_v11  ;;  %3762 = vmatmul.f32.gmra.mxu1 %v7428_v15  ;;  %v2691_v44 = vld [vmem:[#allocation3 + $0x1a1] sm:$0xff]  ;;  %v3697_v63 = vpop.f32.mrf.mxu1 }
 0x539   : > { %3830 = vmatmul.f32.gmra.mxu2 %v7432_v56  ;;  %v3677_v56 = vadd.f32 %v7520_v5, %v7443_v4  ;;  %v3590_v5 = vpop.f32.mrf.mxu0 }
 0x53c   : > { %v3427_v3 = vpop.f32.mrf.mxu2 }
 0x53d   : > { %v7588_v35 = vadd.f32 %v3427_v3, %v7421_v55  ;;  %3542 = vmatmul.f32.gmra.mxu3 %v7585_v21  ;;  %3765 = vmatmul.f32.gmra.mxu1 %v2690_v50  ;;  %v3680_v55 = vadd.f32 %v3679_v57, %v7454_v43  ;;  %v3700_v4 = vpop.f32.mrf.mxu1 }
 0x541   : > { %3833 = vmatmul.f32.gmra.mxu2 %v7445_v47 }
 0x544   : > { %v3430_v49 = vpop.f32.mrf.mxu2 }
 0x545   : > { %v7593_v48 = vadd.f32 %v3430_v49, %v7434_v0  ;;  %3768 = vmatmul.f32.vlgmr.msra.gmra.mxu3 %v2691_v44  ;;  %v3477_v0 = vpop.f32.mrf.mxu3  ;;  %v3703_v50 = vpop.f32.mrf.mxu1  ;;  %v3692_v49 = vadd.f32 %v3691_v27, %v7500_v39 }
 0x549   : > { %3836 = vmatmul.f32.gmra.mxu2 %v7456_v1  ;;  %v3683_v1 = vadd.f32 %v3682_v19, %v7465_v45  ;;  %v3593_v45 = vpop.f32.mrf.mxu0 }
 0x54c   : > { %v3789_v15 = vpop.f32.mrf.mxu2 }
 0x54d   : > { %v3790_v7 = vadd.f32 %v3789_v15, %v3677_v56  ;;  %v3480_v43 = vpop.f32.mrf.mxu3 }
 0x54f   : > { %3885 = vxpose.xlu0.b32.start [1/16] (narrow) %v3790_v7, 8 }
 0x551   : > { %3839 = vmatmul.f32.gmra.mxu2 %v7467_v59  ;;  %v3686_v59 = vadd.f32 %v3685_v38, %v7476_v17  ;;  %v3596_v56 = vpop.f32.mrf.mxu0 }
 0x554   : > { %v3792_v47 = vpop.f32.mrf.mxu2 }
 0x555   : > { %v3793_v24 = vadd.f32 %v3792_v47, %v3680_v55  ;;  %v3483_v44 = vpop.f32.mrf.mxu3  ;;  %v3698_v47 = vadd.f32 %v3697_v63, %v7524_v26  ;;  %v7796_v63 = vld [vmem:[#allocation5_spill] sm:$0xff] }
 0x557   : > { %3886 = vxpose.xlu0.b32.cont [2/16] (narrow) %v3793_v24, 8 }
 0x559   : > { %3842 = vmatmul.f32.gmra.mxu2 %v7478_v13  ;;  %v3689_v13 = vadd.f32 %v3688_v58, %v7488_v2  ;;  %v3599_v55 = vpop.f32.mrf.mxu0 }
 0x55c   : > { %v3795_v12 = vpop.f32.mrf.mxu2 }
 0x55d   : > { %v3796_v33 = vadd.f32 %v3795_v12, %v3683_v1  ;;  %v3486_v15 = vpop.f32.mrf.mxu3  ;;  %v3588_v1 = vadd.f32 %v3587_v34, %v7534_v41 }
 0x55f   : > { %3887 = vxpose.xlu0.b32.cont [3/16] (narrow) %v3796_v33, 8 }
 0x561   : > { %3845 = vmatmul.f32.gmra.mxu2 %v7490_v53  ;;  %v3706_v53 = vpop.f32.mrf.mxu1 }
 0x564   : > { %v3798_v57 = vpop.f32.mrf.mxu2 }
 0x565   : > { %v3799_v62 = vadd.f32 %v3798_v57, %v3686_v59 }
 0x567   : > { %3888 = vxpose.xlu0.b32.cont [4/16] (narrow) %v3799_v62, 8 }
 0x569   : > { %3848 = vmatmul.f32.gmra.mxu2 %v7502_v61  ;;  %v3695_v61 = vadd.f32 %v3694_v10, %v7511_v40  ;;  %v3709_v2 = vpop.f32.mrf.mxu1  ;;  %v3701_v40 = vadd.f32 %v3700_v4, %v3588_v1  ;;  %v7795_v10 = vld [vmem:[#allocation15_spill] sm:$0xff]  ;;  %v7799_v1 = vld [vmem:[#allocation18_spill] sm:$0xff] }
 0x56a   : > { %v3478_v12 = vadd.f32 %v3477_v0, %v7795_v10 }
 0x56c   : > { %v3801_v3 = vpop.f32.mrf.mxu2  ;;  %v3591_v62 = vadd.f32 %v3590_v5, %v3478_v12 }
 0x56d   : > { %v3802_v19 = vadd.f32 %v3801_v3, %v3689_v13  ;;  %v3481_v13 = vadd.f32 %v3480_v43, %v7796_v63 }
 0x56e   : > { %v3704_v26 = vadd.f32 %v3703_v50, %v3591_v62  ;;  %v7798_v50 = vld [vmem:[#allocation16_spill] sm:$0xff] }
 0x56f   : > { %3889 = vxpose.xlu0.b32.cont [5/16] (narrow) %v3802_v19, 8 }
 0x571   : > { %3851 = vmatmul.f32.gmra.mxu2 %v7513_v8  ;;  %v3489_v8 = vpop.f32.mrf.mxu3  ;;  %v3712_v24 = vpop.f32.mrf.mxu1 }
 0x574   : > { %v3804_v17 = vpop.f32.mrf.mxu2 }
 0x575   : > { %v3805_v38 = vadd.f32 %v3804_v17, %v3692_v49  ;;  %v7797_v49 = vld [vmem:[#allocation14_spill] sm:$0xff] }
 0x576   : > { %v3484_v17 = vadd.f32 %v3483_v44, %v7797_v49 }
 0x577   : > { %3890 = vxpose.xlu0.b32.cont [6/16] (narrow) %v3805_v38, 8 }
 0x579   : > { %3854 = vmatmul.f32.gmra.mxu2 %v7526_v25  ;;  %v3602_v25 = vpop.f32.mrf.mxu0  ;;  %v3492_v33 = vpop.f32.mrf.mxu3 }
 0x57c   : > { %v3807_v58 = vpop.f32.mrf.mxu2 }
 0x57d   : > { %v3808_v7 = vadd.f32 %v3807_v58, %v3695_v61  ;;  %v3597_v58 = vadd.f32 %v3596_v56, %v3484_v17 }
 0x57f   : > { %3891 = vxpose.xlu0.b32.cont [7/16] (narrow) %v3808_v7, 8  ;;  %v3710_v43 = vadd.f32 %v3709_v2, %v3597_v58  ;;  %v3487_v7 = vadd.f32 %v3486_v15, %v7798_v50  ;;  %v3493_v2 = vadd.f32 %v3492_v33, %v7424_v52 }
 0x581   : > { %3857 = vmatmul.f32.gmra.mxu2 %v7537_v6  ;;  %v3715_v6 = vpop.f32.mrf.mxu1  ;;  %v3605_v41 = vpop.f32.mrf.mxu0 }
 0x582   : > { %v3495_v19 = vpop.f32.mrf.mxu3 }
 0x583   : > { %v3496_v63 = vadd.f32 %v3495_v19, %v7437_v28 }
 0x584   : > { %v3810_v39 = vpop.f32.mrf.mxu2 }
 0x585   : > { %v3811_v27 = vadd.f32 %v3810_v39, %v3698_v47 }
 0x587   : > { %3892 = vxpose.xlu0.b32.cont [8/16] (narrow) %v3811_v27, 8  ;;  %v3600_v27 = vadd.f32 %v3599_v55, %v3487_v7 }
 0x589   : > { %3860 = vmatmul.f32.gmra.mxu2 %v7545_v14  ;;  %v3594_v14 = vadd.f32 %v3593_v45, %v3481_v13  ;;  %v3718_v0 = vpop.f32.mrf.mxu1  ;;  %v3608_v61 = vpop.f32.mrf.mxu0 }
 0x58b   : > { %v3707_v4 = vadd.f32 %v3706_v53, %v3594_v14  ;;  %v3713_v53 = vadd.f32 %v3712_v24, %v3600_v27  ;;  %v3609_v14 = vadd.f32 %v3608_v61, %v3496_v63 }
 0x58c   : > { %v3813_v59 = vpop.f32.mrf.mxu2 }
 0x58d   : > { %v3814_v57 = vadd.f32 %v3813_v59, %v3701_v40  ;;  %v3490_v40 = vadd.f32 %v3489_v8, %v7799_v1 }
 0x58f   : > { %3893 = vxpose.xlu0.b32.cont [9/16] (narrow) %v3814_v57, 8  ;;  %v3603_v59 = vadd.f32 %v3602_v25, %v3490_v40 }
 0x591   : > { %3863 = vmatmul.f32.gmra.mxu2 %v7553_v30  ;;  %v3498_v30 = vpop.f32.mrf.mxu3  ;;  %v3721_v47 = vpop.f32.mrf.mxu1  ;;  %v3716_v15 = vadd.f32 %v3715_v6, %v3603_v59 }
 0x592   : > { %v3722_v33 = vadd.f32 %v3721_v47, %v3609_v14  ;;  %v3499_v6 = vadd.f32 %v3498_v30, %v7448_v20  ;;  %v4471_v14 = vmov 0  }
 0x593   : > { %4454 = vset.pattern.permute.xlu2 %v4471_v14 }
 0x594   : > { %v3816_v3 = vpop.f32.mrf.mxu2 }
 0x595   : > { %v3817_v34 = vadd.f32 %v3816_v3, %v3704_v26  ;;  %v2722_v26 = vld [vmem:[#allocation3 + $0x19a] sm:$0xff] }
 0x597   : > { %3894 = vxpose.xlu0.b32.cont [10/16] (narrow) %v3817_v34, 8 }
 0x599   : > { %3866 = vmatmul.f32.gmra.mxu2 %v7561_v23  ;;  %v3611_v23 = vpop.f32.mrf.mxu0  ;;  %v3501_v44 = vpop.f32.mrf.mxu3 }
 0x59a   : > { %v3724_v12 = vpop.f32.mrf.mxu1  ;;  %v3612_v17 = vadd.f32 %v3611_v23, %v3499_v6  ;;  %v3502_v28 = vadd.f32 %v3501_v44, %v7459_v16 }
 0x59c   : > { %v3819_v5 = vpop.f32.mrf.mxu2 }
 0x59d   : > { %v3820_v38 = vadd.f32 %v3819_v5, %v3707_v4  ;;  %v3725_v5 = vadd.f32 %v3724_v12, %v3612_v17 }
 0x59f   : > { %3895 = vxpose.xlu0.b32.cont [11/16] (narrow) %v3820_v38, 8 }
 0x5a1   : > { %3869 = vmatmul.f32.gmra.mxu2 %v7569_v29  ;;  %v3614_v29 = vpop.f32.mrf.mxu0  ;;  %v3504_v55 = vpop.f32.mrf.mxu3 }
 0x5a2   : > { %v3727_v24 = vpop.f32.mrf.mxu1  ;;  %v3505_v47 = vadd.f32 %v3504_v55, %v7470_v9 }
 0x5a4   : > { %v3822_v45 = vpop.f32.mrf.mxu2 }
 0x5a5   : > { %v3823_v39 = vadd.f32 %v3822_v45, %v3710_v43  ;;  %v3615_v43 = vadd.f32 %v3614_v29, %v3502_v28 }
 0x5a7   : > { %3896 = vxpose.xlu0.b32.cont [12/16] (narrow) %v3823_v39, 8  ;;  %v3728_v7 = vadd.f32 %v3727_v24, %v3615_v43 }
 0x5a9   : > { %3872 = vmatmul.f32.gmra.mxu2 %v7577_v11  ;;  %v3606_v11 = vadd.f32 %v3605_v41, %v3493_v2  ;;  %v3617_v25 = vpop.f32.mrf.mxu0  ;;  %v3507_v34 = vpop.f32.mrf.mxu3 }
 0x5aa   : > { %v3730_v52 = vpop.f32.mrf.mxu1  ;;  %v3618_v39 = vadd.f32 %v3617_v25, %v3505_v47 }
 0x5ab   : > { %v3719_v8 = vadd.f32 %v3718_v0, %v3606_v11 }
 0x5ac   : > { %v3825_v56 = vpop.f32.mrf.mxu2  ;;  %v3731_v23 = vadd.f32 %v3730_v52, %v3618_v39 }
 0x5ad   : > { %v3826_v10 = vadd.f32 %v3825_v56, %v3713_v53  ;;  %v3508_v53 = vadd.f32 %v3507_v34, %v7481_v31 }
 0x5af   : > { %3897 = vxpose.xlu0.b32.cont [13/16] (narrow) %v3826_v10, 8 }
 0x5b1   : > { %3875 = vmatmul.f32.gmra.mxu2 %v7585_v21  ;;  %v2723_v21 = vld [vmem:[#allocation3 + $0x1a2] sm:$0xff]  ;;  %v3620_v49 = vpop.f32.mrf.mxu0  ;;  %v3510_v0 = vpop.f32.mrf.mxu3 }
 0x5b2   : > { %v3733_v19 = vpop.f32.mrf.mxu1  ;;  %v3621_v40 = vadd.f32 %v3620_v49, %v3508_v53  ;;  %v3511_v12 = vadd.f32 %v3510_v0, %v7493_v46 }
 0x5b4   : > { %v3828_v57 = vpop.f32.mrf.mxu2  ;;  %v3734_v10 = vadd.f32 %v3733_v19, %v3621_v40 }
 0x5b5   : > { %v3829_v62 = vadd.f32 %v3828_v57, %v3716_v15 }
 0x5b7   : > { %3898 = vxpose.xlu0.b32.cont [14/16] (narrow) %v3829_v62, 8 }
 0x5b9   : > { %3878 = vmatmul.f32.gmra.mxu2 %v2722_v26  ;;  %v3623_v61 = vpop.f32.mrf.mxu0  ;;  %v3513_v50 = vpop.f32.mrf.mxu3 }
 0x5ba   : > { %v3736_v45 = vpop.f32.mrf.mxu1  ;;  %v3624_v2 = vadd.f32 %v3623_v61, %v3511_v12  ;;  %v3514_v62 = vadd.f32 %v3513_v50, %v7505_v32 }
 0x5bc   : > { %v3831_v13 = vpop.f32.mrf.mxu2  ;;  %v3737_v57 = vadd.f32 %v3736_v45, %v3624_v2 }
 0x5bd   : > { %v3832_v3 = vadd.f32 %v3831_v13, %v3719_v8 }
 0x5bf   : > { %3899 = vxpose.xlu0.b32.cont [15/16] (narrow) %v3832_v3, 8 }
 0x5c1   : > { %3881 = vmatmul.f32.gmra.mxu2 %v2723_v21  ;;  %v3626_v27 = vpop.f32.mrf.mxu0  ;;  %v3516_v16 = vpop.f32.mrf.mxu3  ;;  %v3949_v21 = vld [vmem:[%s7658_s6] sm:$0x7] }
 0x5c2   : > { %v3739_v56 = vpop.f32.mrf.mxu1  ;;  %v3627_v24 = vadd.f32 %v3626_v27, %v3514_v62  ;;  %v3517_v13 = vadd.f32 %v3516_v16, %v7516_v37  ;;  %3952 = vperm.xlu2 %4454, %v3949_v21  }
 0x5c4   : > { %v3834_v4 = vpop.f32.mrf.mxu2  ;;  %v3740_v63 = vadd.f32 %v3739_v56, %v3627_v24 }
 0x5c5   : > { %v3835_v41 = vadd.f32 %v3834_v4, %v3722_v33 }
 0x5c7   : > { %3900 = vxpose.xlu0.b32.end [16/16] (narrow) %v3835_v41, 8 }
 0x5c9   : > { %v3629_v9 = vpop.f32.mrf.mxu0  ;;  %v3519_v15 = vpop.f32.mrf.mxu3 }
 0x5ca   : > { %v3742_v55 = vpop.f32.mrf.mxu1  ;;  %v3630_v34 = vadd.f32 %v3629_v9, %v3517_v13  ;;  %v3520_v6 = vadd.f32 %v3519_v15, %v7529_v18 }
 0x5cc   : > { %v3837_v38 = vpop.f32.mrf.mxu2  ;;  %v3743_v33 = vadd.f32 %v3742_v55, %v3630_v34 }
 0x5cd   : > { %v3838_v58 = vadd.f32 %v3837_v38, %v3725_v5 }
 0x5cf   : > { %3917 = vxpose.xlu1.b32.start [1/16] (narrow) %v3838_v58, 8 }
 0x5d1   : > { %v3632_v11 = vpop.f32.mrf.mxu0  ;;  %v3522_v8 = vpop.f32.mrf.mxu3 }
 0x5d2   : > { %v3745_v46 = vpop.f32.mrf.mxu1  ;;  %v3633_v49 = vadd.f32 %v3632_v11, %v3520_v6  ;;  %v3523_v5 = vadd.f32 %v3522_v8, %v7540_v42 }
 0x5d4   : > { %v3840_v20 = vpop.f32.mrf.mxu2  ;;  %v3746_v0 = vadd.f32 %v3745_v46, %v3633_v49 }
 0x5d5   : > { %v3841_v30 = vadd.f32 %v3840_v20, %v3728_v7 }
 0x5d7   : > { %3918 = vxpose.xlu1.b32.cont [2/16] (narrow) %v3841_v30, 8 }
 0x5d9   : > { %v3635_v32 = vpop.f32.mrf.mxu0  ;;  %v3525_v52 = vpop.f32.mrf.mxu3 }
 0x5da   : > { %v3748_v37 = vpop.f32.mrf.mxu1  ;;  %v3636_v58 = vadd.f32 %v3635_v32, %v3523_v5  ;;  %v3526_v50 = vadd.f32 %v3525_v52, %v7548_v54 }
 0x5dc   : > { %v3843_v44 = vpop.f32.mrf.mxu2  ;;  %v3749_v61 = vadd.f32 %v3748_v37, %v3636_v58 }
 0x5dd   : > { %v3844_v1 = vadd.f32 %v3843_v44, %v3731_v23 }
 0x5df   : > { %3919 = vxpose.xlu1.b32.cont [3/16] (narrow) %v3844_v1, 8 }
 0x5e1   : > { %v3638_v17 = vpop.f32.mrf.mxu0  ;;  %v3528_v28 = vpop.f32.mrf.mxu3 }
 0x5e2   : > { %v3751_v43 = vpop.f32.mrf.mxu1  ;;  %v3639_v30 = vadd.f32 %v3638_v17, %v3526_v50  ;;  %v3529_v27 = vadd.f32 %v3528_v28, %v7556_v22 }
 0x5e4   : > { %v3846_v59 = vpop.f32.mrf.mxu2  ;;  %v3752_v39 = vadd.f32 %v3751_v43, %v3639_v30 }
 0x5e5   : > { %v3847_v29 = vadd.f32 %v3846_v59, %v3734_v10 }
 0x5e7   : > { %3920 = vxpose.xlu1.b32.cont [4/16] (narrow) %v3847_v29, 8 }
 0x5e9   : > { %v3641_v18 = vpop.f32.mrf.mxu0  ;;  %v3531_v20 = vpop.f32.mrf.mxu3 }
 0x5ea   : > { %v3754_v45 = vpop.f32.mrf.mxu1  ;;  %v3642_v16 = vadd.f32 %v3641_v18, %v3529_v27  ;;  %v3532_v40 = vadd.f32 %v3531_v20, %v7564_v36 }
 0x5ec   : > { %v3849_v31 = vpop.f32.mrf.mxu2  ;;  %v3755_v1 = vadd.f32 %v3754_v45, %v3642_v16 }
 0x5ed   : > { %v3850_v26 = vadd.f32 %v3849_v31, %v3737_v57 }
 0x5ef   : > { %3921 = vxpose.xlu1.b32.cont [5/16] (narrow) %v3850_v26, 8 }
 0x5f1   : > { %v3644_v53 = vpop.f32.mrf.mxu0  ;;  %v3534_v44 = vpop.f32.mrf.mxu3 }
 0x5f2   : > { %v3757_v54 = vpop.f32.mrf.mxu1  ;;  %v3645_v12 = vadd.f32 %v3644_v53, %v3532_v40  ;;  %v3535_v15 = vadd.f32 %v3534_v44, %v7572_v60 }
 0x5f4   : > { %v3852_v25 = vpop.f32.mrf.mxu2  ;;  %v3758_v29 = vadd.f32 %v3757_v54, %v3645_v12 }
 0x5f5   : > { %v3853_v3 = vadd.f32 %v3852_v25, %v3740_v63 }
 0x5f7   : > { %3922 = vxpose.xlu1.b32.cont [6/16] (narrow) %v3853_v3, 8 }
 0x5f9   : > { %v3647_v59 = vpop.f32.mrf.mxu0  ;;  %v3537_v9 = vpop.f32.mrf.mxu3 }
 0x5fa   : > { %v3760_v55 = vpop.f32.mrf.mxu1  ;;  %v3648_v57 = vadd.f32 %v3647_v59, %v3535_v15  ;;  %v3538_v26 = vadd.f32 %v3537_v9, %v7580_v51 }
 0x5fc   : > { %v3855_v4 = vpop.f32.mrf.mxu2  ;;  %v3761_v31 = vadd.f32 %v3760_v55, %v3648_v57 }
 0x5fd   : > { %v3856_v41 = vadd.f32 %v3855_v4, %v3743_v33 }
 0x5ff   : > { %3923 = vxpose.xlu1.b32.cont [7/16] (narrow) %v3856_v41, 8 }
 0x601   : > { %v3650_v62 = vpop.f32.mrf.mxu0  ;;  %v3540_v36 = vpop.f32.mrf.mxu3 }
 0x602   : > { %v3651_v8 = vadd.f32 %v3650_v62, %v3538_v26  ;;  %v3763_v63 = vpop.f32.mrf.mxu1  ;;  %v3541_v46 = vadd.f32 %v3540_v36, %v7588_v35 }
 0x604   : > { %v3858_v19 = vpop.f32.mrf.mxu2  ;;  %v3764_v13 = vadd.f32 %v3763_v63, %v3651_v8 }
 0x605   : > { %v3859_v38 = vadd.f32 %v3858_v19, %v3746_v0  ;;  %v3901_v0 = vpop.trf.xlu0 }
 0x607   : > { %3924 = vxpose.xlu1.b32.cont [8/16] (narrow) %v3859_v38, 8 }
 0x609   : > { %v3653_v60 = vpop.f32.mrf.mxu0  ;;  %v3543_v34 = vpop.f32.mrf.mxu3 }
 0x60a   : > { %v3654_v21 = vadd.f32 %v3653_v60, %v3541_v46  ;;  %v3766_v32 = vpop.f32.mrf.mxu1  ;;  %v3544_v33 = vadd.f32 %v3543_v34, %v7593_v48 }
 0x60c   : > { %v3861_v7 = vpop.f32.mrf.mxu2  ;;  %v3767_v52 = vadd.f32 %v3766_v32, %v3654_v21 }
 0x60d   : > { %v3862_v47 = vadd.f32 %v3861_v7, %v3749_v61 }
 0x60f   : > { %3925 = vxpose.xlu1.b32.cont [9/16] (narrow) %v3862_v47, 8 }
 0x611   : > { %v3769_v4 = vpop.f32.mrf.mxu3 }
 0x614   : > { %v3864_v42 = vpop.f32.mrf.mxu2 }
 0x615   : > { %v3865_v23 = vadd.f32 %v3864_v42, %v3752_v39 }
 0x617   : > { %3926 = vxpose.xlu1.b32.cont [10/16] (narrow) %v3865_v23, 8 }
 0x61c   : > { %v3867_v56 = vpop.f32.mrf.mxu2  ;;  %v3953_v17 = vpop.permute.xlu2 %3952 }
 0x61d   : > { %v3868_v10 = vadd.f32 %v3867_v56, %v3755_v1  ;;  %v3955_v19 = vadd.f32 %v3953_v17, %v3901_v0 }
 0x61f   : > { %3927 = vxpose.xlu1.b32.cont [11/16] (narrow) %v3868_v10, 8 }
 0x624   : > { %v3870_v22 = vpop.f32.mrf.mxu2 }
 0x625   : > { %v3871_v2 = vadd.f32 %v3870_v22, %v3758_v29 }
 0x627   : > { %3928 = vxpose.xlu1.b32.cont [12/16] (narrow) %v3871_v2, 8 }
 0x62c   : > { %v3873_v11 = vpop.f32.mrf.mxu2 }
 0x62d   : > { %v3874_v24 = vadd.f32 %v3873_v11, %v3761_v31 }
 0x62e   : > { %4455 = vset.pattern.permute.xlu0 %v4471_v14  ;;  %v3656_v14 = vpop.f32.mrf.mxu0 }
 0x62f   : > { %3929 = vxpose.xlu1.b32.cont [13/16] (narrow) %v3874_v24, 8  ;;  %v3657_v41 = vadd.f32 %v3656_v14, %v3544_v33 }
 0x631   : > { %v3770_v37 = vadd.f32 %v3769_v4, %v3657_v41 }
 0x634   : > { %v3876_v25 = vpop.f32.mrf.mxu2 }
 0x635   : > { %v3877_v3 = vadd.f32 %v3876_v25, %v3764_v13 }
 0x637   : > { %3930 = vxpose.xlu1.b32.cont [14/16] (narrow) %v3877_v3, 8 }
 0x63c   : > { %v3879_v51 = vpop.f32.mrf.mxu2 }
 0x63d   : > { %v3880_v6 = vadd.f32 %v3879_v51, %v3767_v52 }
 0x63f   : > { %3931 = vxpose.xlu1.b32.cont [15/16] (narrow) %v3880_v6, 8 }
 0x644   : > { %v3882_v49 = vpop.f32.mrf.mxu2 }
 0x645   : > { %v3883_v35 = vadd.f32 %v3882_v49, %v3770_v37 }
 0x647   : > { %3932 = vxpose.xlu1.b32.end [16/16] (narrow) %v3883_v35, 8 }
 0x673   : > { %v3933_v5 = vpop.trf.xlu1 }
 0x674   : > { %v3956_v28 = vadd.f32 %v3953_v17, %v3933_v5 }
 0x676   : > { %v3959_v48 = vrot.slane %v3956_v28, 4 }
 0x678   : > { %v3961_v38 = vsel %vm3960_vm3, %v3955_v19, %v3959_v48 }
 0x679   : > { %3963 = vst [vmem:[%s278_s28] sm:$0x77] %v3961_v38 }
 0x67a PF: > { %s17_s24 = sadd.s32 1, %s4467_s24  }
 0x67b   : > { %p14_p4 = scmp.ge.s32.totalorder %s17_s24, 4  }
 0x67d   :  { %16 = sbr.rel (!%p14_p4) target bundleno = 1 (0x1), region = 82 }

</bundles_post_ra>
